<compile_context>
chip_gen: v7x
topology: tpu7x:2x2x1
jax: 0.10.0
libtpu: 0.0.40
codegen_flags: <defaults>
</compile_context>

<pallas_src>
import jax
import jax.numpy as jnp
from jax import lax
from jax.experimental import pallas as pl
from jax.experimental.pallas import tpu as pltpu


# ----------------------------------------------------------------------------
# Generation-aware VMEM / tile budgets
# ----------------------------------------------------------------------------
def _round_up(x, m):
    return ((x + m - 1) // m) * m


def _vmem_capacity_bytes():
    try:
        return int(pltpu.get_tpu_info().vmem_capacity_bytes)
    except Exception:
        return 64 * 1024 * 1024          # assume smallest (v7x per-core VMEM)


_VMEM_CAP = _vmem_capacity_bytes()
if _VMEM_CAP >= 100 * 1024 * 1024:       # v5e / v6e: 128 MiB physical VMEM
    _VMEM_LIMIT = 64 * 1024 * 1024
    _CONV_TM_TARGET = 1024
    _FC_TM_TARGET = 512
else:                                    # v7x: 64 MiB physical VMEM
    _VMEM_LIMIT = 32 * 1024 * 1024
    _CONV_TM_TARGET = 512
    _FC_TM_TARGET = 256


def _pick_tile_rows(m, target):
    """Row-tile: multiple of 8, <= target, and (when there is enough work)
    <= ceil(m/2) so the 'parallel' grid axis has >= 2 steps (v7x has 2 TCs)."""
    t = min(target, _round_up(m, 8))
    if m >= 16:
        t = min(t, _round_up((m + 1) // 2, 8))
    return max(t, 8)


def _const_spec(block_shape):
    """BlockSpec for a grid-invariant operand: constant index_map, single-buffered."""
    try:
        return pl.BlockSpec(block_shape, lambda i: (0, 0),
                            pipeline_mode=pl.Buffered(1))
    except TypeError:                    # very old jax without pipeline_mode
        return pl.BlockSpec(block_shape, lambda i: (0, 0))


# ----------------------------------------------------------------------------
# Pallas kernels
# ----------------------------------------------------------------------------
def _conv_pool_kernel(p00_ref, p01_ref, p10_ref, p11_ref, w_ref, b_ref, o_ref):
    """Fused conv(3x3, pad 1) + bias + ReLU + 2x2 max-pool.

    Each p??_ref holds the bf16 im2col patches for one corner of every 2x2
    pooling window (pf pooled pixels packed per row, K zero-padded to 128-mult);
    w_ref is the matching block-diagonal bf16 (Kp_pad, 128) weight.
    max over the 4 corners == max-pool; relu(max+b) == max(relu(+b)).
    """
    w = w_ref[...]
    d00 = jnp.dot(p00_ref[...], w, preferred_element_type=jnp.float32)
    d01 = jnp.dot(p01_ref[...], w, preferred_element_type=jnp.float32)
    d10 = jnp.dot(p10_ref[...], w, preferred_element_type=jnp.float32)
    d11 = jnp.dot(p11_ref[...], w, preferred_element_type=jnp.float32)
    m = jnp.maximum(jnp.maximum(d00, d01), jnp.maximum(d10, d11))
    o_ref[...] = jnp.maximum(m + b_ref[...], 0.0).astype(o_ref.dtype)


def _fc_fused_kernel(x_ref, w1_ref, b1_ref, w2_ref, b2_ref, o_ref):
    """logits(padded to 128 lanes) = relu(x @ W1 + b1) @ W2 + b2, one kernel."""
    h = jnp.dot(x_ref[...], w1_ref[...], preferred_element_type=jnp.float32)
    h = jnp.maximum(h + b1_ref[...], 0.0)
    o = jnp.dot(h, w2_ref[...], preferred_element_type=jnp.float32) + b2_ref[...]
    o_ref[...] = o.astype(o_ref.dtype)


# ----------------------------------------------------------------------------
# Pallas wrappers
# ----------------------------------------------------------------------------
def conv3x3_relu_pool_pallas(x_nhwc, w_packed, b_packed, cout, pf):
    """Conv 3x3 / pad 1 / stride 1 + bias + ReLU + 2x2 max-pool (NHWC in/out).

    pf = pooled pixels packed per output row so that pf*cout == 128 lanes.
    Returns (N, H//2, W//2, cout) float32.
    """
    N, H, W, C = x_nhwc.shape
    assert H % 2 == 0 and W % 2 == 0
    Ho, Wo = H // 2, W // 2
    assert pf * cout == 128 and Wo % pf == 0
    K = C * 9
    Kp = K * pf
    Kp_pad = w_packed.shape[0]            # K zero-padded to multiple of 128 at init
    lanes = pf * cout
    Mr = (N * Ho * Wo) // pf

    tm = _pick_tile_rows(Mr, _CONV_TM_TARGET)
    grid = pl.cdiv(Mr, tm)
    Mr_pad = grid * tm

    # --- XLA glue (interim): corner-partitioned im2col in pooled-pixel order,
    # zero-padded to (Mr_pad, Kp_pad) and cast to bf16. ------------------------
    xp = jnp.pad(x_nhwc, ((0, 0), (1, 1), (1, 1), (0, 0)))
    corners = []
    for ry in (0, 1):
        for rx in (0, 1):
            pats = jnp.stack(
                [xp[:, ry + dy: ry + dy + H - 1: 2,
                       rx + dx: rx + dx + W - 1: 2, :]
                 for dy in range(3) for dx in range(3)],
                axis=-1)                                   # (N, Ho, Wo, C, 9)
            # K-order (ci, dy, dx) matches the OIHW weight flatten; row-major
            # reshape packs pf consecutive pooled pixels per row.
            c = pats.reshape(Mr, Kp)
            c = jnp.pad(c, ((0, Mr_pad - Mr), (0, Kp_pad - Kp)))
            corners.append(c.astype(jnp.bfloat16))

    in_specs = (
        [pl.BlockSpec((tm, Kp_pad), lambda i: (i, 0)) for _ in range(4)]
        + [_const_spec((Kp_pad, lanes)), _const_spec((1, lanes))]
    )
    out = pl.pallas_call(
        _conv_pool_kernel,
        out_shape=jax.ShapeDtypeStruct((Mr_pad, lanes), jnp.float32),
        grid_spec=pltpu.PrefetchScalarGridSpec(
            num_scalar_prefetch=0,
            grid=(grid,),
            in_specs=in_specs,
            out_specs=pl.BlockSpec((tm, lanes), lambda i: (i, 0)),
        ),
        compiler_params=pltpu.CompilerParams(
            dimension_semantics=("parallel",),
            vmem_limit_bytes=_VMEM_LIMIT),
    )(*corners, w_packed, b_packed)
    # (Mr, 128) is a pure row-major repack of (N, Ho, Wo, cout).
    return out[:Mr].reshape(N, Ho, Wo, cout)


def fc_fused_pallas(x, w1, b1, w2, b2, n_out):
    """relu(x @ w1 + b1) @ w2 + b2.  w2/b2 are lane-padded to 128; output sliced."""
    M, K1 = x.shape
    H1 = w1.shape[1]
    NOp = w2.shape[1]                      # 128 (lane-dense output)

    tm = _pick_tile_rows(M, _FC_TM_TARGET)
    grid = pl.cdiv(M, tm)
    M_pad = grid * tm
    xp = jnp.pad(x, ((0, M_pad - M), (0, 0)))

    out = pl.pallas_call(
        _fc_fused_kernel,
        out_shape=jax.ShapeDtypeStruct((M_pad, NOp), jnp.float32),
        grid_spec=pltpu.PrefetchScalarGridSpec(
            num_scalar_prefetch=0,
            grid=(grid,),
            in_specs=[
                pl.BlockSpec((tm, K1), lambda i: (i, 0)),
                _const_spec((K1, H1)),
                _const_spec((1, H1)),
                _const_spec((H1, NOp)),
                _const_spec((1, NOp)),
            ],
            out_specs=pl.BlockSpec((tm, NOp), lambda i: (i, 0)),
        ),
        compiler_params=pltpu.CompilerParams(
            dimension_semantics=("parallel",),
            vmem_limit_bytes=_VMEM_LIMIT),
    )(xp, w1, b1, w2, b2)
    return out[:M, :n_out]


# ----------------------------------------------------------------------------
# Parameters (raw torch-layout weights + Pallas-packed forms, built once)
# ----------------------------------------------------------------------------
def init_params(key):
    ks = jax.random.split(key, 8)
    s = 0.05
    conv1_w = s * jax.random.normal(ks[0], (32, 3, 3, 3), jnp.float32)      # OIHW
    conv1_b = s * jax.random.normal(ks[1], (32,), jnp.float32)
    conv2_w = s * jax.random.normal(ks[2], (64, 32, 3, 3), jnp.float32)     # OIHW
    conv2_b = s * jax.random.normal(ks[3], (64,), jnp.float32)
    fc1_w = s * jax.random.normal(ks[4], (256, 64 * 8 * 8), jnp.float32)    # torch (out,in)
    fc1_b = s * jax.random.normal(ks[5], (256,), jnp.float32)
    fc2_w = s * jax.random.normal(ks[6], (10, 256), jnp.float32)
    fc2_b = s * jax.random.normal(ks[7], (10,), jnp.float32)

    def pack_conv(w_oihw, b, pf):
        cout, cin = w_oihw.shape[0], w_oihw.shape[1]
        w2d = w_oihw.reshape(cout, cin * 9).T                   # (K, Cout), K=(ci,dy,dx)
        # block-diagonal: pf pooled pixels share the weight, output lanes = pf*Cout = 128
        w_big = jnp.kron(jnp.eye(pf, dtype=w2d.dtype), w2d)     # (pf*K, pf*Cout)
        kp_pad = _round_up(w_big.shape[0], 128)                 # lane-aligned K
        w_big = jnp.pad(w_big, ((0, kp_pad - w_big.shape[0]), (0, 0)))
        b_big = jnp.tile(b, pf).reshape(1, pf * cout)
        return w_big.astype(jnp.bfloat16), b_big

    conv1_wp, conv1_bp = pack_conv(conv1_w, conv1_b, 4)         # (128, 128) bf16
    conv2_wp, conv2_bp = pack_conv(conv2_w, conv2_b, 2)         # (640, 128) bf16

    # Permute fc1 rows (c,h,w) -> (h,w,c) so it consumes the NHWC-flat activation
    # directly (no per-forward NHWC->NCHW transpose).
    fc1_wp = jnp.transpose(fc1_w.reshape(256, 64, 8, 8), (2, 3, 1, 0)).reshape(4096, 256)
    # fc2 lane-padded to 128 output lanes (unmasked stores); sliced to 10 outside.
    fc2_wp = jnp.pad(fc2_w.T, ((0, 0), (0, 128 - 10)))
    fc2_bp = jnp.pad(fc2_b.reshape(1, 10), ((0, 0), (0, 128 - 10)))

    return {
        # raw (for the pure-JAX reference)
        "conv1_w": conv1_w, "conv1_b": conv1_b,
        "conv2_w": conv2_w, "conv2_b": conv2_b,
        "fc1_w": fc1_w, "fc1_b": fc1_b,
        "fc2_w": fc2_w, "fc2_b": fc2_b,
        # packed (for the Pallas path)
        "conv1_wp": conv1_wp, "conv1_bp": conv1_bp,
        "conv2_wp": conv2_wp, "conv2_bp": conv2_bp,
        "fc1_wp": fc1_wp, "fc1_bp": fc1_b.reshape(1, 256),
        "fc2_wp": fc2_wp, "fc2_bp": fc2_bp,
    }


# ----------------------------------------------------------------------------
# Forward pass (Pallas): 3 pallas_calls total
# ----------------------------------------------------------------------------
@jax.jit
def surrogate_cnn_forward(x_nchw, params):
    N = x_nchw.shape[0]
    x = jnp.transpose(x_nchw, (0, 2, 3, 1))                                  # NHWC (N,32,32,3)
    y = conv3x3_relu_pool_pallas(x, params["conv1_wp"], params["conv1_bp"],
                                 cout=32, pf=4)                              # (N,16,16,32)
    y = conv3x3_relu_pool_pallas(y, params["conv2_wp"], params["conv2_bp"],
                                 cout=64, pf=2)                              # (N,8,8,64)
    flat = y.reshape(N, 64 * 8 * 8)                                          # NHWC-flat
    return fc_fused_pallas(flat, params["fc1_wp"], params["fc1_bp"],
                           params["fc2_wp"], params["fc2_bp"], n_out=10)     # (N,10)


# ----------------------------------------------------------------------------
# Pure-JAX reference (matches the PyTorch module semantics, all f32)
# ----------------------------------------------------------------------------
def reference_forward(x_nchw, p):
    def conv(x, w, b):
        y = lax.conv_general_dilated(
            x, w, window_strides=(1, 1), padding="SAME",
            dimension_numbers=("NCHW", "OIHW", "NCHW"))
        return jax.nn.relu(y + b[None, :, None, None])

    def pool(x):
        return lax.reduce_window(
            x, -jnp.inf, lax.max, (1, 1, 2, 2), (1, 1, 2, 2), "VALID")

    y = pool(conv(x_nchw, p["conv1_w"], p["conv1_b"]))
    y = pool(conv(y, p["conv2_w"], p["conv2_b"]))
    flat = y.reshape(y.shape[0], -1)                       # NCHW flatten (torch order)
    h = jax.nn.relu(flat @ p["fc1_w"].T + p["fc1_b"])
    return h @ p["fc2_w"].T + p["fc2_b"]


if __name__ == "__main__":
    # fc1 expects 64*8*8 features => 32x32 spatial input; small batch of 2.
    x = jax.random.normal(jax.random.PRNGKey(0), (2, 3, 32, 32), jnp.float32)
    params = init_params(jax.random.PRNGKey(1))

    out = jax.block_until_ready(surrogate_cnn_forward(x, params))
    assert out.shape == (2, 10) and out.dtype == jnp.float32

    ref = reference_forward(x, params)
    # Conv patches/weights are bf16 (f32 accumulation) vs. the all-f32 reference.
    assert jnp.allclose(out, ref, rtol=2e-2, atol=2e-2), "mismatch vs reference"

    print("KERNEL_OK")
</pallas_src>

<mosaic_0001>
module attributes {stable_mosaic.version = 11 : i64} {
  func.func @_conv_pool_kernel(%arg0: i32, %arg1: memref<64x128xbf16, #tpu.memory_space<vmem>>, %arg2: memref<64x128xbf16, #tpu.memory_space<vmem>>, %arg3: memref<64x128xbf16, #tpu.memory_space<vmem>>, %arg4: memref<64x128xbf16, #tpu.memory_space<vmem>>, %arg5: memref<128x128xbf16, #tpu.memory_space<vmem>>, %arg6: memref<1x128xf32, #tpu.memory_space<vmem>>, %arg7: memref<64x128xf32, #tpu.memory_space<vmem>>) attributes {dimension_semantics = [#tpu.dimension_semantics<parallel>], iteration_bounds = array<i64: 2>, scalar_prefetch = 0 : i64, scratch_operands = 0 : i64, tpu.core_type = #tpu.core_type<tc>, window_params = [{transform_indices = @transform_0, window_bounds = array<i64: 64, 128>}, {transform_indices = @transform_1, window_bounds = array<i64: 64, 128>}, {transform_indices = @transform_2, window_bounds = array<i64: 64, 128>}, {transform_indices = @transform_3, window_bounds = array<i64: 64, 128>}, {pipeline_mode = #tpu.pipeline_mode<synchronous>, transform_indices = @transform_4, window_bounds = array<i64: 128, 128>}, {pipeline_mode = #tpu.pipeline_mode<synchronous>, transform_indices = @transform_5, window_bounds = array<i64: 1, 128>}, {transform_indices = @transform_6, window_bounds = array<i64: 64, 128>}]} {
    %c0 = arith.constant 0 : index
    %c0_0 = arith.constant 0 : index
    %0 = vector.load %arg5[%c0, %c0_0] : memref<128x128xbf16, #tpu.memory_space<vmem>>, vector<128x128xbf16>
    %c0_1 = arith.constant 0 : index
    %c0_2 = arith.constant 0 : index
    %1 = vector.load %arg1[%c0_1, %c0_2] : memref<64x128xbf16, #tpu.memory_space<vmem>>, vector<64x128xbf16>
    %cst = arith.constant dense<0.000000e+00> : vector<64x128xf32>
    %2 = tpu.matmul %1, %0, %cst {dimension_numbers = #tpu.dot_dimension_numbers<[1], [0], [0], [1], [0, 0, 1, 1], [], []>} : vector<64x128xbf16>, vector<128x128xbf16>, vector<64x128xf32> -> vector<64x128xf32>
    %c0_3 = arith.constant 0 : index
    %c0_4 = arith.constant 0 : index
    %3 = vector.load %arg2[%c0_3, %c0_4] : memref<64x128xbf16, #tpu.memory_space<vmem>>, vector<64x128xbf16>
    %cst_5 = arith.constant dense<0.000000e+00> : vector<64x128xf32>
    %4 = tpu.matmul %3, %0, %cst_5 {dimension_numbers = #tpu.dot_dimension_numbers<[1], [0], [0], [1], [0, 0, 1, 1], [], []>} : vector<64x128xbf16>, vector<128x128xbf16>, vector<64x128xf32> -> vector<64x128xf32>
    %c0_6 = arith.constant 0 : index
    %c0_7 = arith.constant 0 : index
    %5 = vector.load %arg3[%c0_6, %c0_7] : memref<64x128xbf16, #tpu.memory_space<vmem>>, vector<64x128xbf16>
    %cst_8 = arith.constant dense<0.000000e+00> : vector<64x128xf32>
    %6 = tpu.matmul %5, %0, %cst_8 {dimension_numbers = #tpu.dot_dimension_numbers<[1], [0], [0], [1], [0, 0, 1, 1], [], []>} : vector<64x128xbf16>, vector<128x128xbf16>, vector<64x128xf32> -> vector<64x128xf32>
    %c0_9 = arith.constant 0 : index
    %c0_10 = arith.constant 0 : index
    %7 = vector.load %arg4[%c0_9, %c0_10] : memref<64x128xbf16, #tpu.memory_space<vmem>>, vector<64x128xbf16>
    %cst_11 = arith.constant dense<0.000000e+00> : vector<64x128xf32>
    %8 = tpu.matmul %7, %0, %cst_11 {dimension_numbers = #tpu.dot_dimension_numbers<[1], [0], [0], [1], [0, 0, 1, 1], [], []>} : vector<64x128xbf16>, vector<128x128xbf16>, vector<64x128xf32> -> vector<64x128xf32>
    %9 = arith.maximumf %2, %4 : vector<64x128xf32>
    %10 = arith.maximumf %6, %8 : vector<64x128xf32>
    %11 = arith.maximumf %9, %10 : vector<64x128xf32>
    %c0_12 = arith.constant 0 : index
    %c0_13 = arith.constant 0 : index
    %12 = vector.load %arg6[%c0_12, %c0_13] : memref<1x128xf32, #tpu.memory_space<vmem>>, vector<1x128xf32>
    %13 = vector.broadcast %12 : vector<1x128xf32> to vector<64x128xf32>
    %14 = arith.addf %11, %13 : vector<64x128xf32>
    %cst_14 = arith.constant 0.000000e+00 : f32
    %15 = vector.broadcast %cst_14 : f32 to vector<64x128xf32>
    %16 = arith.maximumf %14, %15 : vector<64x128xf32>
    %c0_15 = arith.constant 0 : index
    %c0_16 = arith.constant 0 : index
    %17 = vector.load %arg7[%c0_15, %c0_16] : memref<64x128xf32, #tpu.memory_space<vmem>>, vector<64x128xf32>
    tpu.vector_store %arg7[%c0_15, %c0_16], %16 {strides = array<i32>} : memref<64x128xf32, #tpu.memory_space<vmem>>, vector<64x128xf32>,
    return
  }
  func.func @transform_0(%arg0: i32) -> (i32, i32) {
    %c0_i32 = arith.constant 0 : i32
    %c0_i32_0 = arith.constant 0 : i32
    return %arg0, %c0_i32 : i32, i32
  }
  func.func @transform_1(%arg0: i32) -> (i32, i32) {
    %c0_i32 = arith.constant 0 : i32
    %c0_i32_0 = arith.constant 0 : i32
    return %arg0, %c0_i32 : i32, i32
  }
  func.func @transform_2(%arg0: i32) -> (i32, i32) {
    %c0_i32 = arith.constant 0 : i32
    %c0_i32_0 = arith.constant 0 : i32
    return %arg0, %c0_i32 : i32, i32
  }
  func.func @transform_3(%arg0: i32) -> (i32, i32) {
    %c0_i32 = arith.constant 0 : i32
    %c0_i32_0 = arith.constant 0 : i32
    return %arg0, %c0_i32 : i32, i32
  }
  func.func @transform_4(%arg0: i32) -> (i32, i32) {
    %c0_i32 = arith.constant 0 : i32
    %c0_i32_0 = arith.constant 0 : i32
    %c0_i32_1 = arith.constant 0 : i32
    return %c0_i32, %c0_i32_0 : i32, i32
  }
  func.func @transform_5(%arg0: i32) -> (i32, i32) {
    %c0_i32 = arith.constant 0 : i32
    %c0_i32_0 = arith.constant 0 : i32
    %c0_i32_1 = arith.constant 0 : i32
    return %c0_i32, %c0_i32_0 : i32, i32
  }
  func.func @transform_6(%arg0: i32) -> (i32, i32) {
    %c0_i32 = arith.constant 0 : i32
    %c0_i32_0 = arith.constant 0 : i32
    return %arg0, %c0_i32 : i32, i32
  }
}

module attributes {stable_mosaic.version = 11 : i64} {
  func.func @_conv_pool_kernel(%arg0: i32, %arg1: memref<32x640xbf16, #tpu.memory_space<vmem>>, %arg2: memref<32x640xbf16, #tpu.memory_space<vmem>>, %arg3: memref<32x640xbf16, #tpu.memory_space<vmem>>, %arg4: memref<32x640xbf16, #tpu.memory_space<vmem>>, %arg5: memref<640x128xbf16, #tpu.memory_space<vmem>>, %arg6: memref<1x128xf32, #tpu.memory_space<vmem>>, %arg7: memref<32x128xf32, #tpu.memory_space<vmem>>) attributes {dimension_semantics = [#tpu.dimension_semantics<parallel>], iteration_bounds = array<i64: 2>, scalar_prefetch = 0 : i64, scratch_operands = 0 : i64, tpu.core_type = #tpu.core_type<tc>, window_params = [{transform_indices = @transform_0, window_bounds = array<i64: 32, 640>}, {transform_indices = @transform_1, window_bounds = array<i64: 32, 640>}, {transform_indices = @transform_2, window_bounds = array<i64: 32, 640>}, {transform_indices = @transform_3, window_bounds = array<i64: 32, 640>}, {pipeline_mode = #tpu.pipeline_mode<synchronous>, transform_indices = @transform_4, window_bounds = array<i64: 640, 128>}, {pipeline_mode = #tpu.pipeline_mode<synchronous>, transform_indices = @transform_5, window_bounds = array<i64: 1, 128>}, {transform_indices = @transform_6, window_bounds = array<i64: 32, 128>}]} {
    %c0 = arith.constant 0 : index
    %c0_0 = arith.constant 0 : index
    %0 = vector.load %arg5[%c0, %c0_0] : memref<640x128xbf16, #tpu.memory_space<vmem>>, vector<640x128xbf16>
    %c0_1 = arith.constant 0 : index
    %c0_2 = arith.constant 0 : index
    %1 = vector.load %arg1[%c0_1, %c0_2] : memref<32x640xbf16, #tpu.memory_space<vmem>>, vector<32x640xbf16>
    %cst = arith.constant dense<0.000000e+00> : vector<32x128xf32>
    %2 = tpu.matmul %1, %0, %cst {dimension_numbers = #tpu.dot_dimension_numbers<[1], [0], [0], [1], [0, 0, 1, 1], [], []>} : vector<32x640xbf16>, vector<640x128xbf16>, vector<32x128xf32> -> vector<32x128xf32>
    %c0_3 = arith.constant 0 : index
    %c0_4 = arith.constant 0 : index
    %3 = vector.load %arg2[%c0_3, %c0_4] : memref<32x640xbf16, #tpu.memory_space<vmem>>, vector<32x640xbf16>
    %cst_5 = arith.constant dense<0.000000e+00> : vector<32x128xf32>
    %4 = tpu.matmul %3, %0, %cst_5 {dimension_numbers = #tpu.dot_dimension_numbers<[1], [0], [0], [1], [0, 0, 1, 1], [], []>} : vector<32x640xbf16>, vector<640x128xbf16>, vector<32x128xf32> -> vector<32x128xf32>
    %c0_6 = arith.constant 0 : index
    %c0_7 = arith.constant 0 : index
    %5 = vector.load %arg3[%c0_6, %c0_7] : memref<32x640xbf16, #tpu.memory_space<vmem>>, vector<32x640xbf16>
    %cst_8 = arith.constant dense<0.000000e+00> : vector<32x128xf32>
    %6 = tpu.matmul %5, %0, %cst_8 {dimension_numbers = #tpu.dot_dimension_numbers<[1], [0], [0], [1], [0, 0, 1, 1], [], []>} : vector<32x640xbf16>, vector<640x128xbf16>, vector<32x128xf32> -> vector<32x128xf32>
    %c0_9 = arith.constant 0 : index
    %c0_10 = arith.constant 0 : index
    %7 = vector.load %arg4[%c0_9, %c0_10] : memref<32x640xbf16, #tpu.memory_space<vmem>>, vector<32x640xbf16>
    %cst_11 = arith.constant dense<0.000000e+00> : vector<32x128xf32>
    %8 = tpu.matmul %7, %0, %cst_11 {dimension_numbers = #tpu.dot_dimension_numbers<[1], [0], [0], [1], [0, 0, 1, 1], [], []>} : vector<32x640xbf16>, vector<640x128xbf16>, vector<32x128xf32> -> vector<32x128xf32>
    %9 = arith.maximumf %2, %4 : vector<32x128xf32>
    %10 = arith.maximumf %6, %8 : vector<32x128xf32>
    %11 = arith.maximumf %9, %10 : vector<32x128xf32>
    %c0_12 = arith.constant 0 : index
    %c0_13 = arith.constant 0 : index
    %12 = vector.load %arg6[%c0_12, %c0_13] : memref<1x128xf32, #tpu.memory_space<vmem>>, vector<1x128xf32>
    %13 = vector.broadcast %12 : vector<1x128xf32> to vector<32x128xf32>
    %14 = arith.addf %11, %13 : vector<32x128xf32>
    %cst_14 = arith.constant 0.000000e+00 : f32
    %15 = vector.broadcast %cst_14 : f32 to vector<32x128xf32>
    %16 = arith.maximumf %14, %15 : vector<32x128xf32>
    %c0_15 = arith.constant 0 : index
    %c0_16 = arith.constant 0 : index
    %17 = vector.load %arg7[%c0_15, %c0_16] : memref<32x128xf32, #tpu.memory_space<vmem>>, vector<32x128xf32>
    tpu.vector_store %arg7[%c0_15, %c0_16], %16 {strides = array<i32>} : memref<32x128xf32, #tpu.memory_space<vmem>>, vector<32x128xf32>,
    return
  }
  func.func @transform_0(%arg0: i32) -> (i32, i32) {
    %c0_i32 = arith.constant 0 : i32
    %c0_i32_0 = arith.constant 0 : i32
    return %arg0, %c0_i32 : i32, i32
  }
  func.func @transform_1(%arg0: i32) -> (i32, i32) {
    %c0_i32 = arith.constant 0 : i32
    %c0_i32_0 = arith.constant 0 : i32
    return %arg0, %c0_i32 : i32, i32
  }
  func.func @transform_2(%arg0: i32) -> (i32, i32) {
    %c0_i32 = arith.constant 0 : i32
    %c0_i32_0 = arith.constant 0 : i32
    return %arg0, %c0_i32 : i32, i32
  }
  func.func @transform_3(%arg0: i32) -> (i32, i32) {
    %c0_i32 = arith.constant 0 : i32
    %c0_i32_0 = arith.constant 0 : i32
    return %arg0, %c0_i32 : i32, i32
  }
  func.func @transform_4(%arg0: i32) -> (i32, i32) {
    %c0_i32 = arith.constant 0 : i32
    %c0_i32_0 = arith.constant 0 : i32
    %c0_i32_1 = arith.constant 0 : i32
    return %c0_i32, %c0_i32_0 : i32, i32
  }
  func.func @transform_5(%arg0: i32) -> (i32, i32) {
    %c0_i32 = arith.constant 0 : i32
    %c0_i32_0 = arith.constant 0 : i32
    %c0_i32_1 = arith.constant 0 : i32
    return %c0_i32, %c0_i32_0 : i32, i32
  }
  func.func @transform_6(%arg0: i32) -> (i32, i32) {
    %c0_i32 = arith.constant 0 : i32
    %c0_i32_0 = arith.constant 0 : i32
    return %arg0, %c0_i32 : i32, i32
  }
}

module attributes {stable_mosaic.version = 11 : i64} {
  func.func @_fc_fused_kernel(%arg0: i32, %arg1: memref<8x4096xf32, #tpu.memory_space<vmem>>, %arg2: memref<4096x256xf32, #tpu.memory_space<vmem>>, %arg3: memref<1x256xf32, #tpu.memory_space<vmem>>, %arg4: memref<256x128xf32, #tpu.memory_space<vmem>>, %arg5: memref<1x128xf32, #tpu.memory_space<vmem>>, %arg6: memref<8x128xf32, #tpu.memory_space<vmem>>) attributes {dimension_semantics = [#tpu.dimension_semantics<parallel>], iteration_bounds = array<i64: 1>, scalar_prefetch = 0 : i64, scratch_operands = 0 : i64, tpu.core_type = #tpu.core_type<tc>, window_params = [{transform_indices = @transform_0, window_bounds = array<i64: 8, 4096>}, {pipeline_mode = #tpu.pipeline_mode<synchronous>, transform_indices = @transform_1, window_bounds = array<i64: 4096, 256>}, {pipeline_mode = #tpu.pipeline_mode<synchronous>, transform_indices = @transform_2, window_bounds = array<i64: 1, 256>}, {pipeline_mode = #tpu.pipeline_mode<synchronous>, transform_indices = @transform_3, window_bounds = array<i64: 256, 128>}, {pipeline_mode = #tpu.pipeline_mode<synchronous>, transform_indices = @transform_4, window_bounds = array<i64: 1, 128>}, {transform_indices = @transform_5, window_bounds = array<i64: 8, 128>}]} {
    %c0 = arith.constant 0 : index
    %c0_0 = arith.constant 0 : index
    %0 = vector.load %arg1[%c0, %c0_0] : memref<8x4096xf32, #tpu.memory_space<vmem>>, vector<8x4096xf32>
    %c0_1 = arith.constant 0 : index
    %c0_2 = arith.constant 0 : index
    %1 = vector.load %arg2[%c0_1, %c0_2] : memref<4096x256xf32, #tpu.memory_space<vmem>>, vector<4096x256xf32>
    %cst = arith.constant dense<0.000000e+00> : vector<8x256xf32>
    %2 = tpu.matmul %0, %1, %cst {dimension_numbers = #tpu.dot_dimension_numbers<[1], [0], [0], [1], [0, 0, 1, 1], [], []>} : vector<8x4096xf32>, vector<4096x256xf32>, vector<8x256xf32> -> vector<8x256xf32>
    %c0_3 = arith.constant 0 : index
    %c0_4 = arith.constant 0 : index
    %3 = vector.load %arg3[%c0_3, %c0_4] : memref<1x256xf32, #tpu.memory_space<vmem>>, vector<1x256xf32>
    %4 = vector.broadcast %3 : vector<1x256xf32> to vector<8x256xf32>
    %5 = arith.addf %2, %4 : vector<8x256xf32>
    %cst_5 = arith.constant 0.000000e+00 : f32
    %6 = vector.broadcast %cst_5 : f32 to vector<8x256xf32>
    %7 = arith.maximumf %5, %6 : vector<8x256xf32>
    %c0_6 = arith.constant 0 : index
    %c0_7 = arith.constant 0 : index
    %8 = vector.load %arg4[%c0_6, %c0_7] : memref<256x128xf32, #tpu.memory_space<vmem>>, vector<256x128xf32>
    %cst_8 = arith.constant dense<0.000000e+00> : vector<8x128xf32>
    %9 = tpu.matmul %7, %8, %cst_8 {dimension_numbers = #tpu.dot_dimension_numbers<[1], [0], [0], [1], [0, 0, 1, 1], [], []>} : vector<8x256xf32>, vector<256x128xf32>, vector<8x128xf32> -> vector<8x128xf32>
    %c0_9 = arith.constant 0 : index
    %c0_10 = arith.constant 0 : index
    %10 = vector.load %arg5[%c0_9, %c0_10] : memref<1x128xf32, #tpu.memory_space<vmem>>, vector<1x128xf32>
    %11 = vector.broadcast %10 : vector<1x128xf32> to vector<8x128xf32>
    %12 = arith.addf %9, %11 : vector<8x128xf32>
    %c0_11 = arith.constant 0 : index
    %c0_12 = arith.constant 0 : index
    %13 = vector.load %arg6[%c0_11, %c0_12] : memref<8x128xf32, #tpu.memory_space<vmem>>, vector<8x128xf32>
    tpu.vector_store %arg6[%c0_11, %c0_12], %12 {strides = array<i32>} : memref<8x128xf32, #tpu.memory_space<vmem>>, vector<8x128xf32>,
    return
  }
  func.func @transform_0(%arg0: i32) -> (i32, i32) {
    %c0_i32 = arith.constant 0 : i32
    %c0_i32_0 = arith.constant 0 : i32
    return %arg0, %c0_i32 : i32, i32
  }
  func.func @transform_1(%arg0: i32) -> (i32, i32) {
    %c0_i32 = arith.constant 0 : i32
    %c0_i32_0 = arith.constant 0 : i32
    %c0_i32_1 = arith.constant 0 : i32
    return %c0_i32, %c0_i32_0 : i32, i32
  }
  func.func @transform_2(%arg0: i32) -> (i32, i32) {
    %c0_i32 = arith.constant 0 : i32
    %c0_i32_0 = arith.constant 0 : i32
    %c0_i32_1 = arith.constant 0 : i32
    return %c0_i32, %c0_i32_0 : i32, i32
  }
  func.func @transform_3(%arg0: i32) -> (i32, i32) {
    %c0_i32 = arith.constant 0 : i32
    %c0_i32_0 = arith.constant 0 : i32
    %c0_i32_1 = arith.constant 0 : i32
    return %c0_i32, %c0_i32_0 : i32, i32
  }
  func.func @transform_4(%arg0: i32) -> (i32, i32) {
    %c0_i32 = arith.constant 0 : i32
    %c0_i32_0 = arith.constant 0 : i32
    %c0_i32_1 = arith.constant 0 : i32
    return %c0_i32, %c0_i32_0 : i32, i32
  }
  func.func @transform_5(%arg0: i32) -> (i32, i32) {
    %c0_i32 = arith.constant 0 : i32
    %c0_i32_0 = arith.constant 0 : i32
    return %arg0, %c0_i32 : i32, i32
  }
}

</mosaic_0001>

<bundles_post_ra>
// kernel: surrogate_cnn_forward.3
= control target key start
LH: loop header
LB: loop body
LE: loop exit
PB: predicated region body
PF: predicated region fallthrough
CT: control target
= control target key end

     0   :  { %s1182_s21 = smov 0   ;;  %s1303_s0 = inlined_call_operand.vmem [shape: bf16[128,128], index: 0, kind: input, shape index: {}]   ;;  %s1304_s1 = inlined_call_operand.vmem [shape: bf16[128,128], index: 1, kind: input, shape index: {}]   ;;  %s1305_s2 = inlined_call_operand.vmem [shape: bf16[128,128], index: 2, kind: input, shape index: {}]   ;;  %s1306_s3 = inlined_call_operand.vmem [shape: bf16[128,128], index: 3, kind: input, shape index: {}]   ;;  %s1307_s4 = inlined_call_operand.vmem [shape: bf16[128,128], index: 4, kind: input, shape index: {}]   ;;  %s1308_s5 = inlined_call_operand.vmem [shape: f32[1,128], index: 5, kind: input, shape index: {}]   ;;  %s1309_s6 = inlined_call_operand.vmem [shape: f32[128,128], index: 6, kind: output, shape index: {}]  }
   0x1 LB: > { %s921_s22 = sadd.s32 4294967295, %s1145_s21   ;;  %p925_p0 = scmp.ge.s32.totalorder %s1145_s21, 1  ;;  %s1145_s21 = sphi %s1182_s21, %s16_s21  }
   0x2   : > { %p246_p1 = scmp.lt.s32.totalorder %s1145_s21, 3 }
   0x4   : > { %p247_p2 = pnand %p925_p0, %p246_p1 }
   0x5   : > { %v1115_v0 = vld [vmem:[%s1307_s4] sm:$0xff] (!%p247_p2)   ;;  %s926_s25 = sshll.u32 (!%p247_p2), %s921_s22, 3  ;;  %v1196_v1 = vld [vmem:[%s1307_s4 + $0x8] sm:$0xff] (!%p247_p2)   ;;  %v1205_v2 = vld [vmem:[%s1307_s4 + $0x10] sm:$0xff] (!%p247_p2)  }
   0x6   : > { %250 = sbr.rel (%p247_p2) target bundleno = 302 (0x12e), region = 44  ;;  %p292_p3 = scmp.lt.s32.totalorder (!%p247_p2), %s926_s25, 15  ;;  %1011 = vmatprep.subr.bf16.mxu0 (!%p247_p2), %v1115_v0  ;;  %1035 = vmatprep.subr.bf16.mxu1 (!%p247_p2), %v1115_v0  ;;  %v1223_v3 = vld [vmem:[%s1307_s4 + $0x18] sm:$0xff] (!%p247_p2)   ;;  %v1119_v6 = vld [vmem:[%s1307_s4 + $0x20] sm:$0xff] (!%p247_p2)   ;;  %v1120_v7 = vld [vmem:[%s1307_s4 + $0x28] sm:$0xff] (!%p247_p2)  }
   0x7   : > { %1012 = vmatpush3.bf16.msra.mxu0 (!%p247_p2), %v1115_v0  ;;  %1036 = vmatpush3.bf16.msra.mxu1 (!%p247_p2), %v1115_v0  ;;  %v1121_v8 = vld [vmem:[%s1307_s4 + $0x30] sm:$0xff] (!%p247_p2)   ;;  %v1122_v9 = vld [vmem:[%s1307_s4 + $0x38] sm:$0xff] (!%p247_p2)   ;;  %v960_v53 = vld [vmem:[%s1308_s5] ss:$0 sm:$0xff] (!%p247_p2) }
   0x8   : > { %1013 = vmatprep.subr.bf16.mxu0 (!%p247_p2), %v1196_v1  ;;  %1037 = vmatprep.subr.bf16.mxu1 (!%p247_p2), %v1196_v1 }
   0xb   : > { %1014 = vmatpush3.bf16.msra.mxu0 (!%p247_p2), %v1196_v1  ;;  %1038 = vmatpush3.bf16.msra.mxu1 (!%p247_p2), %v1196_v1 }
   0xc   : > { %1015 = vmatprep.subr.bf16.mxu0 (!%p247_p2), %v1205_v2  ;;  %1039 = vmatprep.subr.bf16.mxu1 (!%p247_p2), %v1205_v2 }
   0xd   : > { %s1311_s25 = smov (!%p292_p3, %s926_s25), 15 }
   0xe   : > { %s927_s30 = sshll.u32 %s1311_s25, 2 }
   0xf   : > { %s1211_s9 = scalar_lea.vmem %s1303_s0, %s927_s30  ;;  %s1216_s12 = scalar_lea.vmem %s1304_s1, %s927_s30  ;;  %1016 = vmatpush3.bf16.msra.mxu0 %v1205_v2  ;;  %1040 = vmatpush3.bf16.msra.mxu1 %v1205_v2 }
  0x10   : > { %v1123_v4 = vld [vmem:[%s1211_s9] sm:$0xff]   ;;  %1017 = vmatprep.subr.bf16.mxu0 %v1223_v3  ;;  %1041 = vmatprep.subr.bf16.mxu1 %v1223_v3  ;;  %s1241_s19 = scalar_lea.vmem %s1305_s2, %s927_s30  ;;  %s1249_s26 = scalar_lea.vmem %s1306_s3, %s927_s30  ;;  %v1125_v10 = vld [vmem:[%s1211_s9 + $0x8] sm:$0xff]   ;;  %v1127_v12 = vld [vmem:[%s1211_s9 + $0x10] sm:$0xff]  }
  0x11   : > { %v1124_v5 = vld [vmem:[%s1216_s12] sm:$0xff]   ;;  %1027 = vmatprep.mubr.bf16.mxu0 %v1123_v4  ;;  %v1126_v11 = vld [vmem:[%s1216_s12 + $0x8] sm:$0xff]   ;;  %v1128_v13 = vld [vmem:[%s1216_s12 + $0x10] sm:$0xff]  }
  0x12   : > { %1051 = vmatprep.mubr.bf16.mxu1 %v1124_v5  ;;  %v1129_v14 = vld [vmem:[%s1211_s9 + $0x18] sm:$0xff]   ;;  %v1131_v16 = vld [vmem:[%s1241_s19] sm:$0xff]   ;;  %v1133_v18 = vld [vmem:[%s1241_s19 + $0x8] sm:$0xff]   ;;  %s935_s9 = sshll.u32 %s1311_s25, 3 }
  0x13   : > { %1018 = vmatpush3.bf16.msra.mxu0 %v1223_v3  ;;  %1042 = vmatpush3.bf16.msra.mxu1 %v1223_v3  ;;  %v1130_v15 = vld [vmem:[%s1216_s12 + $0x18] sm:$0xff]   ;;  %v1132_v17 = vld [vmem:[%s1249_s26] sm:$0xff]   ;;  %v1134_v19 = vld [vmem:[%s1249_s26 + $0x8] sm:$0xff]   ;;  %s1290_s12 = scalar_lea.vmem %s1309_s6, %s935_s9 }
  0x14   : > { %1019 = vmatprep.subr.bf16.mxu0 %v1119_v6  ;;  %1043 = vmatprep.subr.bf16.mxu1 %v1119_v6  ;;  %v1135_v20 = vld [vmem:[%s1241_s19 + $0x10] sm:$0xff]   ;;  %v1137_v22 = vld [vmem:[%s1241_s19 + $0x18] sm:$0xff]  }
  0x15   : > { %v1136_v21 = vld [vmem:[%s1249_s26 + $0x10] sm:$0xff]   ;;  %v1138_v23 = vld [vmem:[%s1249_s26 + $0x18] sm:$0xff]  }
  0x17   : > { %1020 = vmatpush3.bf16.msra.mxu0 %v1119_v6  ;;  %1044 = vmatpush3.bf16.msra.mxu1 %v1119_v6 }
  0x18   : > { %1021 = vmatprep.subr.bf16.mxu0 %v1120_v7  ;;  %1045 = vmatprep.subr.bf16.mxu1 %v1120_v7 }
  0x1b   : > { %1022 = vmatpush3.bf16.msra.mxu0 %v1120_v7  ;;  %1046 = vmatpush3.bf16.msra.mxu1 %v1120_v7 }
  0x1c   : > { %1023 = vmatprep.subr.bf16.mxu0 %v1121_v8  ;;  %1047 = vmatprep.subr.bf16.mxu1 %v1121_v8 }
  0x1f   : > { %1024 = vmatpush3.bf16.msra.mxu0 %v1121_v8  ;;  %1048 = vmatpush3.bf16.msra.mxu1 %v1121_v8 }
  0x20   : > { %1025 = vmatprep.subr.bf16.mxu0 %v1122_v9  ;;  %1049 = vmatprep.subr.bf16.mxu1 %v1122_v9 }
  0x23   : > { %1026 = vmatpush3.bf16.msra.mxu0 %v1122_v9  ;;  %1050 = vmatpush3.bf16.msra.mxu1 %v1122_v9 }
  0x24   : > { %1059 = vmatprep.subr.bf16.mxu0 %v1115_v0  ;;  %1083 = vmatprep.subr.bf16.mxu1 %v1115_v0 }
  0x26   : > { %1028 = vmatmul.mubr.bf16.vlgmr.msra.gmra.mrb[0].mxu0 %v1125_v10  ;;  %1052 = vmatmul.mubr.bf16.vlgmr.msra.gmra.mrb[0].mxu1 %v1126_v11 }
  0x27   : > { %1060 = vmatpush3.bf16.msra.mxu0 %v1115_v0  ;;  %1084 = vmatpush3.bf16.msra.mxu1 %v1115_v0 }
  0x28   : > { %1061 = vmatprep.subr.bf16.mxu0 %v1196_v1  ;;  %1085 = vmatprep.subr.bf16.mxu1 %v1196_v1 }
  0x29   : > { %1031 = vmatprep.mubr.bf16.mxu0 %v1127_v12  ;;  %1055 = vmatprep.mubr.bf16.mxu1 %v1128_v13 }
  0x2b   : > { %1062 = vmatpush3.bf16.msra.mxu0 %v1196_v1  ;;  %1086 = vmatpush3.bf16.msra.mxu1 %v1196_v1 }
  0x2c   : > { %1063 = vmatprep.subr.bf16.mxu0 %v1205_v2  ;;  %1087 = vmatprep.subr.bf16.mxu1 %v1205_v2 }
  0x2e   : > { %1032 = vmatmul.mubr.bf16.gmra.mrb[4].mxu0 %v1129_v14  ;;  %1056 = vmatmul.mubr.bf16.gmra.mrb[4].mxu1 %v1130_v15 }
  0x2f   : > { %1064 = vmatpush3.bf16.msra.mxu0 %v1205_v2  ;;  %1088 = vmatpush3.bf16.msra.mxu1 %v1205_v2 }
  0x30   : > { %1065 = vmatprep.subr.bf16.mxu0 %v1223_v3  ;;  %1089 = vmatprep.subr.bf16.mxu1 %v1223_v3 }
  0x31   : > { %1075 = vmatprep.mubr.bf16.mxu0 %v1131_v16  ;;  %1099 = vmatprep.mubr.bf16.mxu1 %v1132_v17 }
  0x33   : > { %1066 = vmatpush3.bf16.msra.mxu0 %v1223_v3  ;;  %1090 = vmatpush3.bf16.msra.mxu1 %v1223_v3 }
  0x34   : > { %1067 = vmatprep.subr.bf16.mxu0 %v1119_v6  ;;  %1091 = vmatprep.subr.bf16.mxu1 %v1119_v6 }
  0x37   : > { %1068 = vmatpush3.bf16.msra.mxu0 %v1119_v6  ;;  %1092 = vmatpush3.bf16.msra.mxu1 %v1119_v6 }
  0x38   : > { %1069 = vmatprep.subr.bf16.mxu0 %v1120_v7  ;;  %1093 = vmatprep.subr.bf16.mxu1 %v1120_v7 }
  0x3b   : > { %1070 = vmatpush3.bf16.msra.mxu0 %v1120_v7  ;;  %1094 = vmatpush3.bf16.msra.mxu1 %v1120_v7 }
  0x3c   : > { %1071 = vmatprep.subr.bf16.mxu0 %v1121_v8  ;;  %1095 = vmatprep.subr.bf16.mxu1 %v1121_v8 }
  0x3f   : > { %1072 = vmatpush3.bf16.msra.mxu0 %v1121_v8  ;;  %1096 = vmatpush3.bf16.msra.mxu1 %v1121_v8 }
  0x40   : > { %1073 = vmatprep.subr.bf16.mxu0 %v1122_v9  ;;  %1097 = vmatprep.subr.bf16.mxu1 %v1122_v9 }
  0x43   : > { %1074 = vmatpush3.bf16.msra.mxu0 %v1122_v9  ;;  %1098 = vmatpush3.bf16.msra.mxu1 %v1122_v9 }
  0x46   : > { %1076 = vmatmul.mubr.bf16.vlgmr.msra.gmra.mrb[8].mxu0 %v1133_v18  ;;  %1100 = vmatmul.mubr.bf16.vlgmr.msra.gmra.mrb[8].mxu1 %v1134_v19 }
  0x47   : > { %1079 = vmatprep.mubr.bf16.mxu0 %v1135_v20  ;;  %1103 = vmatprep.mubr.bf16.mxu1 %v1136_v21 }
  0x4e   : > { %1080 = vmatmul.mubr.bf16.gmra.mrb[12].mxu0 %v1137_v22  ;;  %1104 = vmatmul.mubr.bf16.gmra.mrb[12].mxu1 %v1138_v23 }
  0xf9   : > { %v1029_v24 = vpop.f32.mrb[0].mxu0  ;;  %v1053_v25 = vpop.f32.mrb[0].mxu1 }
  0xfa   : > { %v776_v26 = vmax.f32 %v1029_v24, %v1053_v25  ;;  %v452_v27 = vpop.f32.mrb[1].mxu0  ;;  %v549_v28 = vpop.f32.mrb[1].mxu1 }
  0xfb   : > { %v774_v29 = vmax.f32 %v452_v27, %v549_v28  ;;  %v1030_v30 = vpop.f32.mrb[2].mxu0  ;;  %v1054_v31 = vpop.f32.mrb[2].mxu1 }
  0xfc   : > { %v777_v32 = vmax.f32 %v1030_v30, %v1054_v31  ;;  %v455_v33 = vpop.f32.mrb[3].mxu0  ;;  %v552_v34 = vpop.f32.mrb[3].mxu1 }
  0xfd   : > { %v775_v35 = vmax.f32 %v455_v33, %v552_v34 }
 0x101   : > { %v1033_v36 = vpop.f32.mrb[4].mxu0  ;;  %v1057_v37 = vpop.f32.mrb[4].mxu1 }
 0x102   : > { %v780_v38 = vmax.f32 %v1033_v36, %v1057_v37  ;;  %v468_v39 = vpop.f32.mrb[5].mxu0  ;;  %v565_v40 = vpop.f32.mrb[5].mxu1 }
 0x103   : > { %v778_v41 = vmax.f32 %v468_v39, %v565_v40  ;;  %v1034_v42 = vpop.f32.mrb[6].mxu0  ;;  %v1058_v43 = vpop.f32.mrb[6].mxu1 }
 0x104   : > { %v781_v44 = vmax.f32 %v1034_v42, %v1058_v43  ;;  %v471_v45 = vpop.f32.mrb[7].mxu0  ;;  %v568_v46 = vpop.f32.mrb[7].mxu1 }
 0x105   : > { %v779_v47 = vmax.f32 %v471_v45, %v568_v46 }
 0x119   : > { %v1077_v48 = vpop.f32.mrb[8].mxu0  ;;  %v1101_v49 = vpop.f32.mrb[8].mxu1 }
 0x11a   : > { %v784_v50 = vmax.f32 %v1077_v48, %v1101_v49  ;;  %v646_v51 = vpop.f32.mrb[9].mxu0  ;;  %v743_v52 = vpop.f32.mrb[9].mxu1 }
 0x11b   : > { %v782_v54 = vmax.f32 %v646_v51, %v743_v52  ;;  %v1078_v55 = vpop.f32.mrb[10].mxu0  ;;  %v1102_v56 = vpop.f32.mrb[10].mxu1 }
 0x11c   : > { %v792_v57 = vmax.f32 %v776_v26, %v784_v50  ;;  %v785_v58 = vmax.f32 %v1078_v55, %v1102_v56  ;;  %v649_v59 = vpop.f32.mrb[11].mxu0  ;;  %v746_v60 = vpop.f32.mrb[11].mxu1 }
 0x11d   : > { %v790_v61 = vmax.f32 %v774_v29, %v782_v54  ;;  %v783_v62 = vmax.f32 %v649_v59, %v746_v60 }
 0x11e   : > { %v807_v63 = vadd.f32 %v960_v53, %v792_v57  ;;  %v793_v0 = vmax.f32 %v777_v32, %v785_v58 }
 0x11f   : > { %v805_v1 = vadd.f32 %v960_v53, %v790_v61  ;;  %v791_v2 = vmax.f32 %v775_v35, %v783_v62 }
 0x120   : > { %v815_v3 = vmax.f32 %v807_v63, 0.0  ;;  %v808_v4 = vadd.f32 %v960_v53, %v793_v0 }
 0x121   : > { %v813_v5 = vmax.f32 %v805_v1, 0.0  ;;  %v806_v6 = vadd.f32 %v960_v53, %v791_v2  ;;  %v1081_v7 = vpop.f32.mrb[12].mxu0  ;;  %v1105_v8 = vpop.f32.mrb[12].mxu1 }
 0x122   : > { %823 = vst [vmem:[%s1290_s12 + $0x10] sm:$0xff] %v815_v3  ;;  %v816_v9 = vmax.f32 %v808_v4, 0.0  ;;  %v788_v10 = vmax.f32 %v1081_v7, %v1105_v8  ;;  %v662_v11 = vpop.f32.mrb[13].mxu0  ;;  %v759_v12 = vpop.f32.mrb[13].mxu1 }
 0x123   : > { %821 = vst [vmem:[%s1290_s12] sm:$0xff] %v813_v5  ;;  %v814_v13 = vmax.f32 %v806_v6, 0.0  ;;  %v786_v14 = vmax.f32 %v662_v11, %v759_v12  ;;  %v1082_v15 = vpop.f32.mrb[14].mxu0  ;;  %v1106_v16 = vpop.f32.mrb[14].mxu1 }
 0x124   : > { %824 = vst [vmem:[%s1290_s12 + $0x18] sm:$0xff] %v816_v9  ;;  %v796_v17 = vmax.f32 %v780_v38, %v788_v10  ;;  %v789_v18 = vmax.f32 %v1082_v15, %v1106_v16  ;;  %v665_v19 = vpop.f32.mrb[15].mxu0  ;;  %v762_v20 = vpop.f32.mrb[15].mxu1 }
 0x125   : > { %822 = vst [vmem:[%s1290_s12 + $0x8] sm:$0xff] %v814_v13  ;;  %v794_v21 = vmax.f32 %v778_v41, %v786_v14  ;;  %v787_v22 = vmax.f32 %v665_v19, %v762_v20 }
 0x126   : > { %v811_v23 = vadd.f32 %v960_v53, %v796_v17  ;;  %v797_v24 = vmax.f32 %v781_v44, %v789_v18 }
 0x127   : > { %v809_v25 = vadd.f32 %v960_v53, %v794_v21  ;;  %v795_v26 = vmax.f32 %v779_v47, %v787_v22 }
 0x128   : > { %v819_v27 = vmax.f32 %v811_v23, 0.0  ;;  %v812_v28 = vadd.f32 %v960_v53, %v797_v24 }
 0x129   : > { %v817_v29 = vmax.f32 %v809_v25, 0.0  ;;  %v810_v30 = vadd.f32 %v960_v53, %v795_v26 }
 0x12a   : > { %827 = vst [vmem:[%s1290_s12 + $0x30] sm:$0xff] %v819_v27  ;;  %v820_v31 = vmax.f32 %v812_v28, 0.0 }
 0x12b   : > { %825 = vst [vmem:[%s1290_s12 + $0x20] sm:$0xff] %v817_v29  ;;  %v818_v32 = vmax.f32 %v810_v30, 0.0 }
 0x12c   : > { %828 = vst [vmem:[%s1290_s12 + $0x38] sm:$0xff] %v820_v31 }
 0x12d   : > { %826 = vst [vmem:[%s1290_s12 + $0x28] sm:$0xff] %v818_v32 }
 0x12e PF: > { %s16_s21 = sadd.s32 1, %s1145_s21  }
 0x12f   : > { %p13_p4 = scmp.ge.s32.totalorder %s16_s21, 4  }
 0x131   :  { %15 = sbr.rel (!%p13_p4) target bundleno = 1 (0x1), region = 83 }

// kernel: surrogate_cnn_forward.4
= control target key start
LH: loop header
LB: loop body
LE: loop exit
PB: predicated region body
PF: predicated region fallthrough
CT: control target
= control target key end

     0   :  { %s2211_s21 = smov 0   ;;  %s2728_s0 = inlined_call_operand.vmem [shape: bf16[64,640], index: 0, kind: input, shape index: {}]   ;;  %s2729_s1 = inlined_call_operand.vmem [shape: bf16[64,640], index: 1, kind: input, shape index: {}]   ;;  %s2730_s2 = inlined_call_operand.vmem [shape: bf16[64,640], index: 2, kind: input, shape index: {}]   ;;  %s2731_s3 = inlined_call_operand.vmem [shape: bf16[64,640], index: 3, kind: input, shape index: {}]   ;;  %s2732_s4 = inlined_call_operand.vmem [shape: bf16[640,128], index: 4, kind: input, shape index: {}]   ;;  %s2733_s5 = inlined_call_operand.vmem [shape: f32[1,128], index: 5, kind: input, shape index: {}]   ;;  %s2734_s6 = inlined_call_operand.vmem [shape: f32[64,128], index: 6, kind: output, shape index: {}]  }
   0x1 LB: > { %s1621_s22 = sadd.s32 4294967295, %s2174_s21   ;;  %p1625_p0 = scmp.ge.s32.totalorder %s2174_s21, 1  ;;  %s2174_s21 = sphi %s2211_s21, %s16_s21  }
   0x2   : > { %p250_p1 = scmp.lt.s32.totalorder %s2174_s21, 3 }
   0x4   : > { %p251_p2 = pnand %p1625_p0, %p250_p1 }
   0x5   : > { %v2222_v0 = vld [vmem:[%s2732_s4 + $0x40] sm:$0xff] (!%p251_p2)   ;;  %v2245_v4 = vld [vmem:[%s2732_s4 + $0x48] sm:$0xff] (!%p251_p2)   ;;  %v2269_v8 = vld [vmem:[%s2732_s4 + $0x50] sm:$0xff] (!%p251_p2)   ;;  %s1626_s7 = sshll.u32 (!%p251_p2), %s1621_s22, 2 }
   0x6   : > { %254 = sbr.rel (%p251_p2) target bundleno = 437 (0x1b5), region = 44  ;;  %v2227_v1 = vld [vmem:[%s2732_s4 + $0xc0] sm:$0xff] (!%p251_p2)   ;;  %1719 = vmatprep.subr.bf16.mxu0 (!%p251_p2), %v2222_v0  ;;  %v2251_v5 = vld [vmem:[%s2732_s4 + $0xc8] sm:$0xff] (!%p251_p2)   ;;  %v2275_v9 = vld [vmem:[%s2732_s4 + $0xd0] sm:$0xff] (!%p251_p2)   ;;  %p300_p3 = scmp.lt.s32.totalorder (!%p251_p2), %s1626_s7, 7 }
   0x7   : > { %v2233_v2 = vld [vmem:[%s2732_s4] sm:$0xff] (!%p251_p2)   ;;  %1747 = vmatprep.subr.bf16.mxu1 (!%p251_p2), %v2227_v1  ;;  %v2257_v6 = vld [vmem:[%s2732_s4 + $0x8] sm:$0xff] (!%p251_p2)   ;;  %v2281_v10 = vld [vmem:[%s2732_s4 + $0x10] sm:$0xff] (!%p251_p2)  }
   0x8   : > { %v2239_v3 = vld [vmem:[%s2732_s4 + $0x80] sm:$0xff] (!%p251_p2)   ;;  %1720 = vmatpush3.bf16.msra.mxu0 (!%p251_p2), %v2233_v2  ;;  %v2263_v7 = vld [vmem:[%s2732_s4 + $0x88] sm:$0xff] (!%p251_p2)   ;;  %v2287_v11 = vld [vmem:[%s2732_s4 + $0x90] sm:$0xff] (!%p251_p2)  }
   0x9   : > { %1748 = vmatpush3.bf16.msra.mxu1 (!%p251_p2), %v2239_v3  ;;  %1721 = vmatprep.subr.bf16.mxu0 (!%p251_p2), %v2245_v4  ;;  %v2293_v12 = vld [vmem:[%s2732_s4 + $0x58] sm:$0xff] (!%p251_p2)   ;;  %v2319_v16 = vld [vmem:[%s2732_s4 + $0x60] sm:$0xff] (!%p251_p2)   ;;  %v2343_v20 = vld [vmem:[%s2732_s4 + $0x68] sm:$0xff] (!%p251_p2)  }
   0xa   : > { %1749 = vmatprep.subr.bf16.mxu1 (!%p251_p2), %v2251_v5  ;;  %v2299_v13 = vld [vmem:[%s2732_s4 + $0xd8] sm:$0xff] (!%p251_p2)   ;;  %v2325_v17 = vld [vmem:[%s2732_s4 + $0xe0] sm:$0xff] (!%p251_p2)   ;;  %v2349_v21 = vld [vmem:[%s2732_s4 + $0xe8] sm:$0xff] (!%p251_p2)  }
   0xb   : > { %v2305_v14 = vld [vmem:[%s2732_s4 + $0x18] sm:$0xff] (!%p251_p2)   ;;  %v2331_v18 = vld [vmem:[%s2732_s4 + $0x20] sm:$0xff] (!%p251_p2)   ;;  %v2357_v22 = vld [vmem:[%s2732_s4 + $0x28] sm:$0xff] (!%p251_p2)  }
   0xc   : > { %1722 = vmatpush3.bf16.msra.mxu0 (!%p251_p2), %v2257_v6  ;;  %v2313_v15 = vld [vmem:[%s2732_s4 + $0x98] sm:$0xff] (!%p251_p2)   ;;  %v2337_v19 = vld [vmem:[%s2732_s4 + $0xa0] sm:$0xff] (!%p251_p2)   ;;  %v2363_v23 = vld [vmem:[%s2732_s4 + $0xa8] sm:$0xff] (!%p251_p2)  }
   0xd   : > { %1750 = vmatpush3.bf16.msra.mxu1 %v2263_v7  ;;  %1723 = vmatprep.subr.bf16.mxu0 %v2269_v8  ;;  %s2736_s7 = smov (!%p300_p3, %s1626_s7), 7  ;;  %v2369_v24 = vld [vmem:[%s2732_s4 + $0x70] sm:$0xff]   ;;  %v2396_v28 = vld [vmem:[%s2732_s4 + $0x78] sm:$0xff]   ;;  %v2432_v36 = vld [vmem:[%s2732_s4 + $0x100] sm:$0xff]  }
   0xe   : > { %1751 = vmatprep.subr.bf16.mxu1 %v2275_v9  ;;  %v2375_v25 = vld [vmem:[%s2732_s4 + $0xf0] sm:$0xff]   ;;  %s2378_s8 = smul.u32 20, %s2736_s7  ;;  %v2402_v29 = vld [vmem:[%s2732_s4 + $0xf8] sm:$0xff]   ;;  %v2437_v37 = vld [vmem:[%s2732_s4 + $0x108] sm:$0xff]   ;;  %s1635_s30 = sshll.u32 %s2736_s7, 3 }
   0xf   : > { %v2384_v26 = vld [vmem:[%s2732_s4 + $0x30] sm:$0xff]   ;;  %v2414_v30 = vld [vmem:[%s2732_s4 + $0x38] sm:$0xff]   ;;  %v2476_v45 = vld [vmem:[%s2732_s4 + $0x120] sm:$0xff]   ;;  %s331_s11 = scalar_lea.vmem %s2734_s6, %s1635_s30 }
  0x10   : > { %1724 = vmatpush3.bf16.msra.mxu0 %v2281_v10  ;;  %v2390_v27 = vld [vmem:[%s2732_s4 + $0xb0] sm:$0xff]   ;;  %s2408_s18 = scalar_lea.vmem %s2728_s0, %s2378_s8  ;;  %v2420_v31 = vld [vmem:[%s2732_s4 + $0xb8] sm:$0xff]   ;;  %s2466_s13 = scalar_lea.vmem %s2729_s1, %s2378_s8  ;;  %v2486_v47 = vld [vmem:[%s2732_s4 + $0x128] sm:$0xff]  }
  0x11   : > { %1752 = vmatpush3.bf16.msra.mxu1 %v2287_v11  ;;  %1725 = vmatprep.subr.bf16.mxu0 %v2293_v12  ;;  %v2104_v32 = vld [vmem:[%s2408_s18] ss:$20 sps:$4 sm:$0xff]   ;;  %v2106_v33 = vld [vmem:[%s2408_s18 + $0x4] ss:$20 sps:$4 sm:$0xff]   ;;  %v2107_v34 = vld [vmem:[%s2408_s18 + $0x8] ss:$20 sps:$4 sm:$0xff]   ;;  %s2492_s20 = scalar_lea.vmem %s2730_s2, %s2378_s8  ;;  %s2516_s29 = scalar_lea.vmem %s2731_s3, %s2378_s8 }
  0x12   : > { %1753 = vmatprep.subr.bf16.mxu1 %v2299_v13  ;;  %v2109_v35 = vld [vmem:[%s2408_s18 + $0xc] ss:$20 sps:$4 sm:$0xff]   ;;  %750 = vmatprep.mubr.bf16.mxu0 %v2106_v33  ;;  %v2447_v38 = vld [vmem:[%s2732_s4 + $0x110] sm:$0xff]   ;;  %v2452_v39 = vld [vmem:[%s2732_s4 + $0x118] sm:$0xff]  }
  0x13   : > { %799 = vmatprep.mubr.bf16.mxu1 %v2109_v35  ;;  %v2116_v40 = vld [vmem:[%s2408_s18 + $0x2c] ss:$20 sps:$4 sm:$0xff]   ;;  %v2118_v41 = vld [vmem:[%s2408_s18 + $0x34] ss:$20 sps:$4 sm:$0xff]   ;;  %v2121_v43 = vld [vmem:[%s2408_s18 + $0x30] ss:$20 sps:$4 sm:$0xff]  }
  0x14   : > { %1726 = vmatpush3.bf16.msra.mxu0 %v2305_v14  ;;  %v2120_v42 = vld [vmem:[%s2408_s18 + $0x28] ss:$20 sps:$4 sm:$0xff]   ;;  %v2124_v44 = vld [vmem:[%s2408_s18 + $0x10] ss:$20 sps:$4 sm:$0xff]   ;;  %v2125_v50 = vld [vmem:[%s2408_s18 + $0x38] ss:$20 sps:$4 sm:$0xff]  }
  0x15   : > { %1754 = vmatpush3.bf16.msra.mxu1 %v2313_v15  ;;  %1727 = vmatprep.subr.bf16.mxu0 %v2319_v16  ;;  %v2128_v46 = vld [vmem:[%s2466_s13 + $0x4] ss:$20 sps:$4 sm:$0xff]   ;;  %v2501_v48 = vld [vmem:[%s2732_s4 + $0x130] sm:$0xff]   ;;  %v2129_v52 = vld [vmem:[%s2466_s13 + $0x2c] ss:$20 sps:$4 sm:$0xff]  }
  0x16   : > { %1755 = vmatprep.subr.bf16.mxu1 %v2325_v17  ;;  %v2510_v49 = vld [vmem:[%s2732_s4 + $0x138] sm:$0xff]   ;;  %v2126_v51 = vld [vmem:[%s2466_s13] ss:$20 sps:$4 sm:$0xff]   ;;  %v2135_v55 = vld [vmem:[%s2466_s13 + $0x10] ss:$20 sps:$4 sm:$0xff]  }
  0x17   : > { %v2134_v53 = vld [vmem:[%s2466_s13 + $0xc] ss:$20 sps:$4 sm:$0xff]   ;;  %v2131_v54 = vld [vmem:[%s2466_s13 + $0x28] ss:$20 sps:$4 sm:$0xff]   ;;  %v2139_v60 = vld [vmem:[%s2466_s13 + $0x30] ss:$20 sps:$4 sm:$0xff]  }
  0x18   : > { %1728 = vmatpush3.bf16.msra.mxu0 %v2331_v18  ;;  %v2132_v56 = vld [vmem:[%s2466_s13 + $0x8] ss:$20 sps:$4 sm:$0xff]   ;;  %v2136_v57 = vld [vmem:[%s2466_s13 + $0x38] ss:$20 sps:$4 sm:$0xff]   ;;  %v2140_v62 = vld [vmem:[%s2492_s20] ss:$20 sps:$4 sm:$0xff]  }
  0x19   : > { %1756 = vmatpush3.bf16.msra.mxu1 %v2337_v19  ;;  %1729 = vmatprep.subr.bf16.mxu0 %v2343_v20  ;;  %v2137_v58 = vld [vmem:[%s2466_s13 + $0x34] ss:$20 sps:$4 sm:$0xff]   ;;  %v2145_v59 = vld [vmem:[%s2492_s20 + $0xc] ss:$20 sps:$4 sm:$0xff]   ;;  %v2142_v61 = vld [vmem:[%s2492_s20 + $0x4] ss:$20 sps:$4 sm:$0xff]  }
  0x1a   : > { %1757 = vmatprep.subr.bf16.mxu1 %v2349_v21  ;;  %v2143_v63 = vld [vmem:[%s2492_s20 + $0x8] ss:$20 sps:$4 sm:$0xff]   ;;  %v2151_v35 = vld [vmem:[%s2492_s20 + $0x30] ss:$20 sps:$4 sm:$0xff]  }
  0x1b   : > { %v2148_v33 = vld [vmem:[%s2492_s20 + $0x34] ss:$20 sps:$4 sm:$0xff]  }
  0x1c   : > { %1730 = vmatpush3.bf16.msra.mxu0 %v2357_v22 }
  0x1d   : > { %1758 = vmatpush3.bf16.msra.mxu1 %v2363_v23  ;;  %1731 = vmatprep.subr.bf16.mxu0 %v2369_v24 }
  0x1e   : > { %1759 = vmatprep.subr.bf16.mxu1 %v2375_v25 }
  0x20   : > { %1732 = vmatpush3.bf16.msra.mxu0 %v2384_v26 }
  0x21   : > { %1760 = vmatpush3.bf16.msra.mxu1 %v2390_v27  ;;  %1733 = vmatprep.subr.bf16.mxu0 %v2396_v28 }
  0x22   : > { %1761 = vmatprep.subr.bf16.mxu1 %v2402_v29 }
  0x24   : > { %1734 = vmatpush3.bf16.msra.mxu0 %v2414_v30 }
  0x25   : > { %1762 = vmatpush3.bf16.msra.mxu1 %v2420_v31  ;;  %1983 = vmatprep.subr.bf16.mxu0 %v2432_v36 }
  0x26   : > { %1785 = vmatprep.subr.bf16.mxu1 %v2222_v0 }
  0x27   : > { %751 = vmatmul.mubr.bf16.vlgmr.msra.gmra.mrb[0].mxu0 %v2104_v32  ;;  %v2146_v32 = vld [vmem:[%s2492_s20 + $0x2c] ss:$20 sps:$4 sm:$0xff]  }
  0x28   : > { %800 = vmatmul.mubr.bf16.vlgmr.msra.gmra.mrb[0].mxu1 %v2107_v34  ;;  %1984 = vmatpush3.bf16.msra.mxu0 %v2432_v36  ;;  %v2150_v34 = vld [vmem:[%s2492_s20 + $0x28] ss:$20 sps:$4 sm:$0xff]  }
  0x29   : > { %1786 = vmatpush3.bf16.msra.mxu1 %v2233_v2  ;;  %1985 = vmatprep.subr.bf16.mxu0 %v2437_v37 }
  0x2a   : > { %1787 = vmatprep.subr.bf16.mxu1 %v2245_v4  ;;  %758 = vmatprep.mubr.bf16.mxu0 %v2116_v40  ;;  %v2156_v40 = vld [vmem:[%s2516_s29 + $0x4] ss:$20 sps:$4 sm:$0xff]  }
  0x2b   : > { %807 = vmatprep.mubr.bf16.mxu1 %v2118_v41 }
  0x2c   : > { %1986 = vmatpush3.bf16.msra.mxu0 %v2437_v37 }
  0x2d   : > { %1788 = vmatpush3.bf16.msra.mxu1 %v2257_v6  ;;  %1987 = vmatprep.subr.bf16.mxu0 %v2447_v38 }
  0x2e   : > { %1789 = vmatprep.subr.bf16.mxu1 %v2269_v8 }
  0x2f   : > { %759 = vmatmul.mubr.bf16.gmra.mrb[4].mxu0 %v2120_v42 }
  0x30   : > { %808 = vmatmul.mubr.bf16.gmra.mrb[4].mxu1 %v2121_v43  ;;  %1988 = vmatpush3.bf16.msra.mxu0 %v2447_v38 }
  0x31   : > { %1790 = vmatpush3.bf16.msra.mxu1 %v2281_v10  ;;  %1989 = vmatprep.subr.bf16.mxu0 %v2452_v39 }
  0x32   : > { %1791 = vmatprep.subr.bf16.mxu1 %v2293_v12  ;;  %1999 = vmatprep.mubr.bf16.mxu0 %v2124_v44 }
  0x33   : > { %961 = vmatprep.mubr.bf16.mxu1 %v2128_v46 }
  0x34   : > { %1990 = vmatpush3.bf16.msra.mxu0 %v2452_v39 }
  0x35   : > { %1792 = vmatpush3.bf16.msra.mxu1 %v2305_v14  ;;  %1991 = vmatprep.subr.bf16.mxu0 %v2476_v45 }
  0x36   : > { %1793 = vmatprep.subr.bf16.mxu1 %v2319_v16 }
  0x38   : > { %1992 = vmatpush3.bf16.msra.mxu0 %v2476_v45 }
  0x39   : > { %1794 = vmatpush3.bf16.msra.mxu1 %v2331_v18  ;;  %1993 = vmatprep.subr.bf16.mxu0 %v2486_v47 }
  0x3a   : > { %1795 = vmatprep.subr.bf16.mxu1 %v2343_v20 }
  0x3c   : > { %1994 = vmatpush3.bf16.msra.mxu0 %v2486_v47 }
  0x3d   : > { %1796 = vmatpush3.bf16.msra.mxu1 %v2357_v22  ;;  %1995 = vmatprep.subr.bf16.mxu0 %v2501_v48 }
  0x3e   : > { %1797 = vmatprep.subr.bf16.mxu1 %v2369_v24 }
  0x40   : > { %1996 = vmatpush3.bf16.msra.mxu0 %v2501_v48 }
  0x41   : > { %1798 = vmatpush3.bf16.msra.mxu1 %v2384_v26  ;;  %1997 = vmatprep.subr.bf16.mxu0 %v2510_v49 }
  0x42   : > { %1799 = vmatprep.subr.bf16.mxu1 %v2396_v28 }
  0x44   : > { %1998 = vmatpush3.bf16.msra.mxu0 %v2510_v49 }
  0x45   : > { %1800 = vmatpush3.bf16.msra.mxu1 %v2414_v30  ;;  %1813 = vmatprep.subr.bf16.mxu0 %v2227_v1 }
  0x46   : > { %2003 = vmatprep.subr.bf16.mxu1 %v2432_v36 }
  0x47   : > { %2000 = vmatmul.mubr.bf16.vlgmr.msra.gmra.mrb[8].mxu0 %v2125_v50 }
  0x48   : > { %962 = vmatmul.mubr.bf16.vlgmr.msra.gmra.mrb[8].mxu1 %v2126_v51  ;;  %1814 = vmatpush3.bf16.msra.mxu0 %v2239_v3 }
  0x49   : > { %2004 = vmatpush3.bf16.msra.mxu1 %v2432_v36  ;;  %1815 = vmatprep.subr.bf16.mxu0 %v2251_v5 }
  0x4a   : > { %2005 = vmatprep.subr.bf16.mxu1 %v2437_v37  ;;  %969 = vmatprep.mubr.bf16.mxu1 %v2129_v52 }
  0x4b   : > { %1010 = vmatprep.mubr.bf16.mxu0 %v2134_v53 }
  0x4c   : > { %1816 = vmatpush3.bf16.msra.mxu0 %v2263_v7 }
  0x4d   : > { %2006 = vmatpush3.bf16.msra.mxu1 %v2437_v37  ;;  %1817 = vmatprep.subr.bf16.mxu0 %v2275_v9 }
  0x4e   : > { %2007 = vmatprep.subr.bf16.mxu1 %v2447_v38 }
  0x50   : > { %970 = vmatmul.mubr.bf16.gmra.mrb[12].mxu1 %v2131_v54  ;;  %1818 = vmatpush3.bf16.msra.mxu0 %v2287_v11 }
  0x51   : > { %2008 = vmatpush3.bf16.msra.mxu1 %v2447_v38  ;;  %1819 = vmatprep.subr.bf16.mxu0 %v2299_v13 }
  0x52   : > { %2009 = vmatprep.subr.bf16.mxu1 %v2452_v39  ;;  %2019 = vmatprep.mubr.bf16.mxu1 %v2135_v55 }
  0x54   : > { %1820 = vmatpush3.bf16.msra.mxu0 %v2313_v15 }
  0x55   : > { %2010 = vmatpush3.bf16.msra.mxu1 %v2452_v39  ;;  %1821 = vmatprep.subr.bf16.mxu0 %v2325_v17 }
  0x56   : > { %2011 = vmatprep.subr.bf16.mxu1 %v2476_v45 }
  0x58   : > { %1822 = vmatpush3.bf16.msra.mxu0 %v2337_v19 }
  0x59   : > { %2012 = vmatpush3.bf16.msra.mxu1 %v2476_v45  ;;  %1823 = vmatprep.subr.bf16.mxu0 %v2349_v21 }
  0x5a   : > { %2013 = vmatprep.subr.bf16.mxu1 %v2486_v47 }
  0x5c   : > { %1824 = vmatpush3.bf16.msra.mxu0 %v2363_v23 }
  0x5d   : > { %2014 = vmatpush3.bf16.msra.mxu1 %v2486_v47  ;;  %1825 = vmatprep.subr.bf16.mxu0 %v2375_v25 }
  0x5e   : > { %2015 = vmatprep.subr.bf16.mxu1 %v2501_v48 }
  0x60   : > { %1826 = vmatpush3.bf16.msra.mxu0 %v2390_v27 }
  0x61   : > { %2016 = vmatpush3.bf16.msra.mxu1 %v2501_v48  ;;  %1827 = vmatprep.subr.bf16.mxu0 %v2402_v29 }
  0x62   : > { %2017 = vmatprep.subr.bf16.mxu1 %v2510_v49 }
  0x64   : > { %1828 = vmatpush3.bf16.msra.mxu0 %v2420_v31 }
  0x65   : > { %2018 = vmatpush3.bf16.msra.mxu1 %v2510_v49  ;;  %1851 = vmatprep.subr.bf16.mxu0 %v2222_v0 }
  0x66   : > { %1879 = vmatprep.subr.bf16.mxu1 %v2227_v1 }
  0x67   : > { %1011 = vmatmul.mubr.bf16.vlgmr.msra.gmra.mrb[12].mxu0 %v2132_v56 }
  0x68   : > { %2020 = vmatmul.mubr.bf16.vlgmr.msra.gmra.mrb[16].mxu1 %v2136_v57  ;;  %1852 = vmatpush3.bf16.msra.mxu0 %v2233_v2 }
  0x69   : > { %1880 = vmatpush3.bf16.msra.mxu1 %v2239_v3  ;;  %1853 = vmatprep.subr.bf16.mxu0 %v2245_v4 }
  0x6a   : > { %1881 = vmatprep.subr.bf16.mxu1 %v2251_v5  ;;  %1018 = vmatprep.mubr.bf16.mxu0 %v2137_v58 }
  0x6b   : > { %1221 = vmatprep.mubr.bf16.mxu1 %v2145_v59 }
  0x6c   : > { %1854 = vmatpush3.bf16.msra.mxu0 %v2257_v6 }
  0x6d   : > { %1882 = vmatpush3.bf16.msra.mxu1 %v2263_v7  ;;  %1855 = vmatprep.subr.bf16.mxu0 %v2269_v8 }
  0x6e   : > { %1883 = vmatprep.subr.bf16.mxu1 %v2275_v9 }
  0x6f   : > { %1019 = vmatmul.mubr.bf16.gmra.mrb[16].mxu0 %v2139_v60 }
  0x70   : > { %1856 = vmatpush3.bf16.msra.mxu0 %v2281_v10  ;;  %1172 = vmatprep.mubr.bf16.mxu0 %v2142_v61 }
  0x71   : > { %1884 = vmatpush3.bf16.msra.mxu1 %v2287_v11  ;;  %1857 = vmatprep.subr.bf16.mxu0 %v2293_v12 }
  0x72   : > { %1885 = vmatprep.subr.bf16.mxu1 %v2299_v13 }
  0x74   : > { %1858 = vmatpush3.bf16.msra.mxu0 %v2305_v14 }
  0x75   : > { %1886 = vmatpush3.bf16.msra.mxu1 %v2313_v15  ;;  %1859 = vmatprep.subr.bf16.mxu0 %v2319_v16 }
  0x76   : > { %1887 = vmatprep.subr.bf16.mxu1 %v2325_v17 }
  0x78   : > { %1860 = vmatpush3.bf16.msra.mxu0 %v2331_v18 }
  0x79   : > { %1888 = vmatpush3.bf16.msra.mxu1 %v2337_v19  ;;  %1861 = vmatprep.subr.bf16.mxu0 %v2343_v20 }
  0x7a   : > { %1889 = vmatprep.subr.bf16.mxu1 %v2349_v21 }
  0x7c   : > { %1862 = vmatpush3.bf16.msra.mxu0 %v2357_v22 }
  0x7d   : > { %1890 = vmatpush3.bf16.msra.mxu1 %v2363_v23  ;;  %1863 = vmatprep.subr.bf16.mxu0 %v2369_v24 }
  0x7e   : > { %1891 = vmatprep.subr.bf16.mxu1 %v2375_v25 }
  0x80   : > { %1864 = vmatpush3.bf16.msra.mxu0 %v2384_v26 }
  0x81   : > { %1892 = vmatpush3.bf16.msra.mxu1 %v2390_v27  ;;  %1865 = vmatprep.subr.bf16.mxu0 %v2396_v28 }
  0x82   : > { %1893 = vmatprep.subr.bf16.mxu1 %v2402_v29 }
  0x84   : > { %1866 = vmatpush3.bf16.msra.mxu0 %v2414_v30 }
  0x85   : > { %1894 = vmatpush3.bf16.msra.mxu1 %v2420_v31  ;;  %2023 = vmatprep.subr.bf16.mxu0 %v2432_v36 }
  0x86   : > { %1917 = vmatprep.subr.bf16.mxu1 %v2222_v0  ;;  %v2152_v0 = vld [vmem:[%s2492_s20 + $0x10] ss:$20 sps:$4 sm:$0xff]  }
  0x87   : > { %1173 = vmatmul.mubr.bf16.vlgmr.msra.gmra.mrb[20].mxu0 %v2140_v62 }
  0x88   : > { %1222 = vmatmul.mubr.bf16.vlgmr.msra.gmra.mrb[20].mxu1 %v2143_v63  ;;  %2024 = vmatpush3.bf16.msra.mxu0 %v2432_v36 }
  0x89   : > { %1918 = vmatpush3.bf16.msra.mxu1 %v2233_v2  ;;  %2025 = vmatprep.subr.bf16.mxu0 %v2437_v37  ;;  %v2153_v2 = vld [vmem:[%s2492_s20 + $0x38] ss:$20 sps:$4 sm:$0xff]  }
  0x8a   : > { %1919 = vmatprep.subr.bf16.mxu1 %v2245_v4  ;;  %1180 = vmatprep.mubr.bf16.mxu0 %v2146_v32  ;;  %v2154_v4 = vld [vmem:[%s2516_s29] ss:$20 sps:$4 sm:$0xff]  }
  0x8b   : > { %1229 = vmatprep.mubr.bf16.mxu1 %v2148_v33 }
  0x8c   : > { %2026 = vmatpush3.bf16.msra.mxu0 %v2437_v37 }
  0x8d   : > { %1920 = vmatpush3.bf16.msra.mxu1 %v2257_v6  ;;  %2027 = vmatprep.subr.bf16.mxu0 %v2447_v38  ;;  %v2157_v6 = vld [vmem:[%s2516_s29 + $0x2c] ss:$20 sps:$4 sm:$0xff]  }
  0x8e   : > { %1921 = vmatprep.subr.bf16.mxu1 %v2269_v8  ;;  %v2162_v8 = vld [vmem:[%s2516_s29 + $0xc] ss:$20 sps:$4 sm:$0xff]  }
  0x8f   : > { %1181 = vmatmul.mubr.bf16.gmra.mrb[24].mxu0 %v2150_v34 }
  0x90   : > { %1230 = vmatmul.mubr.bf16.gmra.mrb[24].mxu1 %v2151_v35  ;;  %2028 = vmatpush3.bf16.msra.mxu0 %v2447_v38 }
  0x91   : > { %1922 = vmatpush3.bf16.msra.mxu1 %v2281_v10  ;;  %2029 = vmatprep.subr.bf16.mxu0 %v2452_v39  ;;  %v2159_v10 = vld [vmem:[%s2516_s29 + $0x28] ss:$20 sps:$4 sm:$0xff]  }
  0x92   : > { %1923 = vmatprep.subr.bf16.mxu1 %v2293_v12  ;;  %2039 = vmatprep.mubr.bf16.mxu0 %v2152_v0 }
  0x93   : > { %1383 = vmatprep.mubr.bf16.mxu1 %v2156_v40 }
  0x94   : > { %2030 = vmatpush3.bf16.msra.mxu0 %v2452_v39 }
  0x95   : > { %1924 = vmatpush3.bf16.msra.mxu1 %v2305_v14  ;;  %2031 = vmatprep.subr.bf16.mxu0 %v2476_v45 }
  0x96   : > { %1925 = vmatprep.subr.bf16.mxu1 %v2319_v16 }
  0x98   : > { %2032 = vmatpush3.bf16.msra.mxu0 %v2476_v45 }
  0x99   : > { %1926 = vmatpush3.bf16.msra.mxu1 %v2331_v18  ;;  %2033 = vmatprep.subr.bf16.mxu0 %v2486_v47 }
  0x9a   : > { %1927 = vmatprep.subr.bf16.mxu1 %v2343_v20 }
  0x9c   : > { %2034 = vmatpush3.bf16.msra.mxu0 %v2486_v47 }
  0x9d   : > { %1928 = vmatpush3.bf16.msra.mxu1 %v2357_v22  ;;  %2035 = vmatprep.subr.bf16.mxu0 %v2501_v48 }
  0x9e   : > { %1929 = vmatprep.subr.bf16.mxu1 %v2369_v24 }
  0xa0   : > { %2036 = vmatpush3.bf16.msra.mxu0 %v2501_v48 }
  0xa1   : > { %1930 = vmatpush3.bf16.msra.mxu1 %v2384_v26  ;;  %2037 = vmatprep.subr.bf16.mxu0 %v2510_v49 }
  0xa2   : > { %1931 = vmatprep.subr.bf16.mxu1 %v2396_v28 }
  0xa4   : > { %2038 = vmatpush3.bf16.msra.mxu0 %v2510_v49 }
  0xa5   : > { %1932 = vmatpush3.bf16.msra.mxu1 %v2414_v30  ;;  %1945 = vmatprep.subr.bf16.mxu0 %v2227_v1  ;;  %v2163_v1 = vld [vmem:[%s2516_s29 + $0x10] ss:$20 sps:$4 sm:$0xff]  }
  0xa6   : > { %2043 = vmatprep.subr.bf16.mxu1 %v2432_v36 }
  0xa7   : > { %2040 = vmatmul.mubr.bf16.vlgmr.msra.gmra.mrb[28].mxu0 %v2153_v2 }
  0xa8   : > { %1384 = vmatmul.mubr.bf16.vlgmr.msra.gmra.mrb[28].mxu1 %v2154_v4  ;;  %1946 = vmatpush3.bf16.msra.mxu0 %v2239_v3  ;;  %v2160_v3 = vld [vmem:[%s2516_s29 + $0x8] ss:$20 sps:$4 sm:$0xff]  }
  0xa9   : > { %2044 = vmatpush3.bf16.msra.mxu1 %v2432_v36  ;;  %1947 = vmatprep.subr.bf16.mxu0 %v2251_v5  ;;  %v2164_v5 = vld [vmem:[%s2516_s29 + $0x38] ss:$20 sps:$4 sm:$0xff]  }
  0xaa   : > { %2045 = vmatprep.subr.bf16.mxu1 %v2437_v37  ;;  %1391 = vmatprep.mubr.bf16.mxu1 %v2157_v6 }
  0xab   : > { %1432 = vmatprep.mubr.bf16.mxu0 %v2162_v8 }
  0xac   : > { %1948 = vmatpush3.bf16.msra.mxu0 %v2263_v7  ;;  %v2165_v7 = vld [vmem:[%s2516_s29 + $0x34] ss:$20 sps:$4 sm:$0xff]  }
  0xad   : > { %2046 = vmatpush3.bf16.msra.mxu1 %v2437_v37  ;;  %1949 = vmatprep.subr.bf16.mxu0 %v2275_v9  ;;  %v2167_v9 = vld [vmem:[%s2516_s29 + $0x30] ss:$20 sps:$4 sm:$0xff]  }
  0xae   : > { %2047 = vmatprep.subr.bf16.mxu1 %v2447_v38 }
  0xb0   : > { %1392 = vmatmul.mubr.bf16.gmra.mrb[32].mxu1 %v2159_v10  ;;  %1950 = vmatpush3.bf16.msra.mxu0 %v2287_v11 }
  0xb1   : > { %2048 = vmatpush3.bf16.msra.mxu1 %v2447_v38  ;;  %1951 = vmatprep.subr.bf16.mxu0 %v2299_v13 }
  0xb2   : > { %2049 = vmatprep.subr.bf16.mxu1 %v2452_v39  ;;  %2059 = vmatprep.mubr.bf16.mxu1 %v2163_v1 }
  0xb4   : > { %1952 = vmatpush3.bf16.msra.mxu0 %v2313_v15 }
  0xb5   : > { %2050 = vmatpush3.bf16.msra.mxu1 %v2452_v39  ;;  %1953 = vmatprep.subr.bf16.mxu0 %v2325_v17 }
  0xb6   : > { %2051 = vmatprep.subr.bf16.mxu1 %v2476_v45 }
  0xb8   : > { %1954 = vmatpush3.bf16.msra.mxu0 %v2337_v19 }
  0xb9   : > { %2052 = vmatpush3.bf16.msra.mxu1 %v2476_v45  ;;  %1955 = vmatprep.subr.bf16.mxu0 %v2349_v21 }
  0xba   : > { %2053 = vmatprep.subr.bf16.mxu1 %v2486_v47 }
  0xbc   : > { %1956 = vmatpush3.bf16.msra.mxu0 %v2363_v23 }
  0xbd   : > { %2054 = vmatpush3.bf16.msra.mxu1 %v2486_v47  ;;  %1957 = vmatprep.subr.bf16.mxu0 %v2375_v25 }
  0xbe   : > { %2055 = vmatprep.subr.bf16.mxu1 %v2501_v48 }
  0xc0   : > { %1958 = vmatpush3.bf16.msra.mxu0 %v2390_v27 }
  0xc1   : > { %2056 = vmatpush3.bf16.msra.mxu1 %v2501_v48  ;;  %1959 = vmatprep.subr.bf16.mxu0 %v2402_v29 }
  0xc2   : > { %2057 = vmatprep.subr.bf16.mxu1 %v2510_v49 }
  0xc4   : > { %1960 = vmatpush3.bf16.msra.mxu0 %v2420_v31 }
  0xc5   : > { %2058 = vmatpush3.bf16.msra.mxu1 %v2510_v49 }
  0xc7   : > { %1433 = vmatmul.mubr.bf16.vlgmr.msra.gmra.mrb[32].mxu0 %v2160_v3 }
  0xc8   : > { %2060 = vmatmul.mubr.bf16.vlgmr.msra.gmra.mrb[36].mxu1 %v2164_v5  ;;  %1440 = vmatprep.mubr.bf16.mxu0 %v2165_v7 }
  0xcf   : > { %1441 = vmatmul.mubr.bf16.gmra.mrb[36].mxu0 %v2167_v9 }
  0xfa   : > { %v1735_v11 = vpop.f32.mrb[0].mxu0 }
  0xfb   : > { %v1763_v12 = vpop.f32.mrb[0].mxu1  ;;  %v1736_v13 = vpop.f32.mrb[1].mxu0 }
  0xfc   : > { %v1737_v14 = vadd.f32 %v1736_v13, %v1735_v11  ;;  %v1764_v15 = vpop.f32.mrb[1].mxu1  ;;  %v1738_v16 = vpop.f32.mrb[2].mxu0 }
  0xfd   : > { %v1765_v17 = vadd.f32 %v1764_v15, %v1763_v12  ;;  %v1766_v18 = vpop.f32.mrb[2].mxu1  ;;  %v1739_v19 = vpop.f32.mrb[3].mxu0 }
  0xfe   : > { %v1740_v20 = vadd.f32 %v1739_v19, %v1738_v16  ;;  %v1767_v21 = vpop.f32.mrb[3].mxu1 }
  0xff   : > { %v1768_v22 = vadd.f32 %v1767_v21, %v1766_v18  ;;  %v802_v23 = vadd.f32 %v1765_v17, %v1737_v14 }
 0x101   : > { %v805_v24 = vadd.f32 %v1768_v22, %v1740_v20 }
 0x102   : > { %v1741_v25 = vpop.f32.mrb[4].mxu0 }
 0x103   : > { %v1769_v26 = vpop.f32.mrb[4].mxu1  ;;  %v1742_v27 = vpop.f32.mrb[5].mxu0 }
 0x104   : > { %v1770_v28 = vpop.f32.mrb[5].mxu1  ;;  %v1743_v29 = vadd.f32 %v1742_v27, %v1741_v25  ;;  %v1744_v31 = vpop.f32.mrb[6].mxu0 }
 0x105   : > { %v1771_v30 = vadd.f32 %v1770_v28, %v1769_v26  ;;  %v1772_v36 = vpop.f32.mrb[6].mxu1  ;;  %v1745_v37 = vpop.f32.mrb[7].mxu0 }
 0x106   : > { %v1773_v38 = vpop.f32.mrb[7].mxu1  ;;  %v1746_v39 = vadd.f32 %v1745_v37, %v1744_v31 }
 0x107   : > { %v1774_v41 = vadd.f32 %v1773_v38, %v1772_v36  ;;  %v810_v42 = vadd.f32 %v1771_v30, %v1743_v29 }
 0x109   : > { %v813_v43 = vadd.f32 %v1774_v41, %v1746_v39 }
 0x11a   : > { %v2001_v44 = vpop.f32.mrb[8].mxu0 }
 0x11b   : > { %v1801_v45 = vpop.f32.mrb[8].mxu1  ;;  %v2682_v46 = vadd.f32 %v2001_v44, %v810_v42  ;;  %v850_v47 = vpop.f32.mrb[9].mxu0 }
 0x11c   : > { %v1802_v48 = vpop.f32.mrb[9].mxu1  ;;  %v2684_v49 = vadd.f32 %v850_v47, %v802_v23  ;;  %v2002_v50 = vpop.f32.mrb[10].mxu0 }
 0x11d   : > { %v1803_v51 = vadd.f32 %v1802_v48, %v1801_v45  ;;  %v1804_v52 = vpop.f32.mrb[10].mxu1  ;;  %v2686_v53 = vadd.f32 %v2002_v50, %v813_v43  ;;  %v853_v54 = vpop.f32.mrb[11].mxu0 }
 0x11e   : > { %v1805_v55 = vpop.f32.mrb[11].mxu1  ;;  %v2688_v56 = vadd.f32 %v853_v54, %v805_v24 }
 0x11f   : > { %v1806_v57 = vadd.f32 %v1805_v55, %v1804_v52 }
 0x123   : > { %v1807_v58 = vpop.f32.mrb[12].mxu1 }
 0x124   : > { %v1808_v59 = vpop.f32.mrb[13].mxu1 }
 0x125   : > { %v1809_v60 = vadd.f32 %v1808_v59, %v1807_v58  ;;  %v1810_v61 = vpop.f32.mrb[14].mxu1 }
 0x126   : > { %v1811_v62 = vpop.f32.mrb[15].mxu1 }
 0x127   : > { %v1812_v63 = vadd.f32 %v1811_v62, %v1810_v61 }
 0x13a   : > { %v1829_v32 = vpop.f32.mrb[12].mxu0 }
 0x13b   : > { %v2021_v33 = vpop.f32.mrb[16].mxu1  ;;  %v1830_v34 = vpop.f32.mrb[13].mxu0 }
 0x13c   : > { %v1061_v35 = vpop.f32.mrb[17].mxu1  ;;  %v1831_v0 = vadd.f32 %v1830_v34, %v1829_v32  ;;  %v1832_v40 = vpop.f32.mrb[14].mxu0 }
 0x13d   : > { %v2022_v2 = vpop.f32.mrb[18].mxu1  ;;  %v1833_v4 = vpop.f32.mrb[15].mxu0 }
 0x13e   : > { %v1064_v6 = vpop.f32.mrb[19].mxu1  ;;  %v1834_v8 = vadd.f32 %v1833_v4, %v1832_v40  ;;  %v1013_v10 = vadd.f32 %v1831_v0, %v1803_v51 }
 0x140   : > { %v2690_v1 = vadd.f32 %v1061_v35, %v1013_v10  ;;  %v1016_v3 = vadd.f32 %v1834_v8, %v1806_v57 }
 0x142   : > { %v1498_v5 = vmax.f32 %v2684_v49, %v2690_v1  ;;  %v2694_v7 = vadd.f32 %v1064_v6, %v1016_v3  ;;  %v1835_v9 = vpop.f32.mrb[16].mxu0 }
 0x143   : > { %v1836_v11 = vpop.f32.mrb[17].mxu0 }
 0x144   : > { %v1499_v12 = vmax.f32 %v2688_v56, %v2694_v7  ;;  %v1837_v13 = vadd.f32 %v1836_v11, %v1835_v9  ;;  %v1838_v14 = vpop.f32.mrb[18].mxu0 }
 0x145   : > { %v1839_v15 = vpop.f32.mrb[19].mxu0 }
 0x146   : > { %v1021_v16 = vadd.f32 %v1837_v13, %v1809_v60  ;;  %v1840_v17 = vadd.f32 %v1839_v15, %v1838_v14 }
 0x148   : > { %v2698_v18 = vadd.f32 %v2021_v33, %v1021_v16  ;;  %v1024_v19 = vadd.f32 %v1840_v17, %v1812_v63 }
 0x14a   : > { %v1500_v20 = vmax.f32 %v2682_v46, %v2698_v18  ;;  %v2702_v21 = vadd.f32 %v2022_v2, %v1024_v19 }
 0x14c   : > { %v1501_v22 = vmax.f32 %v2686_v53, %v2702_v21 }
 0x15a   : > { %v1867_v23 = vpop.f32.mrb[20].mxu0 }
 0x15b   : > { %v1895_v24 = vpop.f32.mrb[20].mxu1  ;;  %v1868_v25 = vpop.f32.mrb[21].mxu0 }
 0x15c   : > { %v1896_v26 = vpop.f32.mrb[21].mxu1  ;;  %v1869_v27 = vadd.f32 %v1868_v25, %v1867_v23  ;;  %v1870_v29 = vpop.f32.mrb[22].mxu0 }
 0x15d   : > { %v1897_v28 = vadd.f32 %v1896_v26, %v1895_v24  ;;  %v1898_v30 = vpop.f32.mrb[22].mxu1  ;;  %v1871_v31 = vpop.f32.mrb[23].mxu0 }
 0x15e   : > { %v1899_v36 = vpop.f32.mrb[23].mxu1  ;;  %v1872_v37 = vadd.f32 %v1871_v31, %v1870_v29 }
 0x15f   : > { %v1900_v38 = vadd.f32 %v1899_v36, %v1898_v30  ;;  %v1224_v39 = vadd.f32 %v1897_v28, %v1869_v27 }
 0x161   : > { %v1227_v41 = vadd.f32 %v1900_v38, %v1872_v37 }
 0x162   : > { %v1873_v42 = vpop.f32.mrb[24].mxu0 }
 0x163   : > { %v1901_v43 = vpop.f32.mrb[24].mxu1  ;;  %v1874_v44 = vpop.f32.mrb[25].mxu0 }
 0x164   : > { %v1902_v45 = vpop.f32.mrb[25].mxu1  ;;  %v1875_v47 = vadd.f32 %v1874_v44, %v1873_v42  ;;  %v1876_v50 = vpop.f32.mrb[26].mxu0 }
 0x165   : > { %v1903_v48 = vadd.f32 %v1902_v45, %v1901_v43  ;;  %v1904_v51 = vpop.f32.mrb[26].mxu1  ;;  %v1877_v52 = vpop.f32.mrb[27].mxu0 }
 0x166   : > { %v1905_v54 = vpop.f32.mrb[27].mxu1  ;;  %v1878_v55 = vadd.f32 %v1877_v52, %v1876_v50 }
 0x167   : > { %v1906_v57 = vadd.f32 %v1905_v54, %v1904_v51  ;;  %v1232_v58 = vadd.f32 %v1903_v48, %v1875_v47 }
 0x169   : > { %v1235_v59 = vadd.f32 %v1906_v57, %v1878_v55 }
 0x17a   : > { %v2041_v60 = vpop.f32.mrb[28].mxu0 }
 0x17b   : > { %v1933_v61 = vpop.f32.mrb[28].mxu1  ;;  %v1281_v62 = vadd.f32 %v2041_v60, %v1232_v58  ;;  %v1272_v63 = vpop.f32.mrb[29].mxu0 }
 0x17c   : > { %v1934_v32 = vpop.f32.mrb[29].mxu1  ;;  %v1273_v33 = vadd.f32 %v1272_v63, %v1224_v39  ;;  %v2042_v34 = vpop.f32.mrb[30].mxu0  ;;  %v1716_v39 = vld [vmem:[%s2733_s5] ss:$0 sm:$0xff] }
 0x17d   : > { %v1935_v35 = vadd.f32 %v1934_v32, %v1933_v61  ;;  %v1936_v0 = vpop.f32.mrb[30].mxu1  ;;  %v1284_v40 = vadd.f32 %v2042_v34, %v1235_v59  ;;  %v1275_v2 = vpop.f32.mrb[31].mxu0 }
 0x17e   : > { %v1937_v4 = vpop.f32.mrb[31].mxu1  ;;  %v1276_v6 = vadd.f32 %v1275_v2, %v1227_v41 }
 0x17f   : > { %v1938_v8 = vadd.f32 %v1937_v4, %v1936_v0 }
 0x183   : > { %v1939_v10 = vpop.f32.mrb[32].mxu1 }
 0x184   : > { %v1940_v3 = vpop.f32.mrb[33].mxu1 }
 0x185   : > { %v1941_v9 = vadd.f32 %v1940_v3, %v1939_v10  ;;  %v1942_v11 = vpop.f32.mrb[34].mxu1 }
 0x186   : > { %v1943_v13 = vpop.f32.mrb[35].mxu1 }
 0x187   : > { %v1944_v14 = vadd.f32 %v1943_v13, %v1942_v11 }
 0x19a   : > { %v1961_v15 = vpop.f32.mrb[32].mxu0 }
 0x19b   : > { %v2061_v16 = vpop.f32.mrb[36].mxu1  ;;  %v1962_v17 = vpop.f32.mrb[33].mxu0 }
 0x19c   : > { %v1483_v19 = vpop.f32.mrb[37].mxu1  ;;  %v1963_v23 = vadd.f32 %v1962_v17, %v1961_v15  ;;  %v1964_v24 = vpop.f32.mrb[34].mxu0 }
 0x19d   : > { %v2062_v25 = vpop.f32.mrb[38].mxu1  ;;  %v1965_v26 = vpop.f32.mrb[35].mxu0 }
 0x19e   : > { %v1486_v27 = vpop.f32.mrb[39].mxu1  ;;  %v1966_v28 = vadd.f32 %v1965_v26, %v1964_v24  ;;  %v1435_v29 = vadd.f32 %v1963_v23, %v1935_v35 }
 0x1a0   : > { %v1484_v30 = vadd.f32 %v1483_v19, %v1435_v29  ;;  %v1438_v31 = vadd.f32 %v1966_v28, %v1938_v8 }
 0x1a2   : > { %v1502_v36 = vmax.f32 %v1273_v33, %v1484_v30  ;;  %v1487_v37 = vadd.f32 %v1486_v27, %v1438_v31  ;;  %v1967_v38 = vpop.f32.mrb[36].mxu0 }
 0x1a3   : > { %v1968_v41 = vpop.f32.mrb[37].mxu0 }
 0x1a4   : > { %v1506_v42 = vmax.f32 %v1498_v5, %v1502_v36  ;;  %v1503_v43 = vmax.f32 %v1276_v6, %v1487_v37  ;;  %v1969_v44 = vadd.f32 %v1968_v41, %v1967_v38  ;;  %v1970_v45 = vpop.f32.mrb[38].mxu0 }
 0x1a5   : > { %v1971_v47 = vpop.f32.mrb[39].mxu0 }
 0x1a6   : > { %v1517_v48 = vadd.f32 %v1716_v39, %v1506_v42  ;;  %v1507_v50 = vmax.f32 %v1499_v12, %v1503_v43  ;;  %v1443_v51 = vadd.f32 %v1969_v44, %v1941_v9  ;;  %v1972_v52 = vadd.f32 %v1971_v47, %v1970_v45 }
 0x1a8   : > { %v1521_v54 = vmax.f32 %v1517_v48, 0.0  ;;  %v1518_v55 = vadd.f32 %v1716_v39, %v1507_v50  ;;  %v1492_v57 = vadd.f32 %v2061_v16, %v1443_v51  ;;  %v1446_v49 = vadd.f32 %v1972_v52, %v1944_v14 }
 0x1aa   : > { %1525 = vst [vmem:[%s331_s11] sm:$0xff] %v1521_v54  ;;  %v1522_v1 = vmax.f32 %v1518_v55, 0.0  ;;  %v1504_v5 = vmax.f32 %v1281_v62, %v1492_v57  ;;  %v1495_v58 = vadd.f32 %v2062_v25, %v1446_v49 }
 0x1ac   : > { %1526 = vst [vmem:[%s331_s11 + $0x8] sm:$0xff] %v1522_v1  ;;  %v1508_v56 = vmax.f32 %v1500_v20, %v1504_v5  ;;  %v1505_v7 = vmax.f32 %v1284_v40, %v1495_v58 }
 0x1ae   : > { %v1519_v12 = vadd.f32 %v1716_v39, %v1508_v56  ;;  %v1509_v59 = vmax.f32 %v1501_v22, %v1505_v7 }
 0x1b0   : > { %v1523_v60 = vmax.f32 %v1519_v12, 0.0  ;;  %v1520_v61 = vadd.f32 %v1716_v39, %v1509_v59 }
 0x1b2   : > { %1527 = vst [vmem:[%s331_s11 + $0x10] sm:$0xff] %v1523_v60  ;;  %v1524_v63 = vmax.f32 %v1520_v61, 0.0 }
 0x1b4   : > { %1528 = vst [vmem:[%s331_s11 + $0x18] sm:$0xff] %v1524_v63 }
 0x1b5 PF: > { %s16_s21 = sadd.s32 1, %s2174_s21  }
 0x1b6   : > { %p13_p4 = scmp.ge.s32.totalorder %s16_s21, 4  }
 0x1b8   :  { %15 = sbr.rel (!%p13_p4) target bundleno = 1 (0x1), region = 83 }

// kernel: surrogate_cnn_forward.5
= control target key start
LH: loop header
LB: loop body
LE: loop exit
PB: predicated region body
PF: predicated region fallthrough
CT: control target
= control target key end

     0   :  { %s6767_s1 = inlined_call_operand.vmem [shape: f32[4096,256], index: 1, kind: input, shape index: {}]   ;;  %s6768_s0 = inlined_call_operand.vmem [shape: f32[8,4096], index: 0, kind: input, shape index: {}]   ;;  %s6769_s3 = inlined_call_operand.vmem [shape: f32[256,128], index: 3, kind: input, shape index: {}]   ;;  %s6770_s2 = inlined_call_operand.vmem [shape: f32[1,256], index: 2, kind: input, shape index: {}]   ;;  %s6771_s4 = inlined_call_operand.vmem [shape: f32[1,128], index: 4, kind: input, shape index: {}]   ;;  %s6772_s5 = inlined_call_operand.vmem [shape: f32[8,128], index: 5, kind: output, shape index: {}]  }
   0x1   :  { %v53_v0 = vld [vmem:[%s6767_s1 + $0x8] sm:$0xff]  ;;  %v55_v1 = vld [vmem:[%s6767_s1 + $0x18] sm:$0xff]  ;;  %v52_v5 = vld [vmem:[%s6767_s1] sm:$0xff] }
   0x2   :  { %v565_v2 = vld [vmem:[%s6767_s1 + $0x1008] sm:$0xff]  ;;  %v2376_v3 = vpack.c.bf16 %v55_v1, %v53_v0  ;;  %v567_v4 = vld [vmem:[%s6767_s1 + $0x1018] sm:$0xff]  ;;  %v54_v6 = vld [vmem:[%s6767_s1 + $0x10] sm:$0xff] }
   0x3   :  { %v2888_v7 = vpack.c.bf16 %v567_v4, %v565_v2  ;;  %v2378_v8 = vpack.c.bf16 %v54_v6, %v52_v5  ;;  %v564_v9 = vld [vmem:[%s6767_s1 + $0x1000] sm:$0xff]  ;;  %v566_v10 = vld [vmem:[%s6767_s1 + $0x1010] sm:$0xff]  ;;  %v57_v11 = vld [vmem:[%s6767_s1 + $0x28] sm:$0xff] }
   0x4   :  { %2377 = vmatprep.subr.bf16.mxu1 %v2376_v3  ;;  %v2890_v12 = vpack.c.bf16 %v566_v10, %v564_v9  ;;  %v59_v13 = vld [vmem:[%s6767_s1 + $0x38] sm:$0xff]  ;;  %v569_v14 = vld [vmem:[%s6767_s1 + $0x1028] sm:$0xff]  ;;  %v56_v18 = vld [vmem:[%s6767_s1 + $0x20] sm:$0xff] }
   0x5   :  { %v571_v15 = vld [vmem:[%s6767_s1 + $0x1038] sm:$0xff]  ;;  %2889 = vmatprep.subr.bf16.mxu0 %v2888_v7  ;;  %2379 = vmatpush1.bf16.msra.mxu1 %v2378_v8  ;;  %v2380_v16 = vpack.c.bf16 %v59_v13, %v57_v11  ;;  %v58_v19 = vld [vmem:[%s6767_s1 + $0x30] sm:$0xff]  ;;  %v568_v20 = vld [vmem:[%s6767_s1 + $0x1020] sm:$0xff] }
   0x6   :  { %v2892_v17 = vpack.c.bf16 %v571_v15, %v569_v14  ;;  %2891 = vmatpush1.bf16.msra.mxu0 %v2890_v12  ;;  %v2382_v21 = vpack.c.bf16 %v58_v19, %v56_v18  ;;  %v570_v22 = vld [vmem:[%s6767_s1 + $0x1030] sm:$0xff]  ;;  %v61_v23 = vld [vmem:[%s6767_s1 + $0x48] sm:$0xff]  ;;  %v63_v24 = vld [vmem:[%s6767_s1 + $0x58] sm:$0xff] }
   0x7   :  { %2381 = vmatprep.subr.bf16.mxu1 %v2380_v16  ;;  %v2894_v25 = vpack.c.bf16 %v570_v22, %v568_v20  ;;  %v2384_v26 = vpack.c.bf16 %v63_v24, %v61_v23  ;;  %v573_v27 = vld [vmem:[%s6767_s1 + $0x1048] sm:$0xff]  ;;  %v575_v28 = vld [vmem:[%s6767_s1 + $0x1058] sm:$0xff]  ;;  %v60_v29 = vld [vmem:[%s6767_s1 + $0x40] sm:$0xff] }
   0x8   :  { %2893 = vmatprep.subr.bf16.mxu0 %v2892_v17  ;;  %v2896_v30 = vpack.c.bf16 %v575_v28, %v573_v27  ;;  %v62_v31 = vld [vmem:[%s6767_s1 + $0x50] sm:$0xff]  ;;  %v572_v32 = vld [vmem:[%s6767_s1 + $0x1040] sm:$0xff]  ;;  %v65_v35 = vld [vmem:[%s6767_s1 + $0x68] sm:$0xff] }
   0x9   :  { %v574_v33 = vld [vmem:[%s6767_s1 + $0x1050] sm:$0xff]  ;;  %2383 = vmatpush1.bf16.msra.mxu1 %v2382_v21  ;;  %v2386_v34 = vpack.c.bf16 %v62_v31, %v60_v29  ;;  %v67_v36 = vld [vmem:[%s6767_s1 + $0x78] sm:$0xff]  ;;  %v577_v37 = vld [vmem:[%s6767_s1 + $0x1068] sm:$0xff] }
   0xa   :  { %2895 = vmatpush1.bf16.msra.mxu0 %v2894_v25  ;;  %2385 = vmatprep.subr.bf16.mxu1 %v2384_v26  ;;  %v2898_v38 = vpack.c.bf16 %v574_v33, %v572_v32  ;;  %v2388_v39 = vpack.c.bf16 %v67_v36, %v65_v35  ;;  %v579_v40 = vld [vmem:[%s6767_s1 + $0x1078] sm:$0xff]  ;;  %v64_v41 = vld [vmem:[%s6767_s1 + $0x60] sm:$0xff]  ;;  %v66_v42 = vld [vmem:[%s6767_s1 + $0x70] sm:$0xff] }
   0xb   :  { %2897 = vmatprep.subr.bf16.mxu0 %v2896_v30  ;;  %v2900_v43 = vpack.c.bf16 %v579_v40, %v577_v37  ;;  %v576_v44 = vld [vmem:[%s6767_s1 + $0x1060] sm:$0xff]  ;;  %v578_v45 = vld [vmem:[%s6767_s1 + $0x1070] sm:$0xff]  ;;  %v69_v46 = vld [vmem:[%s6767_s1 + $0x88] sm:$0xff]  ;;  %v2390_v50 = vpack.c.bf16 %v66_v42, %v64_v41 }
   0xc   :  { %v71_v47 = vld [vmem:[%s6767_s1 + $0x98] sm:$0xff]  ;;  %v581_v48 = vld [vmem:[%s6767_s1 + $0x1088] sm:$0xff]  ;;  %v2902_v51 = vpack.c.bf16 %v578_v45, %v576_v44  ;;  %v68_v53 = vld [vmem:[%s6767_s1 + $0x80] sm:$0xff] }
   0xd   :  { %v583_v49 = vld [vmem:[%s6767_s1 + $0x1098] sm:$0xff]  ;;  %2387 = vmatpush1.bf16.msra.mxu1 %v2386_v34  ;;  %v2392_v52 = vpack.c.bf16 %v71_v47, %v69_v46  ;;  %v70_v54 = vld [vmem:[%s6767_s1 + $0x90] sm:$0xff]  ;;  %v580_v55 = vld [vmem:[%s6767_s1 + $0x1080] sm:$0xff] }
   0xe   :  { %2899 = vmatpush1.bf16.msra.mxu0 %v2898_v38  ;;  %2389 = vmatprep.subr.bf16.mxu1 %v2388_v39  ;;  %v2904_v56 = vpack.c.bf16 %v583_v49, %v581_v48  ;;  %v582_v57 = vld [vmem:[%s6767_s1 + $0x1090] sm:$0xff]  ;;  %v73_v58 = vld [vmem:[%s6767_s1 + $0xa8] sm:$0xff]  ;;  %v75_v59 = vld [vmem:[%s6767_s1 + $0xb8] sm:$0xff]  ;;  %v2394_v62 = vpack.c.bf16 %v70_v54, %v68_v53 }
   0xf   :  { %2901 = vmatprep.subr.bf16.mxu0 %v2900_v43  ;;  %v585_v60 = vld [vmem:[%s6767_s1 + $0x10a8] sm:$0xff]  ;;  %v587_v61 = vld [vmem:[%s6767_s1 + $0x10b8] sm:$0xff]  ;;  %v2906_v63 = vpack.c.bf16 %v582_v57, %v580_v55  ;;  %v2396_v0 = vpack.c.bf16 %v75_v59, %v73_v58  ;;  %v72_v1 = vld [vmem:[%s6767_s1 + $0xa0] sm:$0xff] }
  0x10   :  { %v74_v2 = vld [vmem:[%s6767_s1 + $0xb0] sm:$0xff]  ;;  %v584_v3 = vld [vmem:[%s6767_s1 + $0x10a0] sm:$0xff]  ;;  %v2908_v4 = vpack.c.bf16 %v587_v61, %v585_v60  ;;  %v77_v6 = vld [vmem:[%s6767_s1 + $0xc8] sm:$0xff] }
  0x11   :  { %2391 = vmatpush1.bf16.msra.mxu1 %v2390_v50  ;;  %v586_v5 = vld [vmem:[%s6767_s1 + $0x10b0] sm:$0xff]  ;;  %v79_v7 = vld [vmem:[%s6767_s1 + $0xd8] sm:$0xff]  ;;  %v589_v8 = vld [vmem:[%s6767_s1 + $0x10c8] sm:$0xff]  ;;  %v2398_v10 = vpack.c.bf16 %v74_v2, %v72_v1 }
  0x12   :  { %2903 = vmatpush1.bf16.msra.mxu0 %v2902_v51  ;;  %2393 = vmatprep.subr.bf16.mxu1 %v2392_v52  ;;  %v591_v9 = vld [vmem:[%s6767_s1 + $0x10d8] sm:$0xff]  ;;  %v2910_v11 = vpack.c.bf16 %v586_v5, %v584_v3  ;;  %v2400_v12 = vpack.c.bf16 %v79_v7, %v77_v6  ;;  %v76_v13 = vld [vmem:[%s6767_s1 + $0xc0] sm:$0xff]  ;;  %v78_v14 = vld [vmem:[%s6767_s1 + $0xd0] sm:$0xff] }
  0x13   :  { %2905 = vmatprep.subr.bf16.mxu0 %v2904_v56  ;;  %v588_v15 = vld [vmem:[%s6767_s1 + $0x10c0] sm:$0xff]  ;;  %v2912_v16 = vpack.c.bf16 %v591_v9, %v589_v8  ;;  %v590_v17 = vld [vmem:[%s6767_s1 + $0x10d0] sm:$0xff]  ;;  %v81_v18 = vld [vmem:[%s6767_s1 + $0xe8] sm:$0xff]  ;;  %v2402_v22 = vpack.c.bf16 %v78_v14, %v76_v13 }
  0x14   :  { %v83_v19 = vld [vmem:[%s6767_s1 + $0xf8] sm:$0xff]  ;;  %v593_v20 = vld [vmem:[%s6767_s1 + $0x10e8] sm:$0xff]  ;;  %v2914_v23 = vpack.c.bf16 %v590_v17, %v588_v15  ;;  %v80_v25 = vld [vmem:[%s6767_s1 + $0xe0] sm:$0xff] }
  0x15   :  { %2395 = vmatpush1.bf16.msra.mxu1 %v2394_v62  ;;  %v595_v21 = vld [vmem:[%s6767_s1 + $0x10f8] sm:$0xff]  ;;  %v2404_v24 = vpack.c.bf16 %v83_v19, %v81_v18  ;;  %v82_v26 = vld [vmem:[%s6767_s1 + $0xf0] sm:$0xff]  ;;  %v592_v27 = vld [vmem:[%s6767_s1 + $0x10e0] sm:$0xff] }
  0x16   :  { %2907 = vmatpush1.bf16.msra.mxu0 %v2906_v63  ;;  %2397 = vmatprep.subr.bf16.mxu1 %v2396_v0  ;;  %v2916_v28 = vpack.c.bf16 %v595_v21, %v593_v20  ;;  %v594_v29 = vld [vmem:[%s6767_s1 + $0x10f0] sm:$0xff]  ;;  %v85_v30 = vld [vmem:[%s6767_s1 + $0x108] sm:$0xff]  ;;  %v87_v31 = vld [vmem:[%s6767_s1 + $0x118] sm:$0xff]  ;;  %v2406_v34 = vpack.c.bf16 %v82_v26, %v80_v25 }
  0x17   :  { %2909 = vmatprep.subr.bf16.mxu0 %v2908_v4  ;;  %v597_v32 = vld [vmem:[%s6767_s1 + $0x1108] sm:$0xff]  ;;  %v599_v33 = vld [vmem:[%s6767_s1 + $0x1118] sm:$0xff]  ;;  %v2918_v35 = vpack.c.bf16 %v594_v29, %v592_v27  ;;  %v2408_v36 = vpack.c.bf16 %v87_v31, %v85_v30  ;;  %v84_v37 = vld [vmem:[%s6767_s1 + $0x100] sm:$0xff] }
  0x18   :  { %v86_v38 = vld [vmem:[%s6767_s1 + $0x110] sm:$0xff]  ;;  %v596_v39 = vld [vmem:[%s6767_s1 + $0x1100] sm:$0xff]  ;;  %v2920_v40 = vpack.c.bf16 %v599_v33, %v597_v32  ;;  %v89_v42 = vld [vmem:[%s6767_s1 + $0x128] sm:$0xff] }
  0x19   :  { %2399 = vmatpush1.bf16.msra.mxu1 %v2398_v10  ;;  %v598_v41 = vld [vmem:[%s6767_s1 + $0x1110] sm:$0xff]  ;;  %v91_v43 = vld [vmem:[%s6767_s1 + $0x138] sm:$0xff]  ;;  %v601_v44 = vld [vmem:[%s6767_s1 + $0x1128] sm:$0xff]  ;;  %v2410_v46 = vpack.c.bf16 %v86_v38, %v84_v37 }
  0x1a   :  { %2911 = vmatpush1.bf16.msra.mxu0 %v2910_v11  ;;  %2401 = vmatprep.subr.bf16.mxu1 %v2400_v12  ;;  %v603_v45 = vld [vmem:[%s6767_s1 + $0x1138] sm:$0xff]  ;;  %v2922_v47 = vpack.c.bf16 %v598_v41, %v596_v39  ;;  %v2412_v48 = vpack.c.bf16 %v91_v43, %v89_v42  ;;  %v88_v49 = vld [vmem:[%s6767_s1 + $0x120] sm:$0xff]  ;;  %v90_v50 = vld [vmem:[%s6767_s1 + $0x130] sm:$0xff] }
  0x1b   :  { %2913 = vmatprep.subr.bf16.mxu0 %v2912_v16  ;;  %v600_v51 = vld [vmem:[%s6767_s1 + $0x1120] sm:$0xff]  ;;  %v2924_v52 = vpack.c.bf16 %v603_v45, %v601_v44  ;;  %v602_v53 = vld [vmem:[%s6767_s1 + $0x1130] sm:$0xff]  ;;  %v93_v54 = vld [vmem:[%s6767_s1 + $0x148] sm:$0xff]  ;;  %v2414_v58 = vpack.c.bf16 %v90_v50, %v88_v49 }
  0x1c   :  { %v95_v55 = vld [vmem:[%s6767_s1 + $0x158] sm:$0xff]  ;;  %v605_v56 = vld [vmem:[%s6767_s1 + $0x1148] sm:$0xff]  ;;  %v2926_v59 = vpack.c.bf16 %v602_v53, %v600_v51  ;;  %v92_v61 = vld [vmem:[%s6767_s1 + $0x140] sm:$0xff] }
  0x1d   :  { %2403 = vmatpush1.bf16.msra.mxu1 %v2402_v22  ;;  %v607_v57 = vld [vmem:[%s6767_s1 + $0x1158] sm:$0xff]  ;;  %v2416_v60 = vpack.c.bf16 %v95_v55, %v93_v54  ;;  %v94_v62 = vld [vmem:[%s6767_s1 + $0x150] sm:$0xff]  ;;  %v604_v63 = vld [vmem:[%s6767_s1 + $0x1140] sm:$0xff] }
  0x1e   :  { %2915 = vmatpush1.bf16.msra.mxu0 %v2914_v23  ;;  %2405 = vmatprep.subr.bf16.mxu1 %v2404_v24  ;;  %v2928_v0 = vpack.c.bf16 %v607_v57, %v605_v56  ;;  %v606_v1 = vld [vmem:[%s6767_s1 + $0x1150] sm:$0xff]  ;;  %v97_v2 = vld [vmem:[%s6767_s1 + $0x168] sm:$0xff]  ;;  %v99_v3 = vld [vmem:[%s6767_s1 + $0x178] sm:$0xff]  ;;  %v2418_v6 = vpack.c.bf16 %v94_v62, %v92_v61 }
  0x1f   :  { %2917 = vmatprep.subr.bf16.mxu0 %v2916_v28  ;;  %v609_v4 = vld [vmem:[%s6767_s1 + $0x1168] sm:$0xff]  ;;  %v611_v5 = vld [vmem:[%s6767_s1 + $0x1178] sm:$0xff]  ;;  %v96_v7 = vld [vmem:[%s6767_s1 + $0x160] sm:$0xff]  ;;  %v2930_v8 = vpack.c.bf16 %v606_v1, %v604_v63  ;;  %v2420_v9 = vpack.c.bf16 %v99_v3, %v97_v2 }
  0x20   :  { %v98_v10 = vld [vmem:[%s6767_s1 + $0x170] sm:$0xff]  ;;  %v608_v11 = vld [vmem:[%s6767_s1 + $0x1160] sm:$0xff]  ;;  %v2932_v13 = vpack.c.bf16 %v611_v5, %v609_v4  ;;  %v101_v14 = vld [vmem:[%s6767_s1 + $0x188] sm:$0xff] }
  0x21   :  { %2407 = vmatpush1.bf16.msra.mxu1 %v2406_v34  ;;  %v610_v12 = vld [vmem:[%s6767_s1 + $0x1170] sm:$0xff]  ;;  %v103_v15 = vld [vmem:[%s6767_s1 + $0x198] sm:$0xff]  ;;  %v21_v16 = vld [vmem:[%s6768_s0 + $0x8] sm:$0xff]  ;;  %v2422_v20 = vpack.c.bf16 %v98_v10, %v96_v7 }
  0x22   :  { %2919 = vmatpush1.bf16.msra.mxu0 %v2918_v35  ;;  %2409 = vmatprep.subr.bf16.mxu1 %v2408_v36  ;;  %v613_v17 = vld [vmem:[%s6767_s1 + $0x1188] sm:$0xff]  ;;  %v615_v18 = vld [vmem:[%s6767_s1 + $0x1198] sm:$0xff]  ;;  %v2934_v21 = vpack.c.bf16 %v610_v12, %v608_v11  ;;  %v2424_v22 = vpack.c.bf16 %v103_v15, %v101_v14  ;;  %v100_v23 = vld [vmem:[%s6767_s1 + $0x180] sm:$0xff] }
  0x23   :  { %2921 = vmatprep.subr.bf16.mxu0 %v2920_v40  ;;  %1152 = vmatprep.mubr.f32.mxu1 %v21_v16  ;;  %v37_v19 = vld [vmem:[%s6768_s0 + $0x88] sm:$0xff]  ;;  %v102_v24 = vld [vmem:[%s6767_s1 + $0x190] sm:$0xff]  ;;  %v612_v25 = vld [vmem:[%s6767_s1 + $0x1180] sm:$0xff]  ;;  %v2936_v26 = vpack.c.bf16 %v615_v18, %v613_v17 }
  0x24   :  { %1720 = vmatprep.mubr.f32.mxu0 %v37_v19  ;;  %v614_v27 = vld [vmem:[%s6767_s1 + $0x1190] sm:$0xff]  ;;  %v105_v28 = vld [vmem:[%s6767_s1 + $0x1a8] sm:$0xff]  ;;  %v107_v29 = vld [vmem:[%s6767_s1 + $0x1b8] sm:$0xff]  ;;  %v2426_v32 = vpack.c.bf16 %v102_v24, %v100_v23 }
  0x25   :  { %2411 = vmatpush1.bf16.msra.mxu1 %v2410_v46  ;;  %v617_v30 = vld [vmem:[%s6767_s1 + $0x11a8] sm:$0xff]  ;;  %v619_v31 = vld [vmem:[%s6767_s1 + $0x11b8] sm:$0xff]  ;;  %v2938_v33 = vpack.c.bf16 %v614_v27, %v612_v25  ;;  %v2428_v34 = vpack.c.bf16 %v107_v29, %v105_v28  ;;  %v104_v35 = vld [vmem:[%s6767_s1 + $0x1a0] sm:$0xff] }
  0x26   :  { %2923 = vmatpush1.bf16.msra.mxu0 %v2922_v47  ;;  %2413 = vmatprep.subr.bf16.mxu1 %v2412_v48  ;;  %v106_v36 = vld [vmem:[%s6767_s1 + $0x1b0] sm:$0xff]  ;;  %v616_v37 = vld [vmem:[%s6767_s1 + $0x11a0] sm:$0xff]  ;;  %v2940_v38 = vpack.c.bf16 %v619_v31, %v617_v30  ;;  %v109_v40 = vld [vmem:[%s6767_s1 + $0x1c8] sm:$0xff] }
  0x27   :  { %2925 = vmatprep.subr.bf16.mxu0 %v2924_v52  ;;  %v618_v39 = vld [vmem:[%s6767_s1 + $0x11b0] sm:$0xff]  ;;  %v111_v41 = vld [vmem:[%s6767_s1 + $0x1d8] sm:$0xff]  ;;  %v621_v42 = vld [vmem:[%s6767_s1 + $0x11c8] sm:$0xff]  ;;  %v2430_v44 = vpack.c.bf16 %v106_v36, %v104_v35 }
  0x28   :  { %v623_v43 = vld [vmem:[%s6767_s1 + $0x11d8] sm:$0xff]  ;;  %v2942_v45 = vpack.c.bf16 %v618_v39, %v616_v37  ;;  %v2432_v46 = vpack.c.bf16 %v111_v41, %v109_v40  ;;  %v108_v47 = vld [vmem:[%s6767_s1 + $0x1c0] sm:$0xff]  ;;  %v110_v48 = vld [vmem:[%s6767_s1 + $0x1d0] sm:$0xff] }
  0x29   :  { %2415 = vmatpush1.bf16.msra.mxu1 %v2414_v58  ;;  %v620_v49 = vld [vmem:[%s6767_s1 + $0x11c0] sm:$0xff]  ;;  %v2944_v50 = vpack.c.bf16 %v623_v43, %v621_v42  ;;  %v622_v51 = vld [vmem:[%s6767_s1 + $0x11d0] sm:$0xff]  ;;  %v113_v52 = vld [vmem:[%s6767_s1 + $0x1e8] sm:$0xff]  ;;  %v2434_v56 = vpack.c.bf16 %v110_v48, %v108_v47 }
  0x2a   :  { %2927 = vmatpush1.bf16.msra.mxu0 %v2926_v59  ;;  %2417 = vmatprep.subr.bf16.mxu1 %v2416_v60  ;;  %v115_v53 = vld [vmem:[%s6767_s1 + $0x1f8] sm:$0xff]  ;;  %v625_v54 = vld [vmem:[%s6767_s1 + $0x11e8] sm:$0xff]  ;;  %v2946_v57 = vpack.c.bf16 %v622_v51, %v620_v49  ;;  %v112_v59 = vld [vmem:[%s6767_s1 + $0x1e0] sm:$0xff] }
  0x2b   :  { %2929 = vmatprep.subr.bf16.mxu0 %v2928_v0  ;;  %v627_v55 = vld [vmem:[%s6767_s1 + $0x11f8] sm:$0xff]  ;;  %v2436_v58 = vpack.c.bf16 %v115_v53, %v113_v52  ;;  %v114_v60 = vld [vmem:[%s6767_s1 + $0x1f0] sm:$0xff]  ;;  %v624_v61 = vld [vmem:[%s6767_s1 + $0x11e0] sm:$0xff] }
  0x2c   :  { %v2948_v62 = vpack.c.bf16 %v627_v55, %v625_v54  ;;  %v626_v63 = vld [vmem:[%s6767_s1 + $0x11f0] sm:$0xff]  ;;  %v117_v0 = vld [vmem:[%s6767_s1 + $0x208] sm:$0xff]  ;;  %v119_v1 = vld [vmem:[%s6767_s1 + $0x218] sm:$0xff]  ;;  %v2438_v4 = vpack.c.bf16 %v114_v60, %v112_v59 }
  0x2d   :  { %2419 = vmatpush1.bf16.msra.mxu1 %v2418_v6  ;;  %v629_v2 = vld [vmem:[%s6767_s1 + $0x1208] sm:$0xff]  ;;  %v631_v3 = vld [vmem:[%s6767_s1 + $0x1218] sm:$0xff]  ;;  %v2950_v5 = vpack.c.bf16 %v626_v63, %v624_v61  ;;  %v2440_v6 = vpack.c.bf16 %v119_v1, %v117_v0  ;;  %v116_v7 = vld [vmem:[%s6767_s1 + $0x200] sm:$0xff] }
  0x2e   :  { %2931 = vmatpush1.bf16.msra.mxu0 %v2930_v8  ;;  %2421 = vmatprep.subr.bf16.mxu1 %v2420_v9  ;;  %v118_v8 = vld [vmem:[%s6767_s1 + $0x210] sm:$0xff]  ;;  %v628_v9 = vld [vmem:[%s6767_s1 + $0x1200] sm:$0xff]  ;;  %v2952_v10 = vpack.c.bf16 %v631_v3, %v629_v2  ;;  %v121_v12 = vld [vmem:[%s6767_s1 + $0x228] sm:$0xff] }
  0x2f   :  { %2933 = vmatprep.subr.bf16.mxu0 %v2932_v13  ;;  %v630_v11 = vld [vmem:[%s6767_s1 + $0x1210] sm:$0xff]  ;;  %v123_v13 = vld [vmem:[%s6767_s1 + $0x238] sm:$0xff]  ;;  %v633_v14 = vld [vmem:[%s6767_s1 + $0x1228] sm:$0xff]  ;;  %v2442_v17 = vpack.c.bf16 %v118_v8, %v116_v7 }
  0x30   :  { %v635_v15 = vld [vmem:[%s6767_s1 + $0x1238] sm:$0xff]  ;;  %v20_v16 = vld [vmem:[%s6768_s0] sm:$0xff]  ;;  %v2954_v19 = vpack.c.bf16 %v630_v11, %v628_v9  ;;  %v634_v25 = vld [vmem:[%s6767_s1 + $0x1230] sm:$0xff] }
  0x31   :  { %2423 = vmatpush1.bf16.msra.mxu1 %v2422_v20  ;;  %v36_v18 = vld [vmem:[%s6768_s0 + $0x80] sm:$0xff]  ;;  %v2444_v20 = vpack.c.bf16 %v123_v13, %v121_v12  ;;  %v2956_v24 = vpack.c.bf16 %v635_v15, %v633_v14  ;;  %v127_v27 = vld [vmem:[%s6767_s1 + $0x258] sm:$0xff]  ;;  %v637_v28 = vld [vmem:[%s6767_s1 + $0x1248] sm:$0xff] }
  0x32   :  { %2935 = vmatpush1.bf16.msra.mxu0 %v2934_v21  ;;  %2425 = vmatprep.subr.bf16.mxu1 %v2424_v22  ;;  %v120_v21 = vld [vmem:[%s6767_s1 + $0x220] sm:$0xff]  ;;  %v122_v22 = vld [vmem:[%s6767_s1 + $0x230] sm:$0xff]  ;;  %v639_v29 = vld [vmem:[%s6767_s1 + $0x1258] sm:$0xff] }
  0x33   :  { %2937 = vmatprep.subr.bf16.mxu0 %v2936_v26  ;;  %v632_v23 = vld [vmem:[%s6767_s1 + $0x1220] sm:$0xff]  ;;  %v125_v26 = vld [vmem:[%s6767_s1 + $0x248] sm:$0xff]  ;;  %v2446_v30 = vpack.c.bf16 %v122_v22, %v120_v21  ;;  %v2960_v36 = vpack.c.bf16 %v639_v29, %v637_v28  ;;  %v638_v37 = vld [vmem:[%s6767_s1 + $0x1250] sm:$0xff] }
  0x34   :  { %v2958_v31 = vpack.c.bf16 %v634_v25, %v632_v23  ;;  %v636_v35 = vld [vmem:[%s6767_s1 + $0x1240] sm:$0xff]  ;;  %v131_v39 = vld [vmem:[%s6767_s1 + $0x278] sm:$0xff]  ;;  %v641_v40 = vld [vmem:[%s6767_s1 + $0x1268] sm:$0xff] }
  0x35   :  { %2427 = vmatpush1.bf16.msra.mxu1 %v2426_v32  ;;  %v2448_v32 = vpack.c.bf16 %v127_v27, %v125_v26  ;;  %v643_v41 = vld [vmem:[%s6767_s1 + $0x1278] sm:$0xff]  ;;  %v2962_v43 = vpack.c.bf16 %v638_v37, %v636_v35  ;;  %v640_v47 = vld [vmem:[%s6767_s1 + $0x1260] sm:$0xff]  ;;  %v642_v49 = vld [vmem:[%s6767_s1 + $0x1270] sm:$0xff] }
  0x36   :  { %2939 = vmatpush1.bf16.msra.mxu0 %v2938_v33  ;;  %2429 = vmatprep.subr.bf16.mxu1 %v2428_v34  ;;  %v124_v33 = vld [vmem:[%s6767_s1 + $0x240] sm:$0xff]  ;;  %v126_v34 = vld [vmem:[%s6767_s1 + $0x250] sm:$0xff]  ;;  %v2964_v48 = vpack.c.bf16 %v643_v41, %v641_v40  ;;  %v135_v51 = vld [vmem:[%s6767_s1 + $0x298] sm:$0xff]  ;;  %v2966_v55 = vpack.c.bf16 %v642_v49, %v640_v47 }
  0x37   :  { %2941 = vmatprep.subr.bf16.mxu0 %v2940_v38  ;;  %v129_v38 = vld [vmem:[%s6767_s1 + $0x268] sm:$0xff]  ;;  %v2450_v42 = vpack.c.bf16 %v126_v34, %v124_v33  ;;  %v647_v53 = vld [vmem:[%s6767_s1 + $0x1298] sm:$0xff]  ;;  %v644_v59 = vld [vmem:[%s6767_s1 + $0x1280] sm:$0xff] }
  0x38   :  { %v645_v52 = vld [vmem:[%s6767_s1 + $0x1288] sm:$0xff]  ;;  %v646_v61 = vld [vmem:[%s6767_s1 + $0x1290] sm:$0xff]  ;;  %v139_v63 = vld [vmem:[%s6767_s1 + $0x2b8] sm:$0xff] }
  0x39   :  { %2431 = vmatpush1.bf16.msra.mxu1 %v2430_v44  ;;  %v2452_v44 = vpack.c.bf16 %v131_v39, %v129_v38  ;;  %v2968_v60 = vpack.c.bf16 %v647_v53, %v645_v52  ;;  %v649_v0 = vld [vmem:[%s6767_s1 + $0x12a8] sm:$0xff]  ;;  %v651_v1 = vld [vmem:[%s6767_s1 + $0x12b8] sm:$0xff]  ;;  %v2970_v3 = vpack.c.bf16 %v646_v61, %v644_v59  ;;  %v648_v7 = vld [vmem:[%s6767_s1 + $0x12a0] sm:$0xff] }
  0x3a   :  { %2943 = vmatpush1.bf16.msra.mxu0 %v2942_v45  ;;  %2433 = vmatprep.subr.bf16.mxu1 %v2432_v46  ;;  %v128_v45 = vld [vmem:[%s6767_s1 + $0x260] sm:$0xff]  ;;  %v130_v46 = vld [vmem:[%s6767_s1 + $0x270] sm:$0xff]  ;;  %v2972_v8 = vpack.c.bf16 %v651_v1, %v649_v0  ;;  %v143_v11 = vld [vmem:[%s6767_s1 + $0x2d8] sm:$0xff] }
  0x3b   :  { %2945 = vmatprep.subr.bf16.mxu0 %v2944_v50  ;;  %v133_v50 = vld [vmem:[%s6767_s1 + $0x288] sm:$0xff]  ;;  %v2454_v54 = vpack.c.bf16 %v130_v46, %v128_v45  ;;  %v650_v9 = vld [vmem:[%s6767_s1 + $0x12b0] sm:$0xff]  ;;  %v655_v13 = vld [vmem:[%s6767_s1 + $0x12d8] sm:$0xff] }
  0x3c   :  { %v653_v12 = vld [vmem:[%s6767_s1 + $0x12c8] sm:$0xff]  ;;  %v140_v15 = vld [vmem:[%s6767_s1 + $0x2c0] sm:$0xff]  ;;  %v147_v23 = vld [vmem:[%s6767_s1 + $0x2f8] sm:$0xff] }
  0x3d   :  { %2435 = vmatpush1.bf16.msra.mxu1 %v2434_v56  ;;  %v2456_v56 = vpack.c.bf16 %v135_v51, %v133_v50  ;;  %v2976_v21 = vpack.c.bf16 %v655_v13, %v653_v12  ;;  %v145_v22 = vld [vmem:[%s6767_s1 + $0x2e8] sm:$0xff]  ;;  %v659_v26 = vld [vmem:[%s6767_s1 + $0x12f8] sm:$0xff]  ;;  %v656_v33 = vld [vmem:[%s6767_s1 + $0x12e0] sm:$0xff] }
  0x3e   :  { %2947 = vmatpush1.bf16.msra.mxu0 %v2946_v57  ;;  %2437 = vmatprep.subr.bf16.mxu1 %v2436_v58  ;;  %v132_v57 = vld [vmem:[%s6767_s1 + $0x280] sm:$0xff]  ;;  %v134_v58 = vld [vmem:[%s6767_s1 + $0x290] sm:$0xff]  ;;  %v657_v25 = vld [vmem:[%s6767_s1 + $0x12e8] sm:$0xff] }
  0x3f   :  { %2949 = vmatprep.subr.bf16.mxu0 %v2948_v62  ;;  %v137_v62 = vld [vmem:[%s6767_s1 + $0x2a8] sm:$0xff]  ;;  %v2458_v2 = vpack.c.bf16 %v134_v58, %v132_v57  ;;  %v39_v27 = vld [vmem:[%s6768_s0 + $0x98] sm:$0xff]  ;;  %v2980_v34 = vpack.c.bf16 %v659_v26, %v657_v25  ;;  %v658_v35 = vld [vmem:[%s6767_s1 + $0x12f0] sm:$0xff] }
  0x40   :  { %v151_v37 = vld [vmem:[%s6767_s1 + $0x318] sm:$0xff]  ;;  %v661_v38 = vld [vmem:[%s6767_s1 + $0x1308] sm:$0xff]  ;;  %v2982_v41 = vpack.c.bf16 %v658_v35, %v656_v33  ;;  %v660_v45 = vld [vmem:[%s6767_s1 + $0x1300] sm:$0xff] }
  0x41   :  { %2439 = vmatpush1.bf16.msra.mxu1 %v2438_v4  ;;  %v2460_v4 = vpack.c.bf16 %v139_v63, %v137_v62  ;;  %v663_v39 = vld [vmem:[%s6767_s1 + $0x1318] sm:$0xff]  ;;  %v662_v47 = vld [vmem:[%s6767_s1 + $0x1310] sm:$0xff]  ;;  %v665_v50 = vld [vmem:[%s6767_s1 + $0x1328] sm:$0xff] }
  0x42   :  { %2951 = vmatpush1.bf16.msra.mxu0 %v2950_v5  ;;  %2441 = vmatprep.subr.bf16.mxu1 %v2440_v6  ;;  %v136_v5 = vld [vmem:[%s6767_s1 + $0x2a0] sm:$0xff]  ;;  %v138_v6 = vld [vmem:[%s6767_s1 + $0x2b0] sm:$0xff]  ;;  %v2984_v46 = vpack.c.bf16 %v663_v39, %v661_v38  ;;  %v155_v49 = vld [vmem:[%s6767_s1 + $0x338] sm:$0xff]  ;;  %v2986_v53 = vpack.c.bf16 %v662_v47, %v660_v45 }
  0x43   :  { %2953 = vmatprep.subr.bf16.mxu0 %v2952_v10  ;;  %v141_v10 = vld [vmem:[%s6767_s1 + $0x2c8] sm:$0xff]  ;;  %v2462_v14 = vpack.c.bf16 %v138_v6, %v136_v5  ;;  %v667_v51 = vld [vmem:[%s6767_s1 + $0x1338] sm:$0xff]  ;;  %v664_v57 = vld [vmem:[%s6767_s1 + $0x1320] sm:$0xff] }
  0x44   :  { %1153 = vmatmul.mubr.f32.vlgmr.msra.gmra.mrb[0].mxu1 %v20_v16  ;;  %v2974_v16 = vpack.c.bf16 %v650_v9, %v648_v7  ;;  %v2988_v58 = vpack.c.bf16 %v667_v51, %v665_v50  ;;  %v666_v59 = vld [vmem:[%s6767_s1 + $0x1330] sm:$0xff]  ;;  %v159_v61 = vld [vmem:[%s6767_s1 + $0x358] sm:$0xff]  ;;  %v669_v62 = vld [vmem:[%s6767_s1 + $0x1348] sm:$0xff] }
  0x45   :  { %2443 = vmatpush1.bf16.msra.mxu1 %v2442_v17  ;;  %1721 = vmatmul.mubr.f32.vlgmr.msra.gmra.mrb[0].mxu0 %v36_v18  ;;  %v2464_v17 = vpack.c.bf16 %v143_v11, %v141_v10  ;;  %v142_v18 = vld [vmem:[%s6767_s1 + $0x2d0] sm:$0xff]  ;;  %v671_v63 = vld [vmem:[%s6767_s1 + $0x1358] sm:$0xff]  ;;  %v2990_v1 = vpack.c.bf16 %v666_v59, %v664_v57  ;;  %v668_v5 = vld [vmem:[%s6767_s1 + $0x1340] sm:$0xff] }
  0x46   :  { %2955 = vmatpush1.bf16.msra.mxu0 %v2954_v19  ;;  %2445 = vmatprep.subr.bf16.mxu1 %v2444_v20  ;;  %v652_v19 = vld [vmem:[%s6767_s1 + $0x12c0] sm:$0xff]  ;;  %v654_v20 = vld [vmem:[%s6767_s1 + $0x12d0] sm:$0xff]  ;;  %v2466_v28 = vpack.c.bf16 %v142_v18, %v140_v15  ;;  %v2992_v6 = vpack.c.bf16 %v671_v63, %v669_v62  ;;  %v163_v9 = vld [vmem:[%s6767_s1 + $0x378] sm:$0xff] }
  0x47   :  { %2957 = vmatprep.subr.bf16.mxu0 %v2956_v24  ;;  %v23_v24 = vld [vmem:[%s6768_s0 + $0x18] sm:$0xff]  ;;  %1791 = vmatprep.mubr.f32.mxu0 %v39_v27  ;;  %v2978_v29 = vpack.c.bf16 %v654_v20, %v652_v19  ;;  %v670_v7 = vld [vmem:[%s6767_s1 + $0x1350] sm:$0xff]  ;;  %v673_v10 = vld [vmem:[%s6767_s1 + $0x1368] sm:$0xff] }
  0x48   :  { %1223 = vmatprep.mubr.f32.mxu1 %v23_v24  ;;  %v675_v11 = vld [vmem:[%s6767_s1 + $0x1378] sm:$0xff]  ;;  %v2994_v13 = vpack.c.bf16 %v670_v7, %v668_v5  ;;  %v160_v15 = vld [vmem:[%s6767_s1 + $0x360] sm:$0xff]  ;;  %v674_v19 = vld [vmem:[%s6767_s1 + $0x1370] sm:$0xff] }
  0x49   :  { %2447 = vmatpush1.bf16.msra.mxu1 %v2446_v30  ;;  %v2468_v30 = vpack.c.bf16 %v147_v23, %v145_v22  ;;  %v2996_v18 = vpack.c.bf16 %v675_v11, %v673_v10  ;;  %v165_v20 = vld [vmem:[%s6767_s1 + $0x388] sm:$0xff]  ;;  %v679_v23 = vld [vmem:[%s6767_s1 + $0x1398] sm:$0xff]  ;;  %v164_v27 = vld [vmem:[%s6767_s1 + $0x380] sm:$0xff] }
  0x4a   :  { %2959 = vmatpush1.bf16.msra.mxu0 %v2958_v31  ;;  %2449 = vmatprep.subr.bf16.mxu1 %v2448_v32  ;;  %v144_v31 = vld [vmem:[%s6767_s1 + $0x2e0] sm:$0xff]  ;;  %v146_v32 = vld [vmem:[%s6767_s1 + $0x2f0] sm:$0xff]  ;;  %v677_v22 = vld [vmem:[%s6767_s1 + $0x1388] sm:$0xff] }
  0x4b   :  { %2961 = vmatprep.subr.bf16.mxu0 %v2960_v36  ;;  %v149_v36 = vld [vmem:[%s6767_s1 + $0x308] sm:$0xff]  ;;  %v2470_v40 = vpack.c.bf16 %v146_v32, %v144_v31  ;;  %v678_v31 = vld [vmem:[%s6767_s1 + $0x1390] sm:$0xff]  ;;  %v171_v33 = vld [vmem:[%s6767_s1 + $0x3b8] sm:$0xff] }
  0x4c   :  { %v169_v32 = vld [vmem:[%s6767_s1 + $0x3a8] sm:$0xff]  ;;  %v683_v35 = vld [vmem:[%s6767_s1 + $0x13b8] sm:$0xff]  ;;  %v168_v39 = vld [vmem:[%s6767_s1 + $0x3a0] sm:$0xff] }
  0x4d   :  { %2451 = vmatpush1.bf16.msra.mxu1 %v2450_v42  ;;  %v2472_v42 = vpack.c.bf16 %v151_v37, %v149_v36  ;;  %v2492_v38 = vpack.c.bf16 %v171_v33, %v169_v32  ;;  %v175_v45 = vld [vmem:[%s6767_s1 + $0x3d8] sm:$0xff]  ;;  %v172_v51 = vld [vmem:[%s6767_s1 + $0x3c0] sm:$0xff]  ;;  %v701_v32 = vld [vmem:[%s6767_s1 + $0x1448] sm:$0xff] }
  0x4e   :  { %2963 = vmatpush1.bf16.msra.mxu0 %v2962_v43  ;;  %2453 = vmatprep.subr.bf16.mxu1 %v2452_v44  ;;  %v148_v43 = vld [vmem:[%s6767_s1 + $0x300] sm:$0xff]  ;;  %v150_v44 = vld [vmem:[%s6767_s1 + $0x310] sm:$0xff]  ;;  %v687_v47 = vld [vmem:[%s6767_s1 + $0x13d8] sm:$0xff] }
  0x4f   :  { %2965 = vmatprep.subr.bf16.mxu0 %v2964_v48  ;;  %v153_v48 = vld [vmem:[%s6767_s1 + $0x328] sm:$0xff]  ;;  %v2474_v52 = vpack.c.bf16 %v150_v44, %v148_v43  ;;  %v682_v43 = vld [vmem:[%s6767_s1 + $0x13b0] sm:$0xff]  ;;  %v179_v57 = vld [vmem:[%s6767_s1 + $0x3f8] sm:$0xff] }
  0x50   :  { %v173_v44 = vld [vmem:[%s6767_s1 + $0x3c8] sm:$0xff]  ;;  %v691_v59 = vld [vmem:[%s6767_s1 + $0x13f8] sm:$0xff]  ;;  %v176_v63 = vld [vmem:[%s6767_s1 + $0x3e0] sm:$0xff] }
  0x51   :  { %2455 = vmatpush1.bf16.msra.mxu1 %v2454_v54  ;;  %v2476_v54 = vpack.c.bf16 %v155_v49, %v153_v48  ;;  %v2496_v50 = vpack.c.bf16 %v175_v45, %v173_v44  ;;  %v183_v5 = vld [vmem:[%s6767_s1 + $0x418] sm:$0xff]  ;;  %v180_v11 = vld [vmem:[%s6767_s1 + $0x400] sm:$0xff]  ;;  %v193_v44 = vld [vmem:[%s6767_s1 + $0x468] sm:$0xff] }
  0x52   :  { %2967 = vmatpush1.bf16.msra.mxu0 %v2966_v55  ;;  %2457 = vmatprep.subr.bf16.mxu1 %v2456_v56  ;;  %v152_v55 = vld [vmem:[%s6767_s1 + $0x320] sm:$0xff]  ;;  %v154_v56 = vld [vmem:[%s6767_s1 + $0x330] sm:$0xff]  ;;  %v695_v7 = vld [vmem:[%s6767_s1 + $0x1418] sm:$0xff] }
  0x53   :  { %2969 = vmatprep.subr.bf16.mxu0 %v2968_v60  ;;  %v157_v60 = vld [vmem:[%s6767_s1 + $0x348] sm:$0xff]  ;;  %v2478_v0 = vpack.c.bf16 %v154_v56, %v152_v55  ;;  %v686_v55 = vld [vmem:[%s6767_s1 + $0x13d0] sm:$0xff]  ;;  %v703_v33 = vld [vmem:[%s6767_s1 + $0x1458] sm:$0xff] }
  0x54   :  { %v177_v56 = vld [vmem:[%s6767_s1 + $0x3e8] sm:$0xff]  ;;  %v195_v45 = vld [vmem:[%s6767_s1 + $0x478] sm:$0xff] }
  0x55   :  { %2459 = vmatpush1.bf16.msra.mxu1 %v2458_v2  ;;  %v2480_v2 = vpack.c.bf16 %v159_v61, %v157_v60  ;;  %v2500_v62 = vpack.c.bf16 %v179_v57, %v177_v56  ;;  %v197_v56 = vld [vmem:[%s6767_s1 + $0x488] sm:$0xff]  ;;  %v199_v57 = vld [vmem:[%s6767_s1 + $0x498] sm:$0xff] }
  0x56   :  { %2971 = vmatpush1.bf16.msra.mxu0 %v2970_v3  ;;  %2461 = vmatprep.subr.bf16.mxu1 %v2460_v4  ;;  %v156_v3 = vld [vmem:[%s6767_s1 + $0x340] sm:$0xff]  ;;  %v158_v4 = vld [vmem:[%s6767_s1 + $0x350] sm:$0xff] }
  0x57   :  { %2973 = vmatprep.subr.bf16.mxu0 %v2972_v8  ;;  %v161_v8 = vld [vmem:[%s6767_s1 + $0x368] sm:$0xff]  ;;  %v2482_v12 = vpack.c.bf16 %v158_v4, %v156_v3  ;;  %v690_v3 = vld [vmem:[%s6767_s1 + $0x13f0] sm:$0xff] }
  0x58   :  { %v181_v4 = vld [vmem:[%s6767_s1 + $0x408] sm:$0xff] }
  0x59   :  { %2463 = vmatpush1.bf16.msra.mxu1 %v2462_v14  ;;  %v2484_v14 = vpack.c.bf16 %v163_v9, %v161_v8  ;;  %v2504_v10 = vpack.c.bf16 %v183_v5, %v181_v4  ;;  %v201_v4 = vld [vmem:[%s6767_s1 + $0x4a8] sm:$0xff]  ;;  %v203_v5 = vld [vmem:[%s6767_s1 + $0x4b8] sm:$0xff] }
  0x5a   :  { %2975 = vmatpush1.bf16.msra.mxu0 %v2974_v16  ;;  %2465 = vmatprep.subr.bf16.mxu1 %v2464_v17  ;;  %v162_v16 = vld [vmem:[%s6767_s1 + $0x370] sm:$0xff]  ;;  %v672_v17 = vld [vmem:[%s6767_s1 + $0x1360] sm:$0xff] }
  0x5b   :  { %2977 = vmatprep.subr.bf16.mxu0 %v2976_v21  ;;  %v167_v21 = vld [vmem:[%s6767_s1 + $0x398] sm:$0xff]  ;;  %v2486_v24 = vpack.c.bf16 %v162_v16, %v160_v15  ;;  %v2998_v25 = vpack.c.bf16 %v674_v19, %v672_v17  ;;  %v694_v15 = vld [vmem:[%s6767_s1 + $0x1410] sm:$0xff]  ;;  %v185_v16 = vld [vmem:[%s6767_s1 + $0x428] sm:$0xff] }
  0x5c   :  { %v2488_v26 = vpack.c.bf16 %v167_v21, %v165_v20  ;;  %v187_v17 = vld [vmem:[%s6767_s1 + $0x438] sm:$0xff]  ;;  %v22_v20 = vld [vmem:[%s6768_s0 + $0x10] sm:$0xff] }
  0x5d   :  { %2467 = vmatpush1.bf16.msra.mxu1 %v2466_v28  ;;  %v166_v28 = vld [vmem:[%s6767_s1 + $0x390] sm:$0xff]  ;;  %v699_v19 = vld [vmem:[%s6767_s1 + $0x1438] sm:$0xff] }
  0x5e   :  { %2979 = vmatpush1.bf16.msra.mxu0 %v2978_v29  ;;  %2469 = vmatprep.subr.bf16.mxu1 %v2468_v30  ;;  %v676_v29 = vld [vmem:[%s6767_s1 + $0x1380] sm:$0xff]  ;;  %v3000_v30 = vpack.c.bf16 %v679_v23, %v677_v22  ;;  %v2490_v36 = vpack.c.bf16 %v166_v28, %v164_v27  ;;  %v38_v22 = vld [vmem:[%s6768_s0 + $0x90] sm:$0xff] }
  0x5f   :  { %2981 = vmatprep.subr.bf16.mxu0 %v2980_v34  ;;  %v681_v34 = vld [vmem:[%s6767_s1 + $0x13a8] sm:$0xff]  ;;  %v3002_v37 = vpack.c.bf16 %v678_v31, %v676_v29  ;;  %v696_v27 = vld [vmem:[%s6767_s1 + $0x1420] sm:$0xff]  ;;  %v698_v29 = vld [vmem:[%s6767_s1 + $0x1430] sm:$0xff] }
  0x60   :  { %v191_v31 = vld [vmem:[%s6767_s1 + $0x458] sm:$0xff] }
  0x61   :  { %2471 = vmatpush1.bf16.msra.mxu1 %v2470_v40  ;;  %v170_v40 = vld [vmem:[%s6767_s1 + $0x3b0] sm:$0xff] }
  0x62   :  { %2983 = vmatpush1.bf16.msra.mxu0 %v2982_v41  ;;  %2473 = vmatprep.subr.bf16.mxu1 %v2472_v42  ;;  %v680_v41 = vld [vmem:[%s6767_s1 + $0x13a0] sm:$0xff]  ;;  %v3004_v42 = vpack.c.bf16 %v683_v35, %v681_v34  ;;  %v2494_v48 = vpack.c.bf16 %v170_v40, %v168_v39  ;;  %v25_v34 = vld [vmem:[%s6768_s0 + $0x28] sm:$0xff]  ;;  %v190_v40 = vld [vmem:[%s6767_s1 + $0x450] sm:$0xff] }
  0x63   :  { %2985 = vmatprep.subr.bf16.mxu0 %v2984_v46  ;;  %v685_v46 = vld [vmem:[%s6767_s1 + $0x13c8] sm:$0xff]  ;;  %v3006_v49 = vpack.c.bf16 %v682_v43, %v680_v41  ;;  %v188_v39 = vld [vmem:[%s6767_s1 + $0x440] sm:$0xff]  ;;  %v702_v43 = vld [vmem:[%s6767_s1 + $0x1450] sm:$0xff] }
  0x64   :  { %v700_v41 = vld [vmem:[%s6767_s1 + $0x1440] sm:$0xff] }
  0x65   :  { %2475 = vmatpush1.bf16.msra.mxu1 %v2474_v52  ;;  %v174_v52 = vld [vmem:[%s6767_s1 + $0x3d0] sm:$0xff] }
  0x66   :  { %2987 = vmatpush1.bf16.msra.mxu0 %v2986_v53  ;;  %2477 = vmatprep.subr.bf16.mxu1 %v2476_v54  ;;  %v684_v53 = vld [vmem:[%s6767_s1 + $0x13c0] sm:$0xff]  ;;  %v3008_v54 = vpack.c.bf16 %v687_v47, %v685_v46  ;;  %v2498_v60 = vpack.c.bf16 %v174_v52, %v172_v51  ;;  %v705_v46 = vld [vmem:[%s6767_s1 + $0x1468] sm:$0xff]  ;;  %v707_v47 = vld [vmem:[%s6767_s1 + $0x1478] sm:$0xff] }
  0x67   :  { %2989 = vmatprep.subr.bf16.mxu0 %v2988_v58  ;;  %v689_v58 = vld [vmem:[%s6767_s1 + $0x13e8] sm:$0xff]  ;;  %v3010_v61 = vpack.c.bf16 %v686_v55, %v684_v53  ;;  %v192_v51 = vld [vmem:[%s6767_s1 + $0x460] sm:$0xff]  ;;  %v194_v52 = vld [vmem:[%s6767_s1 + $0x470] sm:$0xff] }
  0x68   :  { %v704_v53 = vld [vmem:[%s6767_s1 + $0x1460] sm:$0xff]  ;;  %v706_v55 = vld [vmem:[%s6767_s1 + $0x1470] sm:$0xff] }
  0x69   :  { %2479 = vmatpush1.bf16.msra.mxu1 %v2478_v0  ;;  %v178_v0 = vld [vmem:[%s6767_s1 + $0x3f0] sm:$0xff] }
  0x6a   :  { %2991 = vmatpush1.bf16.msra.mxu0 %v2990_v1  ;;  %2481 = vmatprep.subr.bf16.mxu1 %v2480_v2  ;;  %v688_v1 = vld [vmem:[%s6767_s1 + $0x13e0] sm:$0xff]  ;;  %v3012_v2 = vpack.c.bf16 %v691_v59, %v689_v58  ;;  %v2502_v8 = vpack.c.bf16 %v178_v0, %v176_v63  ;;  %v709_v58 = vld [vmem:[%s6767_s1 + $0x1488] sm:$0xff]  ;;  %v711_v59 = vld [vmem:[%s6767_s1 + $0x1498] sm:$0xff] }
  0x6b   :  { %2993 = vmatprep.subr.bf16.mxu0 %v2992_v6  ;;  %v693_v6 = vld [vmem:[%s6767_s1 + $0x1408] sm:$0xff]  ;;  %v3014_v9 = vpack.c.bf16 %v690_v3, %v688_v1  ;;  %v196_v63 = vld [vmem:[%s6767_s1 + $0x480] sm:$0xff]  ;;  %v198_v0 = vld [vmem:[%s6767_s1 + $0x490] sm:$0xff] }
  0x6c   :  { %v708_v1 = vld [vmem:[%s6767_s1 + $0x1480] sm:$0xff]  ;;  %v710_v3 = vld [vmem:[%s6767_s1 + $0x1490] sm:$0xff] }
  0x6d   :  { %2483 = vmatpush1.bf16.msra.mxu1 %v2482_v12  ;;  %v182_v12 = vld [vmem:[%s6767_s1 + $0x410] sm:$0xff] }
  0x6e   :  { %2995 = vmatpush1.bf16.msra.mxu0 %v2994_v13  ;;  %2485 = vmatprep.subr.bf16.mxu1 %v2484_v14  ;;  %v692_v13 = vld [vmem:[%s6767_s1 + $0x1400] sm:$0xff]  ;;  %v3016_v14 = vpack.c.bf16 %v695_v7, %v693_v6  ;;  %v2506_v21 = vpack.c.bf16 %v182_v12, %v180_v11  ;;  %v713_v6 = vld [vmem:[%s6767_s1 + $0x14a8] sm:$0xff]  ;;  %v715_v7 = vld [vmem:[%s6767_s1 + $0x14b8] sm:$0xff] }
  0x6f   :  { %2997 = vmatprep.subr.bf16.mxu0 %v2996_v18  ;;  %v697_v18 = vld [vmem:[%s6767_s1 + $0x1428] sm:$0xff]  ;;  %v3018_v23 = vpack.c.bf16 %v694_v15, %v692_v13  ;;  %v200_v11 = vld [vmem:[%s6767_s1 + $0x4a0] sm:$0xff]  ;;  %v202_v12 = vld [vmem:[%s6767_s1 + $0x4b0] sm:$0xff] }
  0x70   :  { %v3020_v28 = vpack.c.bf16 %v699_v19, %v697_v18  ;;  %v712_v13 = vld [vmem:[%s6767_s1 + $0x14a0] sm:$0xff]  ;;  %v714_v15 = vld [vmem:[%s6767_s1 + $0x14b0] sm:$0xff]  ;;  %v717_v18 = vld [vmem:[%s6767_s1 + $0x14c8] sm:$0xff] }
  0x71   :  { %2487 = vmatpush1.bf16.msra.mxu1 %v2486_v24  ;;  %v2508_v24 = vpack.c.bf16 %v187_v17, %v185_v16  ;;  %v205_v16 = vld [vmem:[%s6767_s1 + $0x4c8] sm:$0xff]  ;;  %v207_v17 = vld [vmem:[%s6767_s1 + $0x4d8] sm:$0xff] }
  0x72   :  { %2999 = vmatpush1.bf16.msra.mxu0 %v2998_v25  ;;  %2489 = vmatprep.subr.bf16.mxu1 %v2488_v26  ;;  %v184_v25 = vld [vmem:[%s6767_s1 + $0x420] sm:$0xff]  ;;  %v186_v26 = vld [vmem:[%s6767_s1 + $0x430] sm:$0xff]  ;;  %v719_v19 = vld [vmem:[%s6767_s1 + $0x14d8] sm:$0xff] }
  0x73   :  { %3001 = vmatprep.subr.bf16.mxu0 %v3000_v30  ;;  %v189_v30 = vld [vmem:[%s6767_s1 + $0x448] sm:$0xff]  ;;  %v2510_v35 = vpack.c.bf16 %v186_v26, %v184_v25  ;;  %v716_v25 = vld [vmem:[%s6767_s1 + $0x14c0] sm:$0xff]  ;;  %v3040_v26 = vpack.c.bf16 %v719_v19, %v717_v18 }
  0x74   :  { %v224_v19 = vld [vmem:[%s6767_s1 + $0x560] sm:$0xff] }
  0x75   :  { %2491 = vmatpush1.bf16.msra.mxu1 %v2490_v36  ;;  %v41_v36 = vld [vmem:[%s6768_s0 + $0xa8] sm:$0xff] }
  0x76   :  { %3003 = vmatpush1.bf16.msra.mxu0 %v3002_v37  ;;  %2493 = vmatprep.subr.bf16.mxu1 %v2492_v38  ;;  %v3022_v37 = vpack.c.bf16 %v698_v29, %v696_v27  ;;  %v2512_v38 = vpack.c.bf16 %v191_v31, %v189_v30  ;;  %v718_v27 = vld [vmem:[%s6767_s1 + $0x14d0] sm:$0xff]  ;;  %v211_v29 = vld [vmem:[%s6767_s1 + $0x4f8] sm:$0xff]  ;;  %v721_v30 = vld [vmem:[%s6767_s1 + $0x14e8] sm:$0xff] }
  0x77   :  { %3005 = vmatprep.subr.bf16.mxu0 %v3004_v42  ;;  %v3024_v42 = vpack.c.bf16 %v703_v33, %v701_v32  ;;  %v723_v31 = vld [vmem:[%s6767_s1 + $0x14f8] sm:$0xff]  ;;  %v3042_v33 = vpack.c.bf16 %v718_v27, %v716_v25 }
  0x78   :  { %v231_v25 = vld [vmem:[%s6767_s1 + $0x598] sm:$0xff] }
  0x79   :  { %2495 = vmatpush1.bf16.msra.mxu1 %v2494_v48  ;;  %v2514_v48 = vpack.c.bf16 %v190_v40, %v188_v39  ;;  %v722_v39 = vld [vmem:[%s6767_s1 + $0x14f0] sm:$0xff]  ;;  %v213_v40 = vld [vmem:[%s6767_s1 + $0x508] sm:$0xff]  ;;  %v743_v27 = vld [vmem:[%s6767_s1 + $0x1598] sm:$0xff] }
  0x7a   :  { %3007 = vmatpush1.bf16.msra.mxu0 %v3006_v49  ;;  %2497 = vmatprep.subr.bf16.mxu1 %v2496_v50  ;;  %v3026_v49 = vpack.c.bf16 %v702_v43, %v700_v41  ;;  %v2516_v50 = vpack.c.bf16 %v195_v45, %v193_v44  ;;  %v215_v41 = vld [vmem:[%s6767_s1 + $0x518] sm:$0xff] }
  0x7b   :  { %3009 = vmatprep.subr.bf16.mxu0 %v3008_v54  ;;  %v3028_v54 = vpack.c.bf16 %v707_v47, %v705_v46  ;;  %v727_v43 = vld [vmem:[%s6767_s1 + $0x1518] sm:$0xff]  ;;  %v2536_v46 = vpack.c.bf16 %v215_v41, %v213_v40  ;;  %v212_v47 = vld [vmem:[%s6767_s1 + $0x500] sm:$0xff] }
  0x7d   :  { %2499 = vmatpush1.bf16.msra.mxu1 %v2498_v60  ;;  %v2518_v60 = vpack.c.bf16 %v194_v52, %v192_v51  ;;  %v726_v51 = vld [vmem:[%s6767_s1 + $0x1510] sm:$0xff]  ;;  %v217_v52 = vld [vmem:[%s6767_s1 + $0x528] sm:$0xff] }
  0x7e   :  { %3011 = vmatpush1.bf16.msra.mxu0 %v3010_v61  ;;  %2501 = vmatprep.subr.bf16.mxu1 %v2500_v62  ;;  %v3030_v61 = vpack.c.bf16 %v706_v55, %v704_v53  ;;  %v2520_v62 = vpack.c.bf16 %v199_v57, %v197_v56  ;;  %v219_v53 = vld [vmem:[%s6767_s1 + $0x538] sm:$0xff] }
  0x7f   :  { %3013 = vmatprep.subr.bf16.mxu0 %v3012_v2  ;;  %v3032_v2 = vpack.c.bf16 %v711_v59, %v709_v58  ;;  %v731_v55 = vld [vmem:[%s6767_s1 + $0x1538] sm:$0xff]  ;;  %v2540_v58 = vpack.c.bf16 %v219_v53, %v217_v52  ;;  %v216_v59 = vld [vmem:[%s6767_s1 + $0x520] sm:$0xff] }
  0x81   :  { %2503 = vmatpush1.bf16.msra.mxu1 %v2502_v8  ;;  %v2522_v8 = vpack.c.bf16 %v198_v0, %v196_v63  ;;  %v730_v63 = vld [vmem:[%s6767_s1 + $0x1530] sm:$0xff]  ;;  %v221_v0 = vld [vmem:[%s6767_s1 + $0x548] sm:$0xff] }
  0x82   :  { %3015 = vmatpush1.bf16.msra.mxu0 %v3014_v9  ;;  %2505 = vmatprep.subr.bf16.mxu1 %v2504_v10  ;;  %v3034_v9 = vpack.c.bf16 %v710_v3, %v708_v1  ;;  %v2524_v10 = vpack.c.bf16 %v203_v5, %v201_v4  ;;  %v223_v1 = vld [vmem:[%s6767_s1 + $0x558] sm:$0xff] }
  0x83   :  { %3017 = vmatprep.subr.bf16.mxu0 %v3016_v14  ;;  %v3036_v14 = vpack.c.bf16 %v715_v7, %v713_v6  ;;  %v735_v3 = vld [vmem:[%s6767_s1 + $0x1558] sm:$0xff]  ;;  %v2544_v6 = vpack.c.bf16 %v223_v1, %v221_v0  ;;  %v220_v7 = vld [vmem:[%s6767_s1 + $0x540] sm:$0xff] }
  0x84   :  { %1224 = vmatmul.mubr.f32.vlgmr.msra.gmra.mrb[0].mxu1 %v22_v20  ;;  %v2526_v20 = vpack.c.bf16 %v202_v12, %v200_v11  ;;  %v734_v11 = vld [vmem:[%s6767_s1 + $0x1550] sm:$0xff]  ;;  %v225_v12 = vld [vmem:[%s6767_s1 + $0x568] sm:$0xff] }
  0x85   :  { %2507 = vmatpush1.bf16.msra.mxu1 %v2506_v21  ;;  %1792 = vmatmul.mubr.f32.vlgmr.msra.gmra.mrb[0].mxu0 %v38_v22  ;;  %v3038_v21 = vpack.c.bf16 %v714_v15, %v712_v13  ;;  %v2528_v22 = vpack.c.bf16 %v207_v17, %v205_v16  ;;  %v227_v13 = vld [vmem:[%s6767_s1 + $0x578] sm:$0xff] }
  0x86   :  { %3019 = vmatpush1.bf16.msra.mxu0 %v3018_v23  ;;  %2509 = vmatprep.subr.bf16.mxu1 %v2508_v24  ;;  %v204_v23 = vld [vmem:[%s6767_s1 + $0x4c0] sm:$0xff]  ;;  %v206_v24 = vld [vmem:[%s6767_s1 + $0x4d0] sm:$0xff]  ;;  %v739_v15 = vld [vmem:[%s6767_s1 + $0x1578] sm:$0xff]  ;;  %v2548_v18 = vpack.c.bf16 %v227_v13, %v225_v12 }
  0x87   :  { %3021 = vmatprep.subr.bf16.mxu0 %v3020_v28  ;;  %1294 = vmatprep.mubr.f32.mxu1 %v25_v34  ;;  %v209_v28 = vld [vmem:[%s6767_s1 + $0x4e8] sm:$0xff]  ;;  %v2530_v32 = vpack.c.bf16 %v206_v24, %v204_v23  ;;  %v738_v23 = vld [vmem:[%s6767_s1 + $0x1570] sm:$0xff] }
  0x88   :  { %1862 = vmatprep.mubr.f32.mxu0 %v41_v36  ;;  %v2532_v34 = vpack.c.bf16 %v211_v29, %v209_v28  ;;  %v210_v36 = vld [vmem:[%s6767_s1 + $0x4f0] sm:$0xff]  ;;  %v229_v24 = vld [vmem:[%s6767_s1 + $0x588] sm:$0xff] }
  0x89   :  { %2511 = vmatpush1.bf16.msra.mxu1 %v2510_v35  ;;  %v208_v35 = vld [vmem:[%s6767_s1 + $0x4e0] sm:$0xff] }
  0x8a   :  { %3023 = vmatpush1.bf16.msra.mxu0 %v3022_v37  ;;  %2513 = vmatprep.subr.bf16.mxu1 %v2512_v38  ;;  %v720_v37 = vld [vmem:[%s6767_s1 + $0x14e0] sm:$0xff]  ;;  %v3044_v38 = vpack.c.bf16 %v723_v31, %v721_v30  ;;  %v2534_v44 = vpack.c.bf16 %v210_v36, %v208_v35  ;;  %v2552_v30 = vpack.c.bf16 %v231_v25, %v229_v24  ;;  %v742_v35 = vld [vmem:[%s6767_s1 + $0x1590] sm:$0xff]  ;;  %v233_v36 = vld [vmem:[%s6767_s1 + $0x5a8] sm:$0xff] }
  0x8b   :  { %3025 = vmatprep.subr.bf16.mxu0 %v3024_v42  ;;  %v725_v42 = vld [vmem:[%s6767_s1 + $0x1508] sm:$0xff]  ;;  %v3046_v45 = vpack.c.bf16 %v722_v39, %v720_v37  ;;  %v228_v31 = vld [vmem:[%s6767_s1 + $0x580] sm:$0xff]  ;;  %v235_v37 = vld [vmem:[%s6767_s1 + $0x5b8] sm:$0xff] }
  0x8c   :  { %v747_v39 = vld [vmem:[%s6767_s1 + $0x15b8] sm:$0xff]  ;;  %v24_v24 = vld [vmem:[%s6768_s0 + $0x20] sm:$0xff] }
  0x8d   :  { %2515 = vmatpush1.bf16.msra.mxu1 %v2514_v48  ;;  %v214_v48 = vld [vmem:[%s6767_s1 + $0x510] sm:$0xff] }
  0x8e   :  { %3027 = vmatpush1.bf16.msra.mxu0 %v3026_v49  ;;  %2517 = vmatprep.subr.bf16.mxu1 %v2516_v50  ;;  %v724_v49 = vld [vmem:[%s6767_s1 + $0x1500] sm:$0xff]  ;;  %v3048_v50 = vpack.c.bf16 %v727_v43, %v725_v42  ;;  %v2538_v56 = vpack.c.bf16 %v214_v48, %v212_v47  ;;  %v2556_v42 = vpack.c.bf16 %v235_v37, %v233_v36  ;;  %v746_v47 = vld [vmem:[%s6767_s1 + $0x15b0] sm:$0xff]  ;;  %v237_v48 = vld [vmem:[%s6767_s1 + $0x5c8] sm:$0xff] }
  0x8f   :  { %3029 = vmatprep.subr.bf16.mxu0 %v3028_v54  ;;  %v729_v54 = vld [vmem:[%s6767_s1 + $0x1528] sm:$0xff]  ;;  %v3050_v57 = vpack.c.bf16 %v726_v51, %v724_v49  ;;  %v232_v43 = vld [vmem:[%s6767_s1 + $0x5a0] sm:$0xff]  ;;  %v239_v49 = vld [vmem:[%s6767_s1 + $0x5d8] sm:$0xff] }
  0x90   :  { %v751_v51 = vld [vmem:[%s6767_s1 + $0x15d8] sm:$0xff]  ;;  %v765_v36 = vld [vmem:[%s6767_s1 + $0x1648] sm:$0xff] }
  0x91   :  { %2519 = vmatpush1.bf16.msra.mxu1 %v2518_v60  ;;  %v218_v60 = vld [vmem:[%s6767_s1 + $0x530] sm:$0xff]  ;;  %v767_v37 = vld [vmem:[%s6767_s1 + $0x1658] sm:$0xff] }
  0x92   :  { %3031 = vmatpush1.bf16.msra.mxu0 %v3030_v61  ;;  %2521 = vmatprep.subr.bf16.mxu1 %v2520_v62  ;;  %v728_v61 = vld [vmem:[%s6767_s1 + $0x1520] sm:$0xff]  ;;  %v3052_v62 = vpack.c.bf16 %v731_v55, %v729_v54  ;;  %v2542_v4 = vpack.c.bf16 %v218_v60, %v216_v59  ;;  %v2560_v54 = vpack.c.bf16 %v239_v49, %v237_v48  ;;  %v750_v59 = vld [vmem:[%s6767_s1 + $0x15d0] sm:$0xff]  ;;  %v241_v60 = vld [vmem:[%s6767_s1 + $0x5e8] sm:$0xff] }
  0x93   :  { %3033 = vmatprep.subr.bf16.mxu0 %v3032_v2  ;;  %v733_v2 = vld [vmem:[%s6767_s1 + $0x1548] sm:$0xff]  ;;  %v3054_v5 = vpack.c.bf16 %v730_v63, %v728_v61  ;;  %v236_v55 = vld [vmem:[%s6767_s1 + $0x5c0] sm:$0xff]  ;;  %v243_v61 = vld [vmem:[%s6767_s1 + $0x5f8] sm:$0xff] }
  0x94   :  { %v755_v63 = vld [vmem:[%s6767_s1 + $0x15f8] sm:$0xff]  ;;  %v257_v48 = vld [vmem:[%s6767_s1 + $0x668] sm:$0xff] }
  0x95   :  { %2523 = vmatpush1.bf16.msra.mxu1 %v2522_v8  ;;  %v222_v8 = vld [vmem:[%s6767_s1 + $0x550] sm:$0xff]  ;;  %v259_v49 = vld [vmem:[%s6767_s1 + $0x678] sm:$0xff] }
  0x96   :  { %3035 = vmatpush1.bf16.msra.mxu0 %v3034_v9  ;;  %2525 = vmatprep.subr.bf16.mxu1 %v2524_v10  ;;  %v732_v9 = vld [vmem:[%s6767_s1 + $0x1540] sm:$0xff]  ;;  %v3056_v10 = vpack.c.bf16 %v735_v3, %v733_v2  ;;  %v2546_v16 = vpack.c.bf16 %v222_v8, %v220_v7  ;;  %v2564_v2 = vpack.c.bf16 %v243_v61, %v241_v60  ;;  %v754_v7 = vld [vmem:[%s6767_s1 + $0x15f0] sm:$0xff]  ;;  %v245_v8 = vld [vmem:[%s6767_s1 + $0x608] sm:$0xff] }
  0x97   :  { %3037 = vmatprep.subr.bf16.mxu0 %v3036_v14  ;;  %v737_v14 = vld [vmem:[%s6767_s1 + $0x1568] sm:$0xff]  ;;  %v3058_v17 = vpack.c.bf16 %v734_v11, %v732_v9  ;;  %v240_v3 = vld [vmem:[%s6767_s1 + $0x5e0] sm:$0xff]  ;;  %v247_v9 = vld [vmem:[%s6767_s1 + $0x618] sm:$0xff] }
  0x98   :  { %v759_v11 = vld [vmem:[%s6767_s1 + $0x1618] sm:$0xff]  ;;  %v261_v60 = vld [vmem:[%s6767_s1 + $0x688] sm:$0xff] }
  0x99   :  { %2527 = vmatpush1.bf16.msra.mxu1 %v2526_v20  ;;  %v226_v20 = vld [vmem:[%s6767_s1 + $0x570] sm:$0xff]  ;;  %v263_v61 = vld [vmem:[%s6767_s1 + $0x698] sm:$0xff] }
  0x9a   :  { %3039 = vmatpush1.bf16.msra.mxu0 %v3038_v21  ;;  %2529 = vmatprep.subr.bf16.mxu1 %v2528_v22  ;;  %v736_v21 = vld [vmem:[%s6767_s1 + $0x1560] sm:$0xff]  ;;  %v3060_v22 = vpack.c.bf16 %v739_v15, %v737_v14  ;;  %v2550_v28 = vpack.c.bf16 %v226_v20, %v224_v19  ;;  %v2568_v14 = vpack.c.bf16 %v247_v9, %v245_v8  ;;  %v758_v19 = vld [vmem:[%s6767_s1 + $0x1610] sm:$0xff]  ;;  %v249_v20 = vld [vmem:[%s6767_s1 + $0x628] sm:$0xff] }
  0x9b   :  { %3041 = vmatprep.subr.bf16.mxu0 %v3040_v26  ;;  %v741_v26 = vld [vmem:[%s6767_s1 + $0x1588] sm:$0xff]  ;;  %v3062_v29 = vpack.c.bf16 %v738_v23, %v736_v21  ;;  %v244_v15 = vld [vmem:[%s6767_s1 + $0x600] sm:$0xff]  ;;  %v251_v21 = vld [vmem:[%s6767_s1 + $0x638] sm:$0xff] }
  0x9c   :  { %v763_v23 = vld [vmem:[%s6767_s1 + $0x1638] sm:$0xff]  ;;  %v265_v8 = vld [vmem:[%s6767_s1 + $0x6a8] sm:$0xff] }
  0x9d   :  { %2531 = vmatpush1.bf16.msra.mxu1 %v2530_v32  ;;  %v230_v32 = vld [vmem:[%s6767_s1 + $0x590] sm:$0xff]  ;;  %v267_v9 = vld [vmem:[%s6767_s1 + $0x6b8] sm:$0xff] }
  0x9e   :  { %3043 = vmatpush1.bf16.msra.mxu0 %v3042_v33  ;;  %2533 = vmatprep.subr.bf16.mxu1 %v2532_v34  ;;  %v740_v33 = vld [vmem:[%s6767_s1 + $0x1580] sm:$0xff]  ;;  %v3064_v34 = vpack.c.bf16 %v743_v27, %v741_v26  ;;  %v2554_v40 = vpack.c.bf16 %v230_v32, %v228_v31 }
  0x9f   :  { %3045 = vmatprep.subr.bf16.mxu0 %v3044_v38  ;;  %v745_v38 = vld [vmem:[%s6767_s1 + $0x15a8] sm:$0xff]  ;;  %v3066_v41 = vpack.c.bf16 %v742_v35, %v740_v33  ;;  %v40_v26 = vld [vmem:[%s6768_s0 + $0xa0] sm:$0xff]  ;;  %v762_v33 = vld [vmem:[%s6767_s1 + $0x1630] sm:$0xff] }
  0xa0   :  { %v760_v31 = vld [vmem:[%s6767_s1 + $0x1620] sm:$0xff]  ;;  %v255_v35 = vld [vmem:[%s6767_s1 + $0x658] sm:$0xff] }
  0xa1   :  { %2535 = vmatpush1.bf16.msra.mxu1 %v2534_v44  ;;  %v234_v44 = vld [vmem:[%s6767_s1 + $0x5b0] sm:$0xff] }
  0xa2   :  { %3047 = vmatpush1.bf16.msra.mxu0 %v3046_v45  ;;  %2537 = vmatprep.subr.bf16.mxu1 %v2536_v46  ;;  %v744_v45 = vld [vmem:[%s6767_s1 + $0x15a0] sm:$0xff]  ;;  %v3068_v46 = vpack.c.bf16 %v747_v39, %v745_v38  ;;  %v2558_v52 = vpack.c.bf16 %v234_v44, %v232_v43  ;;  %v27_v38 = vld [vmem:[%s6768_s0 + $0x38] sm:$0xff]  ;;  %v254_v44 = vld [vmem:[%s6767_s1 + $0x650] sm:$0xff] }
  0xa3   :  { %3049 = vmatprep.subr.bf16.mxu0 %v3048_v50  ;;  %v749_v50 = vld [vmem:[%s6767_s1 + $0x15c8] sm:$0xff]  ;;  %v3070_v53 = vpack.c.bf16 %v746_v47, %v744_v45  ;;  %v252_v43 = vld [vmem:[%s6767_s1 + $0x640] sm:$0xff]  ;;  %v766_v47 = vld [vmem:[%s6767_s1 + $0x1650] sm:$0xff] }
  0xa4   :  { %v764_v45 = vld [vmem:[%s6767_s1 + $0x1640] sm:$0xff] }
  0xa5   :  { %2539 = vmatpush1.bf16.msra.mxu1 %v2538_v56  ;;  %v238_v56 = vld [vmem:[%s6767_s1 + $0x5d0] sm:$0xff] }
  0xa6   :  { %3051 = vmatpush1.bf16.msra.mxu0 %v3050_v57  ;;  %2541 = vmatprep.subr.bf16.mxu1 %v2540_v58  ;;  %v748_v57 = vld [vmem:[%s6767_s1 + $0x15c0] sm:$0xff]  ;;  %v3072_v58 = vpack.c.bf16 %v751_v51, %v749_v50  ;;  %v2562_v0 = vpack.c.bf16 %v238_v56, %v236_v55  ;;  %v769_v50 = vld [vmem:[%s6767_s1 + $0x1668] sm:$0xff]  ;;  %v771_v51 = vld [vmem:[%s6767_s1 + $0x1678] sm:$0xff] }
  0xa7   :  { %3053 = vmatprep.subr.bf16.mxu0 %v3052_v62  ;;  %v753_v62 = vld [vmem:[%s6767_s1 + $0x15e8] sm:$0xff]  ;;  %v3074_v1 = vpack.c.bf16 %v750_v59, %v748_v57  ;;  %v256_v55 = vld [vmem:[%s6767_s1 + $0x660] sm:$0xff]  ;;  %v258_v56 = vld [vmem:[%s6767_s1 + $0x670] sm:$0xff] }
  0xa8   :  { %v768_v57 = vld [vmem:[%s6767_s1 + $0x1660] sm:$0xff]  ;;  %v770_v59 = vld [vmem:[%s6767_s1 + $0x1670] sm:$0xff] }
  0xa9   :  { %2543 = vmatpush1.bf16.msra.mxu1 %v2542_v4  ;;  %v242_v4 = vld [vmem:[%s6767_s1 + $0x5f0] sm:$0xff] }
  0xaa   :  { %3055 = vmatpush1.bf16.msra.mxu0 %v3054_v5  ;;  %2545 = vmatprep.subr.bf16.mxu1 %v2544_v6  ;;  %v752_v5 = vld [vmem:[%s6767_s1 + $0x15e0] sm:$0xff]  ;;  %v3076_v6 = vpack.c.bf16 %v755_v63, %v753_v62  ;;  %v2566_v12 = vpack.c.bf16 %v242_v4, %v240_v3  ;;  %v773_v62 = vld [vmem:[%s6767_s1 + $0x1688] sm:$0xff]  ;;  %v775_v63 = vld [vmem:[%s6767_s1 + $0x1698] sm:$0xff] }
  0xab   :  { %3057 = vmatprep.subr.bf16.mxu0 %v3056_v10  ;;  %v757_v10 = vld [vmem:[%s6767_s1 + $0x1608] sm:$0xff]  ;;  %v3078_v13 = vpack.c.bf16 %v754_v7, %v752_v5  ;;  %v260_v3 = vld [vmem:[%s6767_s1 + $0x680] sm:$0xff]  ;;  %v262_v4 = vld [vmem:[%s6767_s1 + $0x690] sm:$0xff] }
  0xac   :  { %v772_v5 = vld [vmem:[%s6767_s1 + $0x1680] sm:$0xff]  ;;  %v774_v7 = vld [vmem:[%s6767_s1 + $0x1690] sm:$0xff] }
  0xad   :  { %2547 = vmatpush1.bf16.msra.mxu1 %v2546_v16  ;;  %v246_v16 = vld [vmem:[%s6767_s1 + $0x610] sm:$0xff] }
  0xae   :  { %3059 = vmatpush1.bf16.msra.mxu0 %v3058_v17  ;;  %2549 = vmatprep.subr.bf16.mxu1 %v2548_v18  ;;  %v756_v17 = vld [vmem:[%s6767_s1 + $0x1600] sm:$0xff]  ;;  %v3080_v18 = vpack.c.bf16 %v759_v11, %v757_v10  ;;  %v2570_v25 = vpack.c.bf16 %v246_v16, %v244_v15  ;;  %v777_v10 = vld [vmem:[%s6767_s1 + $0x16a8] sm:$0xff]  ;;  %v779_v11 = vld [vmem:[%s6767_s1 + $0x16b8] sm:$0xff] }
  0xaf   :  { %3061 = vmatprep.subr.bf16.mxu0 %v3060_v22  ;;  %v761_v22 = vld [vmem:[%s6767_s1 + $0x1628] sm:$0xff]  ;;  %v3082_v27 = vpack.c.bf16 %v758_v19, %v756_v17  ;;  %v264_v15 = vld [vmem:[%s6767_s1 + $0x6a0] sm:$0xff]  ;;  %v266_v16 = vld [vmem:[%s6767_s1 + $0x6b0] sm:$0xff] }
  0xb0   :  { %v3084_v32 = vpack.c.bf16 %v763_v23, %v761_v22  ;;  %v776_v17 = vld [vmem:[%s6767_s1 + $0x16a0] sm:$0xff]  ;;  %v778_v19 = vld [vmem:[%s6767_s1 + $0x16b0] sm:$0xff]  ;;  %v781_v22 = vld [vmem:[%s6767_s1 + $0x16c8] sm:$0xff] }
  0xb1   :  { %2551 = vmatpush1.bf16.msra.mxu1 %v2550_v28  ;;  %v2572_v28 = vpack.c.bf16 %v251_v21, %v249_v20  ;;  %v269_v20 = vld [vmem:[%s6767_s1 + $0x6c8] sm:$0xff]  ;;  %v271_v21 = vld [vmem:[%s6767_s1 + $0x6d8] sm:$0xff] }
  0xb2   :  { %3063 = vmatpush1.bf16.msra.mxu0 %v3062_v29  ;;  %2553 = vmatprep.subr.bf16.mxu1 %v2552_v30  ;;  %v248_v29 = vld [vmem:[%s6767_s1 + $0x620] sm:$0xff]  ;;  %v250_v30 = vld [vmem:[%s6767_s1 + $0x630] sm:$0xff]  ;;  %v783_v23 = vld [vmem:[%s6767_s1 + $0x16d8] sm:$0xff] }
  0xb3   :  { %3065 = vmatprep.subr.bf16.mxu0 %v3064_v34  ;;  %v253_v34 = vld [vmem:[%s6767_s1 + $0x648] sm:$0xff]  ;;  %v2574_v39 = vpack.c.bf16 %v250_v30, %v248_v29  ;;  %v780_v29 = vld [vmem:[%s6767_s1 + $0x16c0] sm:$0xff]  ;;  %v3104_v30 = vpack.c.bf16 %v783_v23, %v781_v22 }
  0xb4   :  { %v288_v23 = vld [vmem:[%s6767_s1 + $0x760] sm:$0xff] }
  0xb5   :  { %2555 = vmatpush1.bf16.msra.mxu1 %v2554_v40  ;;  %v43_v40 = vld [vmem:[%s6768_s0 + $0xb8] sm:$0xff] }
  0xb6   :  { %3067 = vmatpush1.bf16.msra.mxu0 %v3066_v41  ;;  %2557 = vmatprep.subr.bf16.mxu1 %v2556_v42  ;;  %v3086_v41 = vpack.c.bf16 %v762_v33, %v760_v31  ;;  %v2576_v42 = vpack.c.bf16 %v255_v35, %v253_v34  ;;  %v782_v31 = vld [vmem:[%s6767_s1 + $0x16d0] sm:$0xff]  ;;  %v275_v33 = vld [vmem:[%s6767_s1 + $0x6f8] sm:$0xff]  ;;  %v785_v34 = vld [vmem:[%s6767_s1 + $0x16e8] sm:$0xff] }
  0xb7   :  { %3069 = vmatprep.subr.bf16.mxu0 %v3068_v46  ;;  %v3088_v46 = vpack.c.bf16 %v767_v37, %v765_v36  ;;  %v787_v35 = vld [vmem:[%s6767_s1 + $0x16f8] sm:$0xff]  ;;  %v3106_v37 = vpack.c.bf16 %v782_v31, %v780_v29 }
  0xb8   :  { %v295_v29 = vld [vmem:[%s6767_s1 + $0x798] sm:$0xff] }
  0xb9   :  { %2559 = vmatpush1.bf16.msra.mxu1 %v2558_v52  ;;  %v2578_v52 = vpack.c.bf16 %v254_v44, %v252_v43  ;;  %v786_v43 = vld [vmem:[%s6767_s1 + $0x16f0] sm:$0xff]  ;;  %v277_v44 = vld [vmem:[%s6767_s1 + $0x708] sm:$0xff]  ;;  %v807_v31 = vld [vmem:[%s6767_s1 + $0x1798] sm:$0xff] }
  0xba   :  { %3071 = vmatpush1.bf16.msra.mxu0 %v3070_v53  ;;  %2561 = vmatprep.subr.bf16.mxu1 %v2560_v54  ;;  %v3090_v53 = vpack.c.bf16 %v766_v47, %v764_v45  ;;  %v2580_v54 = vpack.c.bf16 %v259_v49, %v257_v48  ;;  %v279_v45 = vld [vmem:[%s6767_s1 + $0x718] sm:$0xff] }
  0xbb   :  { %3073 = vmatprep.subr.bf16.mxu0 %v3072_v58  ;;  %v3092_v58 = vpack.c.bf16 %v771_v51, %v769_v50  ;;  %v791_v47 = vld [vmem:[%s6767_s1 + $0x1718] sm:$0xff]  ;;  %v2600_v50 = vpack.c.bf16 %v279_v45, %v277_v44  ;;  %v276_v51 = vld [vmem:[%s6767_s1 + $0x700] sm:$0xff] }
  0xbd   :  { %2563 = vmatpush1.bf16.msra.mxu1 %v2562_v0  ;;  %v2582_v0 = vpack.c.bf16 %v258_v56, %v256_v55  ;;  %v790_v55 = vld [vmem:[%s6767_s1 + $0x1710] sm:$0xff]  ;;  %v281_v56 = vld [vmem:[%s6767_s1 + $0x728] sm:$0xff] }
  0xbe   :  { %3075 = vmatpush1.bf16.msra.mxu0 %v3074_v1  ;;  %2565 = vmatprep.subr.bf16.mxu1 %v2564_v2  ;;  %v3094_v1 = vpack.c.bf16 %v770_v59, %v768_v57  ;;  %v2584_v2 = vpack.c.bf16 %v263_v61, %v261_v60  ;;  %v283_v57 = vld [vmem:[%s6767_s1 + $0x738] sm:$0xff] }
  0xbf   :  { %3077 = vmatprep.subr.bf16.mxu0 %v3076_v6  ;;  %v3096_v6 = vpack.c.bf16 %v775_v63, %v773_v62  ;;  %v795_v59 = vld [vmem:[%s6767_s1 + $0x1738] sm:$0xff]  ;;  %v2604_v62 = vpack.c.bf16 %v283_v57, %v281_v56  ;;  %v280_v63 = vld [vmem:[%s6767_s1 + $0x720] sm:$0xff] }
  0xc1   :  { %2567 = vmatpush1.bf16.msra.mxu1 %v2566_v12  ;;  %v2586_v12 = vpack.c.bf16 %v262_v4, %v260_v3  ;;  %v794_v3 = vld [vmem:[%s6767_s1 + $0x1730] sm:$0xff]  ;;  %v285_v4 = vld [vmem:[%s6767_s1 + $0x748] sm:$0xff] }
  0xc2   :  { %3079 = vmatpush1.bf16.msra.mxu0 %v3078_v13  ;;  %2569 = vmatprep.subr.bf16.mxu1 %v2568_v14  ;;  %v3098_v13 = vpack.c.bf16 %v774_v7, %v772_v5  ;;  %v2588_v14 = vpack.c.bf16 %v267_v9, %v265_v8  ;;  %v287_v5 = vld [vmem:[%s6767_s1 + $0x758] sm:$0xff] }
  0xc3   :  { %3081 = vmatprep.subr.bf16.mxu0 %v3080_v18  ;;  %v3100_v18 = vpack.c.bf16 %v779_v11, %v777_v10  ;;  %v799_v7 = vld [vmem:[%s6767_s1 + $0x1758] sm:$0xff]  ;;  %v2608_v10 = vpack.c.bf16 %v287_v5, %v285_v4  ;;  %v284_v11 = vld [vmem:[%s6767_s1 + $0x740] sm:$0xff] }
  0xc4   :  { %1295 = vmatmul.mubr.f32.vlgmr.msra.gmra.mrb[0].mxu1 %v24_v24  ;;  %v2590_v24 = vpack.c.bf16 %v266_v16, %v264_v15  ;;  %v798_v15 = vld [vmem:[%s6767_s1 + $0x1750] sm:$0xff]  ;;  %v289_v16 = vld [vmem:[%s6767_s1 + $0x768] sm:$0xff] }
  0xc5   :  { %2571 = vmatpush1.bf16.msra.mxu1 %v2570_v25  ;;  %1863 = vmatmul.mubr.f32.vlgmr.msra.gmra.mrb[0].mxu0 %v40_v26  ;;  %v3102_v25 = vpack.c.bf16 %v778_v19, %v776_v17  ;;  %v2592_v26 = vpack.c.bf16 %v271_v21, %v269_v20  ;;  %v291_v17 = vld [vmem:[%s6767_s1 + $0x778] sm:$0xff] }
  0xc6   :  { %3083 = vmatpush1.bf16.msra.mxu0 %v3082_v27  ;;  %2573 = vmatprep.subr.bf16.mxu1 %v2572_v28  ;;  %v268_v27 = vld [vmem:[%s6767_s1 + $0x6c0] sm:$0xff]  ;;  %v270_v28 = vld [vmem:[%s6767_s1 + $0x6d0] sm:$0xff]  ;;  %v803_v19 = vld [vmem:[%s6767_s1 + $0x1778] sm:$0xff]  ;;  %v2612_v22 = vpack.c.bf16 %v291_v17, %v289_v16 }
  0xc7   :  { %3085 = vmatprep.subr.bf16.mxu0 %v3084_v32  ;;  %1365 = vmatprep.mubr.f32.mxu1 %v27_v38  ;;  %v273_v32 = vld [vmem:[%s6767_s1 + $0x6e8] sm:$0xff]  ;;  %v2594_v36 = vpack.c.bf16 %v270_v28, %v268_v27  ;;  %v802_v27 = vld [vmem:[%s6767_s1 + $0x1770] sm:$0xff] }
  0xc8   :  { %1933 = vmatprep.mubr.f32.mxu0 %v43_v40  ;;  %v2596_v38 = vpack.c.bf16 %v275_v33, %v273_v32  ;;  %v274_v40 = vld [vmem:[%s6767_s1 + $0x6f0] sm:$0xff]  ;;  %v293_v28 = vld [vmem:[%s6767_s1 + $0x788] sm:$0xff] }
  0xc9   :  { %2575 = vmatpush1.bf16.msra.mxu1 %v2574_v39  ;;  %v272_v39 = vld [vmem:[%s6767_s1 + $0x6e0] sm:$0xff] }
  0xca   :  { %3087 = vmatpush1.bf16.msra.mxu0 %v3086_v41  ;;  %2577 = vmatprep.subr.bf16.mxu1 %v2576_v42  ;;  %v784_v41 = vld [vmem:[%s6767_s1 + $0x16e0] sm:$0xff]  ;;  %v3108_v42 = vpack.c.bf16 %v787_v35, %v785_v34  ;;  %v2598_v48 = vpack.c.bf16 %v274_v40, %v272_v39  ;;  %v2616_v34 = vpack.c.bf16 %v295_v29, %v293_v28  ;;  %v806_v39 = vld [vmem:[%s6767_s1 + $0x1790] sm:$0xff]  ;;  %v297_v40 = vld [vmem:[%s6767_s1 + $0x7a8] sm:$0xff] }
  0xcb   :  { %3089 = vmatprep.subr.bf16.mxu0 %v3088_v46  ;;  %v789_v46 = vld [vmem:[%s6767_s1 + $0x1708] sm:$0xff]  ;;  %v3110_v49 = vpack.c.bf16 %v786_v43, %v784_v41  ;;  %v292_v35 = vld [vmem:[%s6767_s1 + $0x780] sm:$0xff]  ;;  %v299_v41 = vld [vmem:[%s6767_s1 + $0x7b8] sm:$0xff] }
  0xcc   :  { %v811_v43 = vld [vmem:[%s6767_s1 + $0x17b8] sm:$0xff]  ;;  %v26_v28 = vld [vmem:[%s6768_s0 + $0x30] sm:$0xff] }
  0xcd   :  { %2579 = vmatpush1.bf16.msra.mxu1 %v2578_v52  ;;  %v278_v52 = vld [vmem:[%s6767_s1 + $0x710] sm:$0xff] }
  0xce   :  { %3091 = vmatpush1.bf16.msra.mxu0 %v3090_v53  ;;  %2581 = vmatprep.subr.bf16.mxu1 %v2580_v54  ;;  %v788_v53 = vld [vmem:[%s6767_s1 + $0x1700] sm:$0xff]  ;;  %v3112_v54 = vpack.c.bf16 %v791_v47, %v789_v46  ;;  %v2602_v60 = vpack.c.bf16 %v278_v52, %v276_v51  ;;  %v2620_v46 = vpack.c.bf16 %v299_v41, %v297_v40  ;;  %v810_v51 = vld [vmem:[%s6767_s1 + $0x17b0] sm:$0xff]  ;;  %v301_v52 = vld [vmem:[%s6767_s1 + $0x7c8] sm:$0xff] }
  0xcf   :  { %3093 = vmatprep.subr.bf16.mxu0 %v3092_v58  ;;  %v793_v58 = vld [vmem:[%s6767_s1 + $0x1728] sm:$0xff]  ;;  %v3114_v61 = vpack.c.bf16 %v790_v55, %v788_v53  ;;  %v296_v47 = vld [vmem:[%s6767_s1 + $0x7a0] sm:$0xff]  ;;  %v303_v53 = vld [vmem:[%s6767_s1 + $0x7d8] sm:$0xff] }
  0xd0   :  { %v815_v55 = vld [vmem:[%s6767_s1 + $0x17d8] sm:$0xff]  ;;  %v829_v40 = vld [vmem:[%s6767_s1 + $0x1848] sm:$0xff] }
  0xd1   :  { %2583 = vmatpush1.bf16.msra.mxu1 %v2582_v0  ;;  %v282_v0 = vld [vmem:[%s6767_s1 + $0x730] sm:$0xff]  ;;  %v831_v41 = vld [vmem:[%s6767_s1 + $0x1858] sm:$0xff] }
  0xd2   :  { %3095 = vmatpush1.bf16.msra.mxu0 %v3094_v1  ;;  %2585 = vmatprep.subr.bf16.mxu1 %v2584_v2  ;;  %v792_v1 = vld [vmem:[%s6767_s1 + $0x1720] sm:$0xff]  ;;  %v3116_v2 = vpack.c.bf16 %v795_v59, %v793_v58  ;;  %v2606_v8 = vpack.c.bf16 %v282_v0, %v280_v63  ;;  %v2624_v58 = vpack.c.bf16 %v303_v53, %v301_v52  ;;  %v814_v63 = vld [vmem:[%s6767_s1 + $0x17d0] sm:$0xff]  ;;  %v305_v0 = vld [vmem:[%s6767_s1 + $0x7e8] sm:$0xff] }
  0xd3   :  { %3097 = vmatprep.subr.bf16.mxu0 %v3096_v6  ;;  %v797_v6 = vld [vmem:[%s6767_s1 + $0x1748] sm:$0xff]  ;;  %v3118_v9 = vpack.c.bf16 %v794_v3, %v792_v1  ;;  %v300_v59 = vld [vmem:[%s6767_s1 + $0x7c0] sm:$0xff]  ;;  %v307_v1 = vld [vmem:[%s6767_s1 + $0x7f8] sm:$0xff] }
  0xd4   :  { %v819_v3 = vld [vmem:[%s6767_s1 + $0x17f8] sm:$0xff]  ;;  %v321_v52 = vld [vmem:[%s6767_s1 + $0x868] sm:$0xff] }
  0xd5   :  { %2587 = vmatpush1.bf16.msra.mxu1 %v2586_v12  ;;  %v286_v12 = vld [vmem:[%s6767_s1 + $0x750] sm:$0xff]  ;;  %v323_v53 = vld [vmem:[%s6767_s1 + $0x878] sm:$0xff] }
  0xd6   :  { %3099 = vmatpush1.bf16.msra.mxu0 %v3098_v13  ;;  %2589 = vmatprep.subr.bf16.mxu1 %v2588_v14  ;;  %v796_v13 = vld [vmem:[%s6767_s1 + $0x1740] sm:$0xff]  ;;  %v3120_v14 = vpack.c.bf16 %v799_v7, %v797_v6  ;;  %v2610_v20 = vpack.c.bf16 %v286_v12, %v284_v11  ;;  %v2628_v6 = vpack.c.bf16 %v307_v1, %v305_v0  ;;  %v818_v11 = vld [vmem:[%s6767_s1 + $0x17f0] sm:$0xff]  ;;  %v309_v12 = vld [vmem:[%s6767_s1 + $0x808] sm:$0xff] }
  0xd7   :  { %3101 = vmatprep.subr.bf16.mxu0 %v3100_v18  ;;  %v801_v18 = vld [vmem:[%s6767_s1 + $0x1768] sm:$0xff]  ;;  %v3122_v21 = vpack.c.bf16 %v798_v15, %v796_v13  ;;  %v304_v7 = vld [vmem:[%s6767_s1 + $0x7e0] sm:$0xff]  ;;  %v311_v13 = vld [vmem:[%s6767_s1 + $0x818] sm:$0xff] }
  0xd8   :  { %v823_v15 = vld [vmem:[%s6767_s1 + $0x1818] sm:$0xff]  ;;  %v325_v0 = vld [vmem:[%s6767_s1 + $0x888] sm:$0xff] }
  0xd9   :  { %2591 = vmatpush1.bf16.msra.mxu1 %v2590_v24  ;;  %v290_v24 = vld [vmem:[%s6767_s1 + $0x770] sm:$0xff]  ;;  %v327_v1 = vld [vmem:[%s6767_s1 + $0x898] sm:$0xff] }
  0xda   :  { %3103 = vmatpush1.bf16.msra.mxu0 %v3102_v25  ;;  %2593 = vmatprep.subr.bf16.mxu1 %v2592_v26  ;;  %v800_v25 = vld [vmem:[%s6767_s1 + $0x1760] sm:$0xff]  ;;  %v3124_v26 = vpack.c.bf16 %v803_v19, %v801_v18  ;;  %v2614_v32 = vpack.c.bf16 %v290_v24, %v288_v23  ;;  %v2632_v18 = vpack.c.bf16 %v311_v13, %v309_v12  ;;  %v822_v23 = vld [vmem:[%s6767_s1 + $0x1810] sm:$0xff]  ;;  %v313_v24 = vld [vmem:[%s6767_s1 + $0x828] sm:$0xff] }
  0xdb   :  { %3105 = vmatprep.subr.bf16.mxu0 %v3104_v30  ;;  %v805_v30 = vld [vmem:[%s6767_s1 + $0x1788] sm:$0xff]  ;;  %v3126_v33 = vpack.c.bf16 %v802_v27, %v800_v25  ;;  %v308_v19 = vld [vmem:[%s6767_s1 + $0x800] sm:$0xff]  ;;  %v315_v25 = vld [vmem:[%s6767_s1 + $0x838] sm:$0xff] }
  0xdc   :  { %v827_v27 = vld [vmem:[%s6767_s1 + $0x1838] sm:$0xff]  ;;  %v329_v12 = vld [vmem:[%s6767_s1 + $0x8a8] sm:$0xff] }
  0xdd   :  { %2595 = vmatpush1.bf16.msra.mxu1 %v2594_v36  ;;  %v294_v36 = vld [vmem:[%s6767_s1 + $0x790] sm:$0xff]  ;;  %v331_v13 = vld [vmem:[%s6767_s1 + $0x8b8] sm:$0xff] }
  0xde   :  { %3107 = vmatpush1.bf16.msra.mxu0 %v3106_v37  ;;  %2597 = vmatprep.subr.bf16.mxu1 %v2596_v38  ;;  %v804_v37 = vld [vmem:[%s6767_s1 + $0x1780] sm:$0xff]  ;;  %v3128_v38 = vpack.c.bf16 %v807_v31, %v805_v30  ;;  %v2618_v44 = vpack.c.bf16 %v294_v36, %v292_v35  ;;  %v42_v30 = vld [vmem:[%s6768_s0 + $0xb0] sm:$0xff] }
  0xdf   :  { %3109 = vmatprep.subr.bf16.mxu0 %v3108_v42  ;;  %v809_v42 = vld [vmem:[%s6767_s1 + $0x17a8] sm:$0xff]  ;;  %v3130_v45 = vpack.c.bf16 %v806_v39, %v804_v37  ;;  %v824_v35 = vld [vmem:[%s6767_s1 + $0x1820] sm:$0xff]  ;;  %v826_v37 = vld [vmem:[%s6767_s1 + $0x1830] sm:$0xff] }
  0xe0   :  { %v319_v39 = vld [vmem:[%s6767_s1 + $0x858] sm:$0xff] }
  0xe1   :  { %2599 = vmatpush1.bf16.msra.mxu1 %v2598_v48  ;;  %v298_v48 = vld [vmem:[%s6767_s1 + $0x7b0] sm:$0xff] }
  0xe2   :  { %3111 = vmatpush1.bf16.msra.mxu0 %v3110_v49  ;;  %2601 = vmatprep.subr.bf16.mxu1 %v2600_v50  ;;  %v808_v49 = vld [vmem:[%s6767_s1 + $0x17a0] sm:$0xff]  ;;  %v3132_v50 = vpack.c.bf16 %v811_v43, %v809_v42  ;;  %v2622_v56 = vpack.c.bf16 %v298_v48, %v296_v47  ;;  %v29_v42 = vld [vmem:[%s6768_s0 + $0x48] sm:$0xff]  ;;  %v318_v48 = vld [vmem:[%s6767_s1 + $0x850] sm:$0xff] }
  0xe3   :  { %3113 = vmatprep.subr.bf16.mxu0 %v3112_v54  ;;  %v813_v54 = vld [vmem:[%s6767_s1 + $0x17c8] sm:$0xff]  ;;  %v3134_v57 = vpack.c.bf16 %v810_v51, %v808_v49  ;;  %v316_v47 = vld [vmem:[%s6767_s1 + $0x840] sm:$0xff]  ;;  %v830_v51 = vld [vmem:[%s6767_s1 + $0x1850] sm:$0xff] }
  0xe4   :  { %v828_v49 = vld [vmem:[%s6767_s1 + $0x1840] sm:$0xff] }
  0xe5   :  { %2603 = vmatpush1.bf16.msra.mxu1 %v2602_v60  ;;  %v302_v60 = vld [vmem:[%s6767_s1 + $0x7d0] sm:$0xff] }
  0xe6   :  { %3115 = vmatpush1.bf16.msra.mxu0 %v3114_v61  ;;  %2605 = vmatprep.subr.bf16.mxu1 %v2604_v62  ;;  %v812_v61 = vld [vmem:[%s6767_s1 + $0x17c0] sm:$0xff]  ;;  %v3136_v62 = vpack.c.bf16 %v815_v55, %v813_v54  ;;  %v2626_v4 = vpack.c.bf16 %v302_v60, %v300_v59  ;;  %v833_v54 = vld [vmem:[%s6767_s1 + $0x1868] sm:$0xff]  ;;  %v835_v55 = vld [vmem:[%s6767_s1 + $0x1878] sm:$0xff] }
  0xe7   :  { %3117 = vmatprep.subr.bf16.mxu0 %v3116_v2  ;;  %v817_v2 = vld [vmem:[%s6767_s1 + $0x17e8] sm:$0xff]  ;;  %v3138_v5 = vpack.c.bf16 %v814_v63, %v812_v61  ;;  %v320_v59 = vld [vmem:[%s6767_s1 + $0x860] sm:$0xff]  ;;  %v322_v60 = vld [vmem:[%s6767_s1 + $0x870] sm:$0xff] }
  0xe8   :  { %v832_v61 = vld [vmem:[%s6767_s1 + $0x1860] sm:$0xff]  ;;  %v834_v63 = vld [vmem:[%s6767_s1 + $0x1870] sm:$0xff] }
  0xe9   :  { %2607 = vmatpush1.bf16.msra.mxu1 %v2606_v8  ;;  %v306_v8 = vld [vmem:[%s6767_s1 + $0x7f0] sm:$0xff] }
  0xea   :  { %3119 = vmatpush1.bf16.msra.mxu0 %v3118_v9  ;;  %2609 = vmatprep.subr.bf16.mxu1 %v2608_v10  ;;  %v816_v9 = vld [vmem:[%s6767_s1 + $0x17e0] sm:$0xff]  ;;  %v3140_v10 = vpack.c.bf16 %v819_v3, %v817_v2  ;;  %v2630_v16 = vpack.c.bf16 %v306_v8, %v304_v7  ;;  %v837_v2 = vld [vmem:[%s6767_s1 + $0x1888] sm:$0xff]  ;;  %v839_v3 = vld [vmem:[%s6767_s1 + $0x1898] sm:$0xff] }
  0xeb   :  { %3121 = vmatprep.subr.bf16.mxu0 %v3120_v14  ;;  %v821_v14 = vld [vmem:[%s6767_s1 + $0x1808] sm:$0xff]  ;;  %v3142_v17 = vpack.c.bf16 %v818_v11, %v816_v9  ;;  %v324_v7 = vld [vmem:[%s6767_s1 + $0x880] sm:$0xff]  ;;  %v326_v8 = vld [vmem:[%s6767_s1 + $0x890] sm:$0xff] }
  0xec   :  { %v836_v9 = vld [vmem:[%s6767_s1 + $0x1880] sm:$0xff]  ;;  %v838_v11 = vld [vmem:[%s6767_s1 + $0x1890] sm:$0xff] }
  0xed   :  { %2611 = vmatpush1.bf16.msra.mxu1 %v2610_v20  ;;  %v310_v20 = vld [vmem:[%s6767_s1 + $0x810] sm:$0xff] }
  0xee   :  { %3123 = vmatpush1.bf16.msra.mxu0 %v3122_v21  ;;  %2613 = vmatprep.subr.bf16.mxu1 %v2612_v22  ;;  %v820_v21 = vld [vmem:[%s6767_s1 + $0x1800] sm:$0xff]  ;;  %v3144_v22 = vpack.c.bf16 %v823_v15, %v821_v14  ;;  %v2634_v29 = vpack.c.bf16 %v310_v20, %v308_v19  ;;  %v841_v14 = vld [vmem:[%s6767_s1 + $0x18a8] sm:$0xff]  ;;  %v843_v15 = vld [vmem:[%s6767_s1 + $0x18b8] sm:$0xff] }
  0xef   :  { %3125 = vmatprep.subr.bf16.mxu0 %v3124_v26  ;;  %v825_v26 = vld [vmem:[%s6767_s1 + $0x1828] sm:$0xff]  ;;  %v3146_v31 = vpack.c.bf16 %v822_v23, %v820_v21  ;;  %v328_v19 = vld [vmem:[%s6767_s1 + $0x8a0] sm:$0xff]  ;;  %v330_v20 = vld [vmem:[%s6767_s1 + $0x8b0] sm:$0xff] }
  0xf0   :  { %v3148_v36 = vpack.c.bf16 %v827_v27, %v825_v26  ;;  %v840_v21 = vld [vmem:[%s6767_s1 + $0x18a0] sm:$0xff]  ;;  %v842_v23 = vld [vmem:[%s6767_s1 + $0x18b0] sm:$0xff]  ;;  %v845_v26 = vld [vmem:[%s6767_s1 + $0x18c8] sm:$0xff] }
  0xf1   :  { %2615 = vmatpush1.bf16.msra.mxu1 %v2614_v32  ;;  %v2636_v32 = vpack.c.bf16 %v315_v25, %v313_v24  ;;  %v333_v24 = vld [vmem:[%s6767_s1 + $0x8c8] sm:$0xff]  ;;  %v335_v25 = vld [vmem:[%s6767_s1 + $0x8d8] sm:$0xff] }
  0xf2   :  { %3127 = vmatpush1.bf16.msra.mxu0 %v3126_v33  ;;  %2617 = vmatprep.subr.bf16.mxu1 %v2616_v34  ;;  %v312_v33 = vld [vmem:[%s6767_s1 + $0x820] sm:$0xff]  ;;  %v314_v34 = vld [vmem:[%s6767_s1 + $0x830] sm:$0xff]  ;;  %v847_v27 = vld [vmem:[%s6767_s1 + $0x18d8] sm:$0xff] }
  0xf3   :  { %3129 = vmatprep.subr.bf16.mxu0 %v3128_v38  ;;  %v317_v38 = vld [vmem:[%s6767_s1 + $0x848] sm:$0xff]  ;;  %v2638_v43 = vpack.c.bf16 %v314_v34, %v312_v33  ;;  %v844_v33 = vld [vmem:[%s6767_s1 + $0x18c0] sm:$0xff]  ;;  %v3168_v34 = vpack.c.bf16 %v847_v27, %v845_v26 }
  0xf4   :  { %v352_v27 = vld [vmem:[%s6767_s1 + $0x960] sm:$0xff] }
  0xf5   :  { %2619 = vmatpush1.bf16.msra.mxu1 %v2618_v44  ;;  %v45_v44 = vld [vmem:[%s6768_s0 + $0xc8] sm:$0xff] }
  0xf6   :  { %3131 = vmatpush1.bf16.msra.mxu0 %v3130_v45  ;;  %2621 = vmatprep.subr.bf16.mxu1 %v2620_v46  ;;  %v3150_v45 = vpack.c.bf16 %v826_v37, %v824_v35  ;;  %v2640_v46 = vpack.c.bf16 %v319_v39, %v317_v38  ;;  %v846_v35 = vld [vmem:[%s6767_s1 + $0x18d0] sm:$0xff]  ;;  %v339_v37 = vld [vmem:[%s6767_s1 + $0x8f8] sm:$0xff]  ;;  %v849_v38 = vld [vmem:[%s6767_s1 + $0x18e8] sm:$0xff] }
  0xf7   :  { %3133 = vmatprep.subr.bf16.mxu0 %v3132_v50  ;;  %v3152_v50 = vpack.c.bf16 %v831_v41, %v829_v40  ;;  %v851_v39 = vld [vmem:[%s6767_s1 + $0x18f8] sm:$0xff]  ;;  %v3170_v41 = vpack.c.bf16 %v846_v35, %v844_v33 }
  0xf8   :  { %v359_v33 = vld [vmem:[%s6767_s1 + $0x998] sm:$0xff] }
  0xf9   :  { %2623 = vmatpush1.bf16.msra.mxu1 %v2622_v56  ;;  %v2642_v56 = vpack.c.bf16 %v318_v48, %v316_v47  ;;  %v850_v47 = vld [vmem:[%s6767_s1 + $0x18f0] sm:$0xff]  ;;  %v341_v48 = vld [vmem:[%s6767_s1 + $0x908] sm:$0xff]  ;;  %v871_v35 = vld [vmem:[%s6767_s1 + $0x1998] sm:$0xff] }
  0xfa   :  { %3135 = vmatpush1.bf16.msra.mxu0 %v3134_v57  ;;  %2625 = vmatprep.subr.bf16.mxu1 %v2624_v58  ;;  %v3154_v57 = vpack.c.bf16 %v830_v51, %v828_v49  ;;  %v2644_v58 = vpack.c.bf16 %v323_v53, %v321_v52  ;;  %v343_v49 = vld [vmem:[%s6767_s1 + $0x918] sm:$0xff] }
  0xfb   :  { %3137 = vmatprep.subr.bf16.mxu0 %v3136_v62  ;;  %v3156_v62 = vpack.c.bf16 %v835_v55, %v833_v54  ;;  %v855_v51 = vld [vmem:[%s6767_s1 + $0x1918] sm:$0xff]  ;;  %v2664_v54 = vpack.c.bf16 %v343_v49, %v341_v48  ;;  %v340_v55 = vld [vmem:[%s6767_s1 + $0x900] sm:$0xff] }
  0xfd   :  { %2627 = vmatpush1.bf16.msra.mxu1 %v2626_v4  ;;  %v2646_v4 = vpack.c.bf16 %v322_v60, %v320_v59  ;;  %v854_v59 = vld [vmem:[%s6767_s1 + $0x1910] sm:$0xff]  ;;  %v345_v60 = vld [vmem:[%s6767_s1 + $0x928] sm:$0xff] }
  0xfe   :  { %3139 = vmatpush1.bf16.msra.mxu0 %v3138_v5  ;;  %2629 = vmatprep.subr.bf16.mxu1 %v2628_v6  ;;  %v3158_v5 = vpack.c.bf16 %v834_v63, %v832_v61  ;;  %v2648_v6 = vpack.c.bf16 %v327_v1, %v325_v0  ;;  %v347_v61 = vld [vmem:[%s6767_s1 + $0x938] sm:$0xff] }
  0xff   :  { %3141 = vmatprep.subr.bf16.mxu0 %v3140_v10  ;;  %v3160_v10 = vpack.c.bf16 %v839_v3, %v837_v2  ;;  %v859_v63 = vld [vmem:[%s6767_s1 + $0x1938] sm:$0xff]  ;;  %v2668_v2 = vpack.c.bf16 %v347_v61, %v345_v60  ;;  %v344_v3 = vld [vmem:[%s6767_s1 + $0x920] sm:$0xff] }
 0x101   :  { %2631 = vmatpush1.bf16.msra.mxu1 %v2630_v16  ;;  %v2650_v16 = vpack.c.bf16 %v326_v8, %v324_v7  ;;  %v858_v7 = vld [vmem:[%s6767_s1 + $0x1930] sm:$0xff]  ;;  %v349_v8 = vld [vmem:[%s6767_s1 + $0x948] sm:$0xff] }
 0x102   :  { %3143 = vmatpush1.bf16.msra.mxu0 %v3142_v17  ;;  %2633 = vmatprep.subr.bf16.mxu1 %v2632_v18  ;;  %v3162_v17 = vpack.c.bf16 %v838_v11, %v836_v9  ;;  %v2652_v18 = vpack.c.bf16 %v331_v13, %v329_v12  ;;  %v351_v9 = vld [vmem:[%s6767_s1 + $0x958] sm:$0xff] }
 0x103   :  { %3145 = vmatprep.subr.bf16.mxu0 %v3144_v22  ;;  %v3164_v22 = vpack.c.bf16 %v843_v15, %v841_v14  ;;  %v863_v11 = vld [vmem:[%s6767_s1 + $0x1958] sm:$0xff]  ;;  %v2672_v14 = vpack.c.bf16 %v351_v9, %v349_v8  ;;  %v348_v15 = vld [vmem:[%s6767_s1 + $0x940] sm:$0xff] }
 0x104   :  { %1366 = vmatmul.mubr.f32.vlgmr.msra.gmra.mrb[0].mxu1 %v26_v28  ;;  %v2654_v28 = vpack.c.bf16 %v330_v20, %v328_v19  ;;  %v862_v19 = vld [vmem:[%s6767_s1 + $0x1950] sm:$0xff]  ;;  %v353_v20 = vld [vmem:[%s6767_s1 + $0x968] sm:$0xff] }
 0x105   :  { %2635 = vmatpush1.bf16.msra.mxu1 %v2634_v29  ;;  %1934 = vmatmul.mubr.f32.vlgmr.msra.gmra.mrb[0].mxu0 %v42_v30  ;;  %v3166_v29 = vpack.c.bf16 %v842_v23, %v840_v21  ;;  %v2656_v30 = vpack.c.bf16 %v335_v25, %v333_v24  ;;  %v355_v21 = vld [vmem:[%s6767_s1 + $0x978] sm:$0xff] }
 0x106   :  { %3147 = vmatpush1.bf16.msra.mxu0 %v3146_v31  ;;  %2637 = vmatprep.subr.bf16.mxu1 %v2636_v32  ;;  %v332_v31 = vld [vmem:[%s6767_s1 + $0x8c0] sm:$0xff]  ;;  %v334_v32 = vld [vmem:[%s6767_s1 + $0x8d0] sm:$0xff]  ;;  %v867_v23 = vld [vmem:[%s6767_s1 + $0x1978] sm:$0xff]  ;;  %v2676_v26 = vpack.c.bf16 %v355_v21, %v353_v20 }
 0x107   :  { %3149 = vmatprep.subr.bf16.mxu0 %v3148_v36  ;;  %1436 = vmatprep.mubr.f32.mxu1 %v29_v42  ;;  %v337_v36 = vld [vmem:[%s6767_s1 + $0x8e8] sm:$0xff]  ;;  %v2658_v40 = vpack.c.bf16 %v334_v32, %v332_v31  ;;  %v866_v31 = vld [vmem:[%s6767_s1 + $0x1970] sm:$0xff] }
 0x108   :  { %2004 = vmatprep.mubr.f32.mxu0 %v45_v44  ;;  %v2660_v42 = vpack.c.bf16 %v339_v37, %v337_v36  ;;  %v338_v44 = vld [vmem:[%s6767_s1 + $0x8f0] sm:$0xff]  ;;  %v357_v32 = vld [vmem:[%s6767_s1 + $0x988] sm:$0xff] }
 0x109   :  { %2639 = vmatpush1.bf16.msra.mxu1 %v2638_v43  ;;  %v336_v43 = vld [vmem:[%s6767_s1 + $0x8e0] sm:$0xff] }
 0x10a   :  { %3151 = vmatpush1.bf16.msra.mxu0 %v3150_v45  ;;  %2641 = vmatprep.subr.bf16.mxu1 %v2640_v46  ;;  %v848_v45 = vld [vmem:[%s6767_s1 + $0x18e0] sm:$0xff]  ;;  %v3172_v46 = vpack.c.bf16 %v851_v39, %v849_v38  ;;  %v2662_v52 = vpack.c.bf16 %v338_v44, %v336_v43  ;;  %v2680_v38 = vpack.c.bf16 %v359_v33, %v357_v32  ;;  %v870_v43 = vld [vmem:[%s6767_s1 + $0x1990] sm:$0xff]  ;;  %v361_v44 = vld [vmem:[%s6767_s1 + $0x9a8] sm:$0xff] }
 0x10b   :  { %3153 = vmatprep.subr.bf16.mxu0 %v3152_v50  ;;  %v853_v50 = vld [vmem:[%s6767_s1 + $0x1908] sm:$0xff]  ;;  %v3174_v53 = vpack.c.bf16 %v850_v47, %v848_v45  ;;  %v356_v39 = vld [vmem:[%s6767_s1 + $0x980] sm:$0xff]  ;;  %v363_v45 = vld [vmem:[%s6767_s1 + $0x9b8] sm:$0xff] }
 0x10c   :  { %v875_v47 = vld [vmem:[%s6767_s1 + $0x19b8] sm:$0xff]  ;;  %v28_v32 = vld [vmem:[%s6768_s0 + $0x40] sm:$0xff] }
 0x10d   :  { %2643 = vmatpush1.bf16.msra.mxu1 %v2642_v56  ;;  %v342_v56 = vld [vmem:[%s6767_s1 + $0x910] sm:$0xff] }
 0x10e   :  { %3155 = vmatpush1.bf16.msra.mxu0 %v3154_v57  ;;  %2645 = vmatprep.subr.bf16.mxu1 %v2644_v58  ;;  %v852_v57 = vld [vmem:[%s6767_s1 + $0x1900] sm:$0xff]  ;;  %v3176_v58 = vpack.c.bf16 %v855_v51, %v853_v50  ;;  %v2666_v0 = vpack.c.bf16 %v342_v56, %v340_v55  ;;  %v2684_v50 = vpack.c.bf16 %v363_v45, %v361_v44  ;;  %v874_v55 = vld [vmem:[%s6767_s1 + $0x19b0] sm:$0xff]  ;;  %v365_v56 = vld [vmem:[%s6767_s1 + $0x9c8] sm:$0xff] }
 0x10f   :  { %3157 = vmatprep.subr.bf16.mxu0 %v3156_v62  ;;  %v857_v62 = vld [vmem:[%s6767_s1 + $0x1928] sm:$0xff]  ;;  %v3178_v1 = vpack.c.bf16 %v854_v59, %v852_v57  ;;  %v360_v51 = vld [vmem:[%s6767_s1 + $0x9a0] sm:$0xff]  ;;  %v367_v57 = vld [vmem:[%s6767_s1 + $0x9d8] sm:$0xff] }
 0x110   :  { %v879_v59 = vld [vmem:[%s6767_s1 + $0x19d8] sm:$0xff]  ;;  %v893_v44 = vld [vmem:[%s6767_s1 + $0x1a48] sm:$0xff] }
 0x111   :  { %2647 = vmatpush1.bf16.msra.mxu1 %v2646_v4  ;;  %v346_v4 = vld [vmem:[%s6767_s1 + $0x930] sm:$0xff]  ;;  %v895_v45 = vld [vmem:[%s6767_s1 + $0x1a58] sm:$0xff] }
 0x112   :  { %3159 = vmatpush1.bf16.msra.mxu0 %v3158_v5  ;;  %2649 = vmatprep.subr.bf16.mxu1 %v2648_v6  ;;  %v856_v5 = vld [vmem:[%s6767_s1 + $0x1920] sm:$0xff]  ;;  %v3180_v6 = vpack.c.bf16 %v859_v63, %v857_v62  ;;  %v2670_v12 = vpack.c.bf16 %v346_v4, %v344_v3  ;;  %v2688_v62 = vpack.c.bf16 %v367_v57, %v365_v56  ;;  %v878_v3 = vld [vmem:[%s6767_s1 + $0x19d0] sm:$0xff]  ;;  %v369_v4 = vld [vmem:[%s6767_s1 + $0x9e8] sm:$0xff] }
 0x113   :  { %3161 = vmatprep.subr.bf16.mxu0 %v3160_v10  ;;  %v861_v10 = vld [vmem:[%s6767_s1 + $0x1948] sm:$0xff]  ;;  %v3182_v13 = vpack.c.bf16 %v858_v7, %v856_v5  ;;  %v364_v63 = vld [vmem:[%s6767_s1 + $0x9c0] sm:$0xff]  ;;  %v371_v5 = vld [vmem:[%s6767_s1 + $0x9f8] sm:$0xff] }
 0x114   :  { %v883_v7 = vld [vmem:[%s6767_s1 + $0x19f8] sm:$0xff]  ;;  %v385_v56 = vld [vmem:[%s6767_s1 + $0xa68] sm:$0xff] }
 0x115   :  { %2651 = vmatpush1.bf16.msra.mxu1 %v2650_v16  ;;  %v350_v16 = vld [vmem:[%s6767_s1 + $0x950] sm:$0xff]  ;;  %v387_v57 = vld [vmem:[%s6767_s1 + $0xa78] sm:$0xff] }
 0x116   :  { %3163 = vmatpush1.bf16.msra.mxu0 %v3162_v17  ;;  %2653 = vmatprep.subr.bf16.mxu1 %v2652_v18  ;;  %v860_v17 = vld [vmem:[%s6767_s1 + $0x1940] sm:$0xff]  ;;  %v3184_v18 = vpack.c.bf16 %v863_v11, %v861_v10  ;;  %v2674_v24 = vpack.c.bf16 %v350_v16, %v348_v15  ;;  %v2692_v10 = vpack.c.bf16 %v371_v5, %v369_v4  ;;  %v882_v15 = vld [vmem:[%s6767_s1 + $0x19f0] sm:$0xff]  ;;  %v373_v16 = vld [vmem:[%s6767_s1 + $0xa08] sm:$0xff] }
 0x117   :  { %3165 = vmatprep.subr.bf16.mxu0 %v3164_v22  ;;  %v865_v22 = vld [vmem:[%s6767_s1 + $0x1968] sm:$0xff]  ;;  %v3186_v25 = vpack.c.bf16 %v862_v19, %v860_v17  ;;  %v368_v11 = vld [vmem:[%s6767_s1 + $0x9e0] sm:$0xff]  ;;  %v375_v17 = vld [vmem:[%s6767_s1 + $0xa18] sm:$0xff] }
 0x118   :  { %v887_v19 = vld [vmem:[%s6767_s1 + $0x1a18] sm:$0xff]  ;;  %v389_v4 = vld [vmem:[%s6767_s1 + $0xa88] sm:$0xff] }
 0x119   :  { %2655 = vmatpush1.bf16.msra.mxu1 %v2654_v28  ;;  %v354_v28 = vld [vmem:[%s6767_s1 + $0x970] sm:$0xff]  ;;  %v391_v5 = vld [vmem:[%s6767_s1 + $0xa98] sm:$0xff] }
 0x11a   :  { %3167 = vmatpush1.bf16.msra.mxu0 %v3166_v29  ;;  %2657 = vmatprep.subr.bf16.mxu1 %v2656_v30  ;;  %v864_v29 = vld [vmem:[%s6767_s1 + $0x1960] sm:$0xff]  ;;  %v3188_v30 = vpack.c.bf16 %v867_v23, %v865_v22  ;;  %v2678_v36 = vpack.c.bf16 %v354_v28, %v352_v27  ;;  %v2696_v22 = vpack.c.bf16 %v375_v17, %v373_v16  ;;  %v886_v27 = vld [vmem:[%s6767_s1 + $0x1a10] sm:$0xff]  ;;  %v377_v28 = vld [vmem:[%s6767_s1 + $0xa28] sm:$0xff] }
 0x11b   :  { %3169 = vmatprep.subr.bf16.mxu0 %v3168_v34  ;;  %v869_v34 = vld [vmem:[%s6767_s1 + $0x1988] sm:$0xff]  ;;  %v3190_v37 = vpack.c.bf16 %v866_v31, %v864_v29  ;;  %v372_v23 = vld [vmem:[%s6767_s1 + $0xa00] sm:$0xff]  ;;  %v379_v29 = vld [vmem:[%s6767_s1 + $0xa38] sm:$0xff] }
 0x11c   :  { %v891_v31 = vld [vmem:[%s6767_s1 + $0x1a38] sm:$0xff]  ;;  %v393_v16 = vld [vmem:[%s6767_s1 + $0xaa8] sm:$0xff] }
 0x11d   :  { %2659 = vmatpush1.bf16.msra.mxu1 %v2658_v40  ;;  %v358_v40 = vld [vmem:[%s6767_s1 + $0x990] sm:$0xff]  ;;  %v395_v17 = vld [vmem:[%s6767_s1 + $0xab8] sm:$0xff] }
 0x11e   :  { %3171 = vmatpush1.bf16.msra.mxu0 %v3170_v41  ;;  %2661 = vmatprep.subr.bf16.mxu1 %v2660_v42  ;;  %v868_v41 = vld [vmem:[%s6767_s1 + $0x1980] sm:$0xff]  ;;  %v3192_v42 = vpack.c.bf16 %v871_v35, %v869_v34  ;;  %v2682_v48 = vpack.c.bf16 %v358_v40, %v356_v39 }
 0x11f   :  { %3173 = vmatprep.subr.bf16.mxu0 %v3172_v46  ;;  %v873_v46 = vld [vmem:[%s6767_s1 + $0x19a8] sm:$0xff]  ;;  %v3194_v49 = vpack.c.bf16 %v870_v43, %v868_v41  ;;  %v44_v34 = vld [vmem:[%s6768_s0 + $0xc0] sm:$0xff]  ;;  %v890_v41 = vld [vmem:[%s6767_s1 + $0x1a30] sm:$0xff] }
 0x120   :  { %v888_v39 = vld [vmem:[%s6767_s1 + $0x1a20] sm:$0xff]  ;;  %v383_v43 = vld [vmem:[%s6767_s1 + $0xa58] sm:$0xff] }
 0x121   :  { %2663 = vmatpush1.bf16.msra.mxu1 %v2662_v52  ;;  %v362_v52 = vld [vmem:[%s6767_s1 + $0x9b0] sm:$0xff] }
 0x122   :  { %3175 = vmatpush1.bf16.msra.mxu0 %v3174_v53  ;;  %2665 = vmatprep.subr.bf16.mxu1 %v2664_v54  ;;  %v872_v53 = vld [vmem:[%s6767_s1 + $0x19a0] sm:$0xff]  ;;  %v3196_v54 = vpack.c.bf16 %v875_v47, %v873_v46  ;;  %v2686_v60 = vpack.c.bf16 %v362_v52, %v360_v51  ;;  %v31_v46 = vld [vmem:[%s6768_s0 + $0x58] sm:$0xff]  ;;  %v382_v52 = vld [vmem:[%s6767_s1 + $0xa50] sm:$0xff] }
 0x123   :  { %3177 = vmatprep.subr.bf16.mxu0 %v3176_v58  ;;  %v877_v58 = vld [vmem:[%s6767_s1 + $0x19c8] sm:$0xff]  ;;  %v3198_v61 = vpack.c.bf16 %v874_v55, %v872_v53  ;;  %v380_v51 = vld [vmem:[%s6767_s1 + $0xa40] sm:$0xff]  ;;  %v894_v55 = vld [vmem:[%s6767_s1 + $0x1a50] sm:$0xff] }
 0x124   :  { %v892_v53 = vld [vmem:[%s6767_s1 + $0x1a40] sm:$0xff] }
 0x125   :  { %2667 = vmatpush1.bf16.msra.mxu1 %v2666_v0  ;;  %v366_v0 = vld [vmem:[%s6767_s1 + $0x9d0] sm:$0xff] }
 0x126   :  { %3179 = vmatpush1.bf16.msra.mxu0 %v3178_v1  ;;  %2669 = vmatprep.subr.bf16.mxu1 %v2668_v2  ;;  %v876_v1 = vld [vmem:[%s6767_s1 + $0x19c0] sm:$0xff]  ;;  %v3200_v2 = vpack.c.bf16 %v879_v59, %v877_v58  ;;  %v2690_v8 = vpack.c.bf16 %v366_v0, %v364_v63  ;;  %v897_v58 = vld [vmem:[%s6767_s1 + $0x1a68] sm:$0xff]  ;;  %v899_v59 = vld [vmem:[%s6767_s1 + $0x1a78] sm:$0xff] }
 0x127   :  { %3181 = vmatprep.subr.bf16.mxu0 %v3180_v6  ;;  %v881_v6 = vld [vmem:[%s6767_s1 + $0x19e8] sm:$0xff]  ;;  %v3202_v9 = vpack.c.bf16 %v878_v3, %v876_v1  ;;  %v384_v63 = vld [vmem:[%s6767_s1 + $0xa60] sm:$0xff]  ;;  %v386_v0 = vld [vmem:[%s6767_s1 + $0xa70] sm:$0xff] }
 0x128   :  { %v896_v1 = vld [vmem:[%s6767_s1 + $0x1a60] sm:$0xff]  ;;  %v898_v3 = vld [vmem:[%s6767_s1 + $0x1a70] sm:$0xff] }
 0x129   :  { %2671 = vmatpush1.bf16.msra.mxu1 %v2670_v12  ;;  %v370_v12 = vld [vmem:[%s6767_s1 + $0x9f0] sm:$0xff] }
 0x12a   :  { %3183 = vmatpush1.bf16.msra.mxu0 %v3182_v13  ;;  %2673 = vmatprep.subr.bf16.mxu1 %v2672_v14  ;;  %v880_v13 = vld [vmem:[%s6767_s1 + $0x19e0] sm:$0xff]  ;;  %v3204_v14 = vpack.c.bf16 %v883_v7, %v881_v6  ;;  %v2694_v20 = vpack.c.bf16 %v370_v12, %v368_v11  ;;  %v901_v6 = vld [vmem:[%s6767_s1 + $0x1a88] sm:$0xff]  ;;  %v903_v7 = vld [vmem:[%s6767_s1 + $0x1a98] sm:$0xff] }
 0x12b   :  { %3185 = vmatprep.subr.bf16.mxu0 %v3184_v18  ;;  %v885_v18 = vld [vmem:[%s6767_s1 + $0x1a08] sm:$0xff]  ;;  %v3206_v21 = vpack.c.bf16 %v882_v15, %v880_v13  ;;  %v388_v11 = vld [vmem:[%s6767_s1 + $0xa80] sm:$0xff]  ;;  %v390_v12 = vld [vmem:[%s6767_s1 + $0xa90] sm:$0xff] }
 0x12c   :  { %v900_v13 = vld [vmem:[%s6767_s1 + $0x1a80] sm:$0xff]  ;;  %v902_v15 = vld [vmem:[%s6767_s1 + $0x1a90] sm:$0xff] }
 0x12d   :  { %2675 = vmatpush1.bf16.msra.mxu1 %v2674_v24  ;;  %v374_v24 = vld [vmem:[%s6767_s1 + $0xa10] sm:$0xff] }
 0x12e   :  { %3187 = vmatpush1.bf16.msra.mxu0 %v3186_v25  ;;  %2677 = vmatprep.subr.bf16.mxu1 %v2676_v26  ;;  %v884_v25 = vld [vmem:[%s6767_s1 + $0x1a00] sm:$0xff]  ;;  %v3208_v26 = vpack.c.bf16 %v887_v19, %v885_v18  ;;  %v2698_v33 = vpack.c.bf16 %v374_v24, %v372_v23  ;;  %v905_v18 = vld [vmem:[%s6767_s1 + $0x1aa8] sm:$0xff]  ;;  %v907_v19 = vld [vmem:[%s6767_s1 + $0x1ab8] sm:$0xff] }
 0x12f   :  { %3189 = vmatprep.subr.bf16.mxu0 %v3188_v30  ;;  %v889_v30 = vld [vmem:[%s6767_s1 + $0x1a28] sm:$0xff]  ;;  %v3210_v35 = vpack.c.bf16 %v886_v27, %v884_v25  ;;  %v392_v23 = vld [vmem:[%s6767_s1 + $0xaa0] sm:$0xff]  ;;  %v394_v24 = vld [vmem:[%s6767_s1 + $0xab0] sm:$0xff] }
 0x130   :  { %v3212_v40 = vpack.c.bf16 %v891_v31, %v889_v30  ;;  %v904_v25 = vld [vmem:[%s6767_s1 + $0x1aa0] sm:$0xff]  ;;  %v906_v27 = vld [vmem:[%s6767_s1 + $0x1ab0] sm:$0xff]  ;;  %v909_v30 = vld [vmem:[%s6767_s1 + $0x1ac8] sm:$0xff] }
 0x131   :  { %2679 = vmatpush1.bf16.msra.mxu1 %v2678_v36  ;;  %v2700_v36 = vpack.c.bf16 %v379_v29, %v377_v28  ;;  %v397_v28 = vld [vmem:[%s6767_s1 + $0xac8] sm:$0xff]  ;;  %v399_v29 = vld [vmem:[%s6767_s1 + $0xad8] sm:$0xff] }
 0x132   :  { %3191 = vmatpush1.bf16.msra.mxu0 %v3190_v37  ;;  %2681 = vmatprep.subr.bf16.mxu1 %v2680_v38  ;;  %v376_v37 = vld [vmem:[%s6767_s1 + $0xa20] sm:$0xff]  ;;  %v378_v38 = vld [vmem:[%s6767_s1 + $0xa30] sm:$0xff]  ;;  %v911_v31 = vld [vmem:[%s6767_s1 + $0x1ad8] sm:$0xff] }
 0x133   :  { %3193 = vmatprep.subr.bf16.mxu0 %v3192_v42  ;;  %v381_v42 = vld [vmem:[%s6767_s1 + $0xa48] sm:$0xff]  ;;  %v2702_v47 = vpack.c.bf16 %v378_v38, %v376_v37  ;;  %v908_v37 = vld [vmem:[%s6767_s1 + $0x1ac0] sm:$0xff]  ;;  %v3232_v38 = vpack.c.bf16 %v911_v31, %v909_v30 }
 0x134   :  { %v416_v31 = vld [vmem:[%s6767_s1 + $0xb60] sm:$0xff] }
 0x135   :  { %2683 = vmatpush1.bf16.msra.mxu1 %v2682_v48  ;;  %v47_v48 = vld [vmem:[%s6768_s0 + $0xd8] sm:$0xff] }
 0x136   :  { %3195 = vmatpush1.bf16.msra.mxu0 %v3194_v49  ;;  %2685 = vmatprep.subr.bf16.mxu1 %v2684_v50  ;;  %v3214_v49 = vpack.c.bf16 %v890_v41, %v888_v39  ;;  %v2704_v50 = vpack.c.bf16 %v383_v43, %v381_v42  ;;  %v910_v39 = vld [vmem:[%s6767_s1 + $0x1ad0] sm:$0xff]  ;;  %v403_v41 = vld [vmem:[%s6767_s1 + $0xaf8] sm:$0xff]  ;;  %v913_v42 = vld [vmem:[%s6767_s1 + $0x1ae8] sm:$0xff] }
 0x137   :  { %3197 = vmatprep.subr.bf16.mxu0 %v3196_v54  ;;  %v3216_v54 = vpack.c.bf16 %v895_v45, %v893_v44  ;;  %v915_v43 = vld [vmem:[%s6767_s1 + $0x1af8] sm:$0xff]  ;;  %v3234_v45 = vpack.c.bf16 %v910_v39, %v908_v37 }
 0x138   :  { %v423_v37 = vld [vmem:[%s6767_s1 + $0xb98] sm:$0xff] }
 0x139   :  { %2687 = vmatpush1.bf16.msra.mxu1 %v2686_v60  ;;  %v2706_v60 = vpack.c.bf16 %v382_v52, %v380_v51  ;;  %v914_v51 = vld [vmem:[%s6767_s1 + $0x1af0] sm:$0xff]  ;;  %v405_v52 = vld [vmem:[%s6767_s1 + $0xb08] sm:$0xff]  ;;  %v935_v39 = vld [vmem:[%s6767_s1 + $0x1b98] sm:$0xff] }
 0x13a   :  { %3199 = vmatpush1.bf16.msra.mxu0 %v3198_v61  ;;  %2689 = vmatprep.subr.bf16.mxu1 %v2688_v62  ;;  %v3218_v61 = vpack.c.bf16 %v894_v55, %v892_v53  ;;  %v2708_v62 = vpack.c.bf16 %v387_v57, %v385_v56  ;;  %v407_v53 = vld [vmem:[%s6767_s1 + $0xb18] sm:$0xff] }
 0x13b   :  { %3201 = vmatprep.subr.bf16.mxu0 %v3200_v2  ;;  %v3220_v2 = vpack.c.bf16 %v899_v59, %v897_v58  ;;  %v919_v55 = vld [vmem:[%s6767_s1 + $0x1b18] sm:$0xff]  ;;  %v2728_v58 = vpack.c.bf16 %v407_v53, %v405_v52  ;;  %v404_v59 = vld [vmem:[%s6767_s1 + $0xb00] sm:$0xff] }
 0x13d   :  { %2691 = vmatpush1.bf16.msra.mxu1 %v2690_v8  ;;  %v2710_v8 = vpack.c.bf16 %v386_v0, %v384_v63  ;;  %v918_v63 = vld [vmem:[%s6767_s1 + $0x1b10] sm:$0xff]  ;;  %v409_v0 = vld [vmem:[%s6767_s1 + $0xb28] sm:$0xff] }
 0x13e   :  { %3203 = vmatpush1.bf16.msra.mxu0 %v3202_v9  ;;  %2693 = vmatprep.subr.bf16.mxu1 %v2692_v10  ;;  %v3222_v9 = vpack.c.bf16 %v898_v3, %v896_v1  ;;  %v2712_v10 = vpack.c.bf16 %v391_v5, %v389_v4  ;;  %v411_v1 = vld [vmem:[%s6767_s1 + $0xb38] sm:$0xff] }
 0x13f   :  { %3205 = vmatprep.subr.bf16.mxu0 %v3204_v14  ;;  %v3224_v14 = vpack.c.bf16 %v903_v7, %v901_v6  ;;  %v923_v3 = vld [vmem:[%s6767_s1 + $0x1b38] sm:$0xff]  ;;  %v2732_v6 = vpack.c.bf16 %v411_v1, %v409_v0  ;;  %v408_v7 = vld [vmem:[%s6767_s1 + $0xb20] sm:$0xff] }
 0x141   :  { %2695 = vmatpush1.bf16.msra.mxu1 %v2694_v20  ;;  %v2714_v20 = vpack.c.bf16 %v390_v12, %v388_v11  ;;  %v922_v11 = vld [vmem:[%s6767_s1 + $0x1b30] sm:$0xff]  ;;  %v413_v12 = vld [vmem:[%s6767_s1 + $0xb48] sm:$0xff] }
 0x142   :  { %3207 = vmatpush1.bf16.msra.mxu0 %v3206_v21  ;;  %2697 = vmatprep.subr.bf16.mxu1 %v2696_v22  ;;  %v3226_v21 = vpack.c.bf16 %v902_v15, %v900_v13  ;;  %v2716_v22 = vpack.c.bf16 %v395_v17, %v393_v16  ;;  %v415_v13 = vld [vmem:[%s6767_s1 + $0xb58] sm:$0xff] }
 0x143   :  { %3209 = vmatprep.subr.bf16.mxu0 %v3208_v26  ;;  %v3228_v26 = vpack.c.bf16 %v907_v19, %v905_v18  ;;  %v927_v15 = vld [vmem:[%s6767_s1 + $0x1b58] sm:$0xff]  ;;  %v2736_v18 = vpack.c.bf16 %v415_v13, %v413_v12  ;;  %v412_v19 = vld [vmem:[%s6767_s1 + $0xb40] sm:$0xff] }
 0x144   :  { %1437 = vmatmul.mubr.f32.vlgmr.msra.gmra.mrb[0].mxu1 %v28_v32  ;;  %v2718_v32 = vpack.c.bf16 %v394_v24, %v392_v23  ;;  %v926_v23 = vld [vmem:[%s6767_s1 + $0x1b50] sm:$0xff]  ;;  %v417_v24 = vld [vmem:[%s6767_s1 + $0xb68] sm:$0xff] }
 0x145   :  { %2699 = vmatpush1.bf16.msra.mxu1 %v2698_v33  ;;  %2005 = vmatmul.mubr.f32.vlgmr.msra.gmra.mrb[0].mxu0 %v44_v34  ;;  %v3230_v33 = vpack.c.bf16 %v906_v27, %v904_v25  ;;  %v2720_v34 = vpack.c.bf16 %v399_v29, %v397_v28  ;;  %v419_v25 = vld [vmem:[%s6767_s1 + $0xb78] sm:$0xff] }
 0x146   :  { %3211 = vmatpush1.bf16.msra.mxu0 %v3210_v35  ;;  %2701 = vmatprep.subr.bf16.mxu1 %v2700_v36  ;;  %v396_v35 = vld [vmem:[%s6767_s1 + $0xac0] sm:$0xff]  ;;  %v398_v36 = vld [vmem:[%s6767_s1 + $0xad0] sm:$0xff]  ;;  %v931_v27 = vld [vmem:[%s6767_s1 + $0x1b78] sm:$0xff]  ;;  %v2740_v30 = vpack.c.bf16 %v419_v25, %v417_v24 }
 0x147   :  { %3213 = vmatprep.subr.bf16.mxu0 %v3212_v40  ;;  %1507 = vmatprep.mubr.f32.mxu1 %v31_v46  ;;  %v401_v40 = vld [vmem:[%s6767_s1 + $0xae8] sm:$0xff]  ;;  %v2722_v44 = vpack.c.bf16 %v398_v36, %v396_v35  ;;  %v930_v35 = vld [vmem:[%s6767_s1 + $0x1b70] sm:$0xff] }
 0x148   :  { %2075 = vmatprep.mubr.f32.mxu0 %v47_v48  ;;  %v2724_v46 = vpack.c.bf16 %v403_v41, %v401_v40  ;;  %v402_v48 = vld [vmem:[%s6767_s1 + $0xaf0] sm:$0xff]  ;;  %v421_v36 = vld [vmem:[%s6767_s1 + $0xb88] sm:$0xff] }
 0x149   :  { %2703 = vmatpush1.bf16.msra.mxu1 %v2702_v47  ;;  %v400_v47 = vld [vmem:[%s6767_s1 + $0xae0] sm:$0xff] }
 0x14a   :  { %3215 = vmatpush1.bf16.msra.mxu0 %v3214_v49  ;;  %2705 = vmatprep.subr.bf16.mxu1 %v2704_v50  ;;  %v912_v49 = vld [vmem:[%s6767_s1 + $0x1ae0] sm:$0xff]  ;;  %v3236_v50 = vpack.c.bf16 %v915_v43, %v913_v42  ;;  %v2726_v56 = vpack.c.bf16 %v402_v48, %v400_v47  ;;  %v2744_v42 = vpack.c.bf16 %v423_v37, %v421_v36  ;;  %v934_v47 = vld [vmem:[%s6767_s1 + $0x1b90] sm:$0xff]  ;;  %v425_v48 = vld [vmem:[%s6767_s1 + $0xba8] sm:$0xff] }
 0x14b   :  { %3217 = vmatprep.subr.bf16.mxu0 %v3216_v54  ;;  %v917_v54 = vld [vmem:[%s6767_s1 + $0x1b08] sm:$0xff]  ;;  %v3238_v57 = vpack.c.bf16 %v914_v51, %v912_v49  ;;  %v420_v43 = vld [vmem:[%s6767_s1 + $0xb80] sm:$0xff]  ;;  %v427_v49 = vld [vmem:[%s6767_s1 + $0xbb8] sm:$0xff] }
 0x14c   :  { %v939_v51 = vld [vmem:[%s6767_s1 + $0x1bb8] sm:$0xff]  ;;  %v30_v36 = vld [vmem:[%s6768_s0 + $0x50] sm:$0xff] }
 0x14d   :  { %2707 = vmatpush1.bf16.msra.mxu1 %v2706_v60  ;;  %v406_v60 = vld [vmem:[%s6767_s1 + $0xb10] sm:$0xff] }
 0x14e   :  { %3219 = vmatpush1.bf16.msra.mxu0 %v3218_v61  ;;  %2709 = vmatprep.subr.bf16.mxu1 %v2708_v62  ;;  %v916_v61 = vld [vmem:[%s6767_s1 + $0x1b00] sm:$0xff]  ;;  %v3240_v62 = vpack.c.bf16 %v919_v55, %v917_v54  ;;  %v2730_v4 = vpack.c.bf16 %v406_v60, %v404_v59  ;;  %v2748_v54 = vpack.c.bf16 %v427_v49, %v425_v48  ;;  %v938_v59 = vld [vmem:[%s6767_s1 + $0x1bb0] sm:$0xff]  ;;  %v429_v60 = vld [vmem:[%s6767_s1 + $0xbc8] sm:$0xff] }
 0x14f   :  { %3221 = vmatprep.subr.bf16.mxu0 %v3220_v2  ;;  %v921_v2 = vld [vmem:[%s6767_s1 + $0x1b28] sm:$0xff]  ;;  %v3242_v5 = vpack.c.bf16 %v918_v63, %v916_v61  ;;  %v424_v55 = vld [vmem:[%s6767_s1 + $0xba0] sm:$0xff]  ;;  %v431_v61 = vld [vmem:[%s6767_s1 + $0xbd8] sm:$0xff] }
 0x150   :  { %v943_v63 = vld [vmem:[%s6767_s1 + $0x1bd8] sm:$0xff]  ;;  %v957_v48 = vld [vmem:[%s6767_s1 + $0x1c48] sm:$0xff] }
 0x151   :  { %2711 = vmatpush1.bf16.msra.mxu1 %v2710_v8  ;;  %v410_v8 = vld [vmem:[%s6767_s1 + $0xb30] sm:$0xff]  ;;  %v959_v49 = vld [vmem:[%s6767_s1 + $0x1c58] sm:$0xff] }
 0x152   :  { %3223 = vmatpush1.bf16.msra.mxu0 %v3222_v9  ;;  %2713 = vmatprep.subr.bf16.mxu1 %v2712_v10  ;;  %v920_v9 = vld [vmem:[%s6767_s1 + $0x1b20] sm:$0xff]  ;;  %v3244_v10 = vpack.c.bf16 %v923_v3, %v921_v2  ;;  %v2734_v16 = vpack.c.bf16 %v410_v8, %v408_v7  ;;  %v2752_v2 = vpack.c.bf16 %v431_v61, %v429_v60  ;;  %v942_v7 = vld [vmem:[%s6767_s1 + $0x1bd0] sm:$0xff]  ;;  %v433_v8 = vld [vmem:[%s6767_s1 + $0xbe8] sm:$0xff] }
 0x153   :  { %3225 = vmatprep.subr.bf16.mxu0 %v3224_v14  ;;  %v925_v14 = vld [vmem:[%s6767_s1 + $0x1b48] sm:$0xff]  ;;  %v3246_v17 = vpack.c.bf16 %v922_v11, %v920_v9  ;;  %v428_v3 = vld [vmem:[%s6767_s1 + $0xbc0] sm:$0xff]  ;;  %v435_v9 = vld [vmem:[%s6767_s1 + $0xbf8] sm:$0xff] }
 0x154   :  { %v947_v11 = vld [vmem:[%s6767_s1 + $0x1bf8] sm:$0xff]  ;;  %v449_v60 = vld [vmem:[%s6767_s1 + $0xc68] sm:$0xff] }
 0x155   :  { %2715 = vmatpush1.bf16.msra.mxu1 %v2714_v20  ;;  %v414_v20 = vld [vmem:[%s6767_s1 + $0xb50] sm:$0xff]  ;;  %v451_v61 = vld [vmem:[%s6767_s1 + $0xc78] sm:$0xff] }
 0x156   :  { %3227 = vmatpush1.bf16.msra.mxu0 %v3226_v21  ;;  %2717 = vmatprep.subr.bf16.mxu1 %v2716_v22  ;;  %v924_v21 = vld [vmem:[%s6767_s1 + $0x1b40] sm:$0xff]  ;;  %v3248_v22 = vpack.c.bf16 %v927_v15, %v925_v14  ;;  %v2738_v28 = vpack.c.bf16 %v414_v20, %v412_v19  ;;  %v2756_v14 = vpack.c.bf16 %v435_v9, %v433_v8  ;;  %v946_v19 = vld [vmem:[%s6767_s1 + $0x1bf0] sm:$0xff]  ;;  %v437_v20 = vld [vmem:[%s6767_s1 + $0xc08] sm:$0xff] }
 0x157   :  { %3229 = vmatprep.subr.bf16.mxu0 %v3228_v26  ;;  %v929_v26 = vld [vmem:[%s6767_s1 + $0x1b68] sm:$0xff]  ;;  %v3250_v29 = vpack.c.bf16 %v926_v23, %v924_v21  ;;  %v432_v15 = vld [vmem:[%s6767_s1 + $0xbe0] sm:$0xff]  ;;  %v439_v21 = vld [vmem:[%s6767_s1 + $0xc18] sm:$0xff] }
 0x158   :  { %v951_v23 = vld [vmem:[%s6767_s1 + $0x1c18] sm:$0xff]  ;;  %v453_v8 = vld [vmem:[%s6767_s1 + $0xc88] sm:$0xff] }
 0x159   :  { %2719 = vmatpush1.bf16.msra.mxu1 %v2718_v32  ;;  %v418_v32 = vld [vmem:[%s6767_s1 + $0xb70] sm:$0xff]  ;;  %v455_v9 = vld [vmem:[%s6767_s1 + $0xc98] sm:$0xff] }
 0x15a   :  { %3231 = vmatpush1.bf16.msra.mxu0 %v3230_v33  ;;  %2721 = vmatprep.subr.bf16.mxu1 %v2720_v34  ;;  %v928_v33 = vld [vmem:[%s6767_s1 + $0x1b60] sm:$0xff]  ;;  %v3252_v34 = vpack.c.bf16 %v931_v27, %v929_v26  ;;  %v2742_v40 = vpack.c.bf16 %v418_v32, %v416_v31  ;;  %v2760_v26 = vpack.c.bf16 %v439_v21, %v437_v20  ;;  %v950_v31 = vld [vmem:[%s6767_s1 + $0x1c10] sm:$0xff]  ;;  %v441_v32 = vld [vmem:[%s6767_s1 + $0xc28] sm:$0xff] }
 0x15b   :  { %3233 = vmatprep.subr.bf16.mxu0 %v3232_v38  ;;  %v933_v38 = vld [vmem:[%s6767_s1 + $0x1b88] sm:$0xff]  ;;  %v3254_v41 = vpack.c.bf16 %v930_v35, %v928_v33  ;;  %v436_v27 = vld [vmem:[%s6767_s1 + $0xc00] sm:$0xff]  ;;  %v443_v33 = vld [vmem:[%s6767_s1 + $0xc38] sm:$0xff] }
 0x15c   :  { %v955_v35 = vld [vmem:[%s6767_s1 + $0x1c38] sm:$0xff]  ;;  %v457_v20 = vld [vmem:[%s6767_s1 + $0xca8] sm:$0xff] }
 0x15d   :  { %2723 = vmatpush1.bf16.msra.mxu1 %v2722_v44  ;;  %v422_v44 = vld [vmem:[%s6767_s1 + $0xb90] sm:$0xff]  ;;  %v459_v21 = vld [vmem:[%s6767_s1 + $0xcb8] sm:$0xff] }
 0x15e   :  { %3235 = vmatpush1.bf16.msra.mxu0 %v3234_v45  ;;  %2725 = vmatprep.subr.bf16.mxu1 %v2724_v46  ;;  %v932_v45 = vld [vmem:[%s6767_s1 + $0x1b80] sm:$0xff]  ;;  %v3256_v46 = vpack.c.bf16 %v935_v39, %v933_v38  ;;  %v2746_v52 = vpack.c.bf16 %v422_v44, %v420_v43  ;;  %v46_v38 = vld [vmem:[%s6768_s0 + $0xd0] sm:$0xff] }
 0x15f   :  { %3237 = vmatprep.subr.bf16.mxu0 %v3236_v50  ;;  %v937_v50 = vld [vmem:[%s6767_s1 + $0x1ba8] sm:$0xff]  ;;  %v3258_v53 = vpack.c.bf16 %v934_v47, %v932_v45  ;;  %v952_v43 = vld [vmem:[%s6767_s1 + $0x1c20] sm:$0xff]  ;;  %v954_v45 = vld [vmem:[%s6767_s1 + $0x1c30] sm:$0xff] }
 0x160   :  { %v447_v47 = vld [vmem:[%s6767_s1 + $0xc58] sm:$0xff] }
 0x161   :  { %2727 = vmatpush1.bf16.msra.mxu1 %v2726_v56  ;;  %v426_v56 = vld [vmem:[%s6767_s1 + $0xbb0] sm:$0xff] }
 0x162   :  { %3239 = vmatpush1.bf16.msra.mxu0 %v3238_v57  ;;  %2729 = vmatprep.subr.bf16.mxu1 %v2728_v58  ;;  %v936_v57 = vld [vmem:[%s6767_s1 + $0x1ba0] sm:$0xff]  ;;  %v3260_v58 = vpack.c.bf16 %v939_v51, %v937_v50  ;;  %v2750_v0 = vpack.c.bf16 %v426_v56, %v424_v55  ;;  %v33_v50 = vld [vmem:[%s6768_s0 + $0x68] sm:$0xff]  ;;  %v446_v56 = vld [vmem:[%s6767_s1 + $0xc50] sm:$0xff] }
 0x163   :  { %3241 = vmatprep.subr.bf16.mxu0 %v3240_v62  ;;  %v941_v62 = vld [vmem:[%s6767_s1 + $0x1bc8] sm:$0xff]  ;;  %v3262_v1 = vpack.c.bf16 %v938_v59, %v936_v57  ;;  %v444_v55 = vld [vmem:[%s6767_s1 + $0xc40] sm:$0xff]  ;;  %v958_v59 = vld [vmem:[%s6767_s1 + $0x1c50] sm:$0xff] }
 0x164   :  { %v956_v57 = vld [vmem:[%s6767_s1 + $0x1c40] sm:$0xff] }
 0x165   :  { %2731 = vmatpush1.bf16.msra.mxu1 %v2730_v4  ;;  %v430_v4 = vld [vmem:[%s6767_s1 + $0xbd0] sm:$0xff] }
 0x166   :  { %3243 = vmatpush1.bf16.msra.mxu0 %v3242_v5  ;;  %2733 = vmatprep.subr.bf16.mxu1 %v2732_v6  ;;  %v940_v5 = vld [vmem:[%s6767_s1 + $0x1bc0] sm:$0xff]  ;;  %v3264_v6 = vpack.c.bf16 %v943_v63, %v941_v62  ;;  %v2754_v12 = vpack.c.bf16 %v430_v4, %v428_v3  ;;  %v961_v62 = vld [vmem:[%s6767_s1 + $0x1c68] sm:$0xff]  ;;  %v963_v63 = vld [vmem:[%s6767_s1 + $0x1c78] sm:$0xff] }
 0x167   :  { %3245 = vmatprep.subr.bf16.mxu0 %v3244_v10  ;;  %v945_v10 = vld [vmem:[%s6767_s1 + $0x1be8] sm:$0xff]  ;;  %v3266_v13 = vpack.c.bf16 %v942_v7, %v940_v5  ;;  %v448_v3 = vld [vmem:[%s6767_s1 + $0xc60] sm:$0xff]  ;;  %v450_v4 = vld [vmem:[%s6767_s1 + $0xc70] sm:$0xff] }
 0x168   :  { %v960_v5 = vld [vmem:[%s6767_s1 + $0x1c60] sm:$0xff]  ;;  %v962_v7 = vld [vmem:[%s6767_s1 + $0x1c70] sm:$0xff] }
 0x169   :  { %2735 = vmatpush1.bf16.msra.mxu1 %v2734_v16  ;;  %v434_v16 = vld [vmem:[%s6767_s1 + $0xbf0] sm:$0xff] }
 0x16a   :  { %3247 = vmatpush1.bf16.msra.mxu0 %v3246_v17  ;;  %2737 = vmatprep.subr.bf16.mxu1 %v2736_v18  ;;  %v944_v17 = vld [vmem:[%s6767_s1 + $0x1be0] sm:$0xff]  ;;  %v3268_v18 = vpack.c.bf16 %v947_v11, %v945_v10  ;;  %v2758_v24 = vpack.c.bf16 %v434_v16, %v432_v15  ;;  %v965_v10 = vld [vmem:[%s6767_s1 + $0x1c88] sm:$0xff]  ;;  %v967_v11 = vld [vmem:[%s6767_s1 + $0x1c98] sm:$0xff] }
 0x16b   :  { %3249 = vmatprep.subr.bf16.mxu0 %v3248_v22  ;;  %v949_v22 = vld [vmem:[%s6767_s1 + $0x1c08] sm:$0xff]  ;;  %v3270_v25 = vpack.c.bf16 %v946_v19, %v944_v17  ;;  %v452_v15 = vld [vmem:[%s6767_s1 + $0xc80] sm:$0xff]  ;;  %v454_v16 = vld [vmem:[%s6767_s1 + $0xc90] sm:$0xff] }
 0x16c   :  { %v964_v17 = vld [vmem:[%s6767_s1 + $0x1c80] sm:$0xff]  ;;  %v966_v19 = vld [vmem:[%s6767_s1 + $0x1c90] sm:$0xff] }
 0x16d   :  { %2739 = vmatpush1.bf16.msra.mxu1 %v2738_v28  ;;  %v438_v28 = vld [vmem:[%s6767_s1 + $0xc10] sm:$0xff] }
 0x16e   :  { %3251 = vmatpush1.bf16.msra.mxu0 %v3250_v29  ;;  %2741 = vmatprep.subr.bf16.mxu1 %v2740_v30  ;;  %v948_v29 = vld [vmem:[%s6767_s1 + $0x1c00] sm:$0xff]  ;;  %v3272_v30 = vpack.c.bf16 %v951_v23, %v949_v22  ;;  %v2762_v37 = vpack.c.bf16 %v438_v28, %v436_v27  ;;  %v969_v22 = vld [vmem:[%s6767_s1 + $0x1ca8] sm:$0xff]  ;;  %v971_v23 = vld [vmem:[%s6767_s1 + $0x1cb8] sm:$0xff] }
 0x16f   :  { %3253 = vmatprep.subr.bf16.mxu0 %v3252_v34  ;;  %v953_v34 = vld [vmem:[%s6767_s1 + $0x1c28] sm:$0xff]  ;;  %v3274_v39 = vpack.c.bf16 %v950_v31, %v948_v29  ;;  %v456_v27 = vld [vmem:[%s6767_s1 + $0xca0] sm:$0xff]  ;;  %v458_v28 = vld [vmem:[%s6767_s1 + $0xcb0] sm:$0xff] }
 0x170   :  { %v3276_v44 = vpack.c.bf16 %v955_v35, %v953_v34  ;;  %v968_v29 = vld [vmem:[%s6767_s1 + $0x1ca0] sm:$0xff]  ;;  %v970_v31 = vld [vmem:[%s6767_s1 + $0x1cb0] sm:$0xff]  ;;  %v973_v34 = vld [vmem:[%s6767_s1 + $0x1cc8] sm:$0xff] }
 0x171   :  { %2743 = vmatpush1.bf16.msra.mxu1 %v2742_v40  ;;  %v2764_v40 = vpack.c.bf16 %v443_v33, %v441_v32  ;;  %v461_v32 = vld [vmem:[%s6767_s1 + $0xcc8] sm:$0xff]  ;;  %v463_v33 = vld [vmem:[%s6767_s1 + $0xcd8] sm:$0xff] }
 0x172   :  { %3255 = vmatpush1.bf16.msra.mxu0 %v3254_v41  ;;  %2745 = vmatprep.subr.bf16.mxu1 %v2744_v42  ;;  %v440_v41 = vld [vmem:[%s6767_s1 + $0xc20] sm:$0xff]  ;;  %v442_v42 = vld [vmem:[%s6767_s1 + $0xc30] sm:$0xff]  ;;  %v975_v35 = vld [vmem:[%s6767_s1 + $0x1cd8] sm:$0xff] }
 0x173   :  { %3257 = vmatprep.subr.bf16.mxu0 %v3256_v46  ;;  %v445_v46 = vld [vmem:[%s6767_s1 + $0xc48] sm:$0xff]  ;;  %v2766_v51 = vpack.c.bf16 %v442_v42, %v440_v41  ;;  %v972_v41 = vld [vmem:[%s6767_s1 + $0x1cc0] sm:$0xff]  ;;  %v3296_v42 = vpack.c.bf16 %v975_v35, %v973_v34 }
 0x174   :  { %v480_v35 = vld [vmem:[%s6767_s1 + $0xd60] sm:$0xff] }
 0x175   :  { %2747 = vmatpush1.bf16.msra.mxu1 %v2746_v52  ;;  %v49_v52 = vld [vmem:[%s6768_s0 + $0xe8] sm:$0xff] }
 0x176   :  { %3259 = vmatpush1.bf16.msra.mxu0 %v3258_v53  ;;  %2749 = vmatprep.subr.bf16.mxu1 %v2748_v54  ;;  %v3278_v53 = vpack.c.bf16 %v954_v45, %v952_v43  ;;  %v2768_v54 = vpack.c.bf16 %v447_v47, %v445_v46  ;;  %v974_v43 = vld [vmem:[%s6767_s1 + $0x1cd0] sm:$0xff]  ;;  %v467_v45 = vld [vmem:[%s6767_s1 + $0xcf8] sm:$0xff]  ;;  %v977_v46 = vld [vmem:[%s6767_s1 + $0x1ce8] sm:$0xff] }
 0x177   :  { %3261 = vmatprep.subr.bf16.mxu0 %v3260_v58  ;;  %v3280_v58 = vpack.c.bf16 %v959_v49, %v957_v48  ;;  %v979_v47 = vld [vmem:[%s6767_s1 + $0x1cf8] sm:$0xff]  ;;  %v3298_v49 = vpack.c.bf16 %v974_v43, %v972_v41 }
 0x178   :  { %v487_v41 = vld [vmem:[%s6767_s1 + $0xd98] sm:$0xff] }
 0x179   :  { %2751 = vmatpush1.bf16.msra.mxu1 %v2750_v0  ;;  %v2770_v0 = vpack.c.bf16 %v446_v56, %v444_v55  ;;  %v978_v55 = vld [vmem:[%s6767_s1 + $0x1cf0] sm:$0xff]  ;;  %v469_v56 = vld [vmem:[%s6767_s1 + $0xd08] sm:$0xff]  ;;  %v999_v43 = vld [vmem:[%s6767_s1 + $0x1d98] sm:$0xff] }
 0x17a   :  { %3263 = vmatpush1.bf16.msra.mxu0 %v3262_v1  ;;  %2753 = vmatprep.subr.bf16.mxu1 %v2752_v2  ;;  %v3282_v1 = vpack.c.bf16 %v958_v59, %v956_v57  ;;  %v2772_v2 = vpack.c.bf16 %v451_v61, %v449_v60  ;;  %v471_v57 = vld [vmem:[%s6767_s1 + $0xd18] sm:$0xff] }
 0x17b   :  { %3265 = vmatprep.subr.bf16.mxu0 %v3264_v6  ;;  %v3284_v6 = vpack.c.bf16 %v963_v63, %v961_v62  ;;  %v983_v59 = vld [vmem:[%s6767_s1 + $0x1d18] sm:$0xff]  ;;  %v2792_v62 = vpack.c.bf16 %v471_v57, %v469_v56  ;;  %v468_v63 = vld [vmem:[%s6767_s1 + $0xd00] sm:$0xff] }
 0x17d   :  { %2755 = vmatpush1.bf16.msra.mxu1 %v2754_v12  ;;  %v2774_v12 = vpack.c.bf16 %v450_v4, %v448_v3  ;;  %v982_v3 = vld [vmem:[%s6767_s1 + $0x1d10] sm:$0xff]  ;;  %v473_v4 = vld [vmem:[%s6767_s1 + $0xd28] sm:$0xff] }
 0x17e   :  { %3267 = vmatpush1.bf16.msra.mxu0 %v3266_v13  ;;  %2757 = vmatprep.subr.bf16.mxu1 %v2756_v14  ;;  %v3286_v13 = vpack.c.bf16 %v962_v7, %v960_v5  ;;  %v2776_v14 = vpack.c.bf16 %v455_v9, %v453_v8  ;;  %v475_v5 = vld [vmem:[%s6767_s1 + $0xd38] sm:$0xff] }
 0x17f   :  { %3269 = vmatprep.subr.bf16.mxu0 %v3268_v18  ;;  %v3288_v18 = vpack.c.bf16 %v967_v11, %v965_v10  ;;  %v987_v7 = vld [vmem:[%s6767_s1 + $0x1d38] sm:$0xff]  ;;  %v2796_v10 = vpack.c.bf16 %v475_v5, %v473_v4  ;;  %v472_v11 = vld [vmem:[%s6767_s1 + $0xd20] sm:$0xff] }
 0x181   :  { %2759 = vmatpush1.bf16.msra.mxu1 %v2758_v24  ;;  %v2778_v24 = vpack.c.bf16 %v454_v16, %v452_v15  ;;  %v986_v15 = vld [vmem:[%s6767_s1 + $0x1d30] sm:$0xff]  ;;  %v477_v16 = vld [vmem:[%s6767_s1 + $0xd48] sm:$0xff] }
 0x182   :  { %3271 = vmatpush1.bf16.msra.mxu0 %v3270_v25  ;;  %2761 = vmatprep.subr.bf16.mxu1 %v2760_v26  ;;  %v3290_v25 = vpack.c.bf16 %v966_v19, %v964_v17  ;;  %v2780_v26 = vpack.c.bf16 %v459_v21, %v457_v20  ;;  %v479_v17 = vld [vmem:[%s6767_s1 + $0xd58] sm:$0xff] }
 0x183   :  { %3273 = vmatprep.subr.bf16.mxu0 %v3272_v30  ;;  %v3292_v30 = vpack.c.bf16 %v971_v23, %v969_v22  ;;  %v991_v19 = vld [vmem:[%s6767_s1 + $0x1d58] sm:$0xff]  ;;  %v2800_v22 = vpack.c.bf16 %v479_v17, %v477_v16  ;;  %v476_v23 = vld [vmem:[%s6767_s1 + $0xd40] sm:$0xff] }
 0x184   :  { %1508 = vmatmul.mubr.f32.vlgmr.msra.gmra.mrb[0].mxu1 %v30_v36  ;;  %v2782_v36 = vpack.c.bf16 %v458_v28, %v456_v27  ;;  %v990_v27 = vld [vmem:[%s6767_s1 + $0x1d50] sm:$0xff]  ;;  %v481_v28 = vld [vmem:[%s6767_s1 + $0xd68] sm:$0xff] }
 0x185   :  { %2763 = vmatpush1.bf16.msra.mxu1 %v2762_v37  ;;  %2076 = vmatmul.mubr.f32.vlgmr.msra.gmra.mrb[0].mxu0 %v46_v38  ;;  %v3294_v37 = vpack.c.bf16 %v970_v31, %v968_v29  ;;  %v2784_v38 = vpack.c.bf16 %v463_v33, %v461_v32  ;;  %v483_v29 = vld [vmem:[%s6767_s1 + $0xd78] sm:$0xff] }
 0x186   :  { %3275 = vmatpush1.bf16.msra.mxu0 %v3274_v39  ;;  %2765 = vmatprep.subr.bf16.mxu1 %v2764_v40  ;;  %v460_v39 = vld [vmem:[%s6767_s1 + $0xcc0] sm:$0xff]  ;;  %v462_v40 = vld [vmem:[%s6767_s1 + $0xcd0] sm:$0xff]  ;;  %v995_v31 = vld [vmem:[%s6767_s1 + $0x1d78] sm:$0xff]  ;;  %v2804_v34 = vpack.c.bf16 %v483_v29, %v481_v28 }
 0x187   :  { %3277 = vmatprep.subr.bf16.mxu0 %v3276_v44  ;;  %1578 = vmatprep.mubr.f32.mxu1 %v33_v50  ;;  %v465_v44 = vld [vmem:[%s6767_s1 + $0xce8] sm:$0xff]  ;;  %v2786_v48 = vpack.c.bf16 %v462_v40, %v460_v39  ;;  %v994_v39 = vld [vmem:[%s6767_s1 + $0x1d70] sm:$0xff] }
 0x188   :  { %2146 = vmatprep.mubr.f32.mxu0 %v49_v52  ;;  %v2788_v50 = vpack.c.bf16 %v467_v45, %v465_v44  ;;  %v466_v52 = vld [vmem:[%s6767_s1 + $0xcf0] sm:$0xff]  ;;  %v485_v40 = vld [vmem:[%s6767_s1 + $0xd88] sm:$0xff] }
 0x189   :  { %2767 = vmatpush1.bf16.msra.mxu1 %v2766_v51  ;;  %v464_v51 = vld [vmem:[%s6767_s1 + $0xce0] sm:$0xff] }
 0x18a   :  { %3279 = vmatpush1.bf16.msra.mxu0 %v3278_v53  ;;  %2769 = vmatprep.subr.bf16.mxu1 %v2768_v54  ;;  %v976_v53 = vld [vmem:[%s6767_s1 + $0x1ce0] sm:$0xff]  ;;  %v3300_v54 = vpack.c.bf16 %v979_v47, %v977_v46  ;;  %v2790_v60 = vpack.c.bf16 %v466_v52, %v464_v51  ;;  %v2808_v46 = vpack.c.bf16 %v487_v41, %v485_v40  ;;  %v998_v51 = vld [vmem:[%s6767_s1 + $0x1d90] sm:$0xff]  ;;  %v489_v52 = vld [vmem:[%s6767_s1 + $0xda8] sm:$0xff] }
 0x18b   :  { %3281 = vmatprep.subr.bf16.mxu0 %v3280_v58  ;;  %v981_v58 = vld [vmem:[%s6767_s1 + $0x1d08] sm:$0xff]  ;;  %v3302_v61 = vpack.c.bf16 %v978_v55, %v976_v53  ;;  %v484_v47 = vld [vmem:[%s6767_s1 + $0xd80] sm:$0xff]  ;;  %v491_v53 = vld [vmem:[%s6767_s1 + $0xdb8] sm:$0xff] }
 0x18c   :  { %v1003_v55 = vld [vmem:[%s6767_s1 + $0x1db8] sm:$0xff]  ;;  %v32_v40 = vld [vmem:[%s6768_s0 + $0x60] sm:$0xff] }
 0x18d   :  { %2771 = vmatpush1.bf16.msra.mxu1 %v2770_v0  ;;  %v470_v0 = vld [vmem:[%s6767_s1 + $0xd10] sm:$0xff] }
 0x18e   :  { %3283 = vmatpush1.bf16.msra.mxu0 %v3282_v1  ;;  %2773 = vmatprep.subr.bf16.mxu1 %v2772_v2  ;;  %v980_v1 = vld [vmem:[%s6767_s1 + $0x1d00] sm:$0xff]  ;;  %v3304_v2 = vpack.c.bf16 %v983_v59, %v981_v58  ;;  %v2794_v8 = vpack.c.bf16 %v470_v0, %v468_v63  ;;  %v2812_v58 = vpack.c.bf16 %v491_v53, %v489_v52  ;;  %v1002_v63 = vld [vmem:[%s6767_s1 + $0x1db0] sm:$0xff]  ;;  %v493_v0 = vld [vmem:[%s6767_s1 + $0xdc8] sm:$0xff] }
 0x18f   :  { %3285 = vmatprep.subr.bf16.mxu0 %v3284_v6  ;;  %v985_v6 = vld [vmem:[%s6767_s1 + $0x1d28] sm:$0xff]  ;;  %v3306_v9 = vpack.c.bf16 %v982_v3, %v980_v1  ;;  %v488_v59 = vld [vmem:[%s6767_s1 + $0xda0] sm:$0xff]  ;;  %v495_v1 = vld [vmem:[%s6767_s1 + $0xdd8] sm:$0xff] }
 0x190   :  { %v1007_v3 = vld [vmem:[%s6767_s1 + $0x1dd8] sm:$0xff]  ;;  %v1021_v52 = vld [vmem:[%s6767_s1 + $0x1e48] sm:$0xff] }
 0x191   :  { %2775 = vmatpush1.bf16.msra.mxu1 %v2774_v12  ;;  %v474_v12 = vld [vmem:[%s6767_s1 + $0xd30] sm:$0xff]  ;;  %v1023_v53 = vld [vmem:[%s6767_s1 + $0x1e58] sm:$0xff] }
 0x192   :  { %3287 = vmatpush1.bf16.msra.mxu0 %v3286_v13  ;;  %2777 = vmatprep.subr.bf16.mxu1 %v2776_v14  ;;  %v984_v13 = vld [vmem:[%s6767_s1 + $0x1d20] sm:$0xff]  ;;  %v3308_v14 = vpack.c.bf16 %v987_v7, %v985_v6  ;;  %v2798_v20 = vpack.c.bf16 %v474_v12, %v472_v11  ;;  %v2816_v6 = vpack.c.bf16 %v495_v1, %v493_v0  ;;  %v1006_v11 = vld [vmem:[%s6767_s1 + $0x1dd0] sm:$0xff]  ;;  %v497_v12 = vld [vmem:[%s6767_s1 + $0xde8] sm:$0xff] }
 0x193   :  { %3289 = vmatprep.subr.bf16.mxu0 %v3288_v18  ;;  %v989_v18 = vld [vmem:[%s6767_s1 + $0x1d48] sm:$0xff]  ;;  %v3310_v21 = vpack.c.bf16 %v986_v15, %v984_v13  ;;  %v492_v7 = vld [vmem:[%s6767_s1 + $0xdc0] sm:$0xff]  ;;  %v499_v13 = vld [vmem:[%s6767_s1 + $0xdf8] sm:$0xff] }
 0x194   :  { %v1011_v15 = vld [vmem:[%s6767_s1 + $0x1df8] sm:$0xff]  ;;  %v513_v0 = vld [vmem:[%s6767_s1 + $0xe68] sm:$0xff] }
 0x195   :  { %2779 = vmatpush1.bf16.msra.mxu1 %v2778_v24  ;;  %v478_v24 = vld [vmem:[%s6767_s1 + $0xd50] sm:$0xff]  ;;  %v515_v1 = vld [vmem:[%s6767_s1 + $0xe78] sm:$0xff] }
 0x196   :  { %3291 = vmatpush1.bf16.msra.mxu0 %v3290_v25  ;;  %2781 = vmatprep.subr.bf16.mxu1 %v2780_v26  ;;  %v988_v25 = vld [vmem:[%s6767_s1 + $0x1d40] sm:$0xff]  ;;  %v3312_v26 = vpack.c.bf16 %v991_v19, %v989_v18  ;;  %v2802_v32 = vpack.c.bf16 %v478_v24, %v476_v23  ;;  %v2820_v18 = vpack.c.bf16 %v499_v13, %v497_v12  ;;  %v1010_v23 = vld [vmem:[%s6767_s1 + $0x1df0] sm:$0xff]  ;;  %v501_v24 = vld [vmem:[%s6767_s1 + $0xe08] sm:$0xff] }
 0x197   :  { %3293 = vmatprep.subr.bf16.mxu0 %v3292_v30  ;;  %v993_v30 = vld [vmem:[%s6767_s1 + $0x1d68] sm:$0xff]  ;;  %v3314_v33 = vpack.c.bf16 %v990_v27, %v988_v25  ;;  %v496_v19 = vld [vmem:[%s6767_s1 + $0xde0] sm:$0xff]  ;;  %v503_v25 = vld [vmem:[%s6767_s1 + $0xe18] sm:$0xff] }
 0x198   :  { %v1015_v27 = vld [vmem:[%s6767_s1 + $0x1e18] sm:$0xff]  ;;  %v517_v12 = vld [vmem:[%s6767_s1 + $0xe88] sm:$0xff] }
 0x199   :  { %2783 = vmatpush1.bf16.msra.mxu1 %v2782_v36  ;;  %v482_v36 = vld [vmem:[%s6767_s1 + $0xd70] sm:$0xff]  ;;  %v519_v13 = vld [vmem:[%s6767_s1 + $0xe98] sm:$0xff] }
 0x19a   :  { %3295 = vmatpush1.bf16.msra.mxu0 %v3294_v37  ;;  %2785 = vmatprep.subr.bf16.mxu1 %v2784_v38  ;;  %v992_v37 = vld [vmem:[%s6767_s1 + $0x1d60] sm:$0xff]  ;;  %v3316_v38 = vpack.c.bf16 %v995_v31, %v993_v30  ;;  %v2806_v44 = vpack.c.bf16 %v482_v36, %v480_v35  ;;  %v2824_v30 = vpack.c.bf16 %v503_v25, %v501_v24  ;;  %v1014_v35 = vld [vmem:[%s6767_s1 + $0x1e10] sm:$0xff]  ;;  %v505_v36 = vld [vmem:[%s6767_s1 + $0xe28] sm:$0xff] }
 0x19b   :  { %3297 = vmatprep.subr.bf16.mxu0 %v3296_v42  ;;  %v997_v42 = vld [vmem:[%s6767_s1 + $0x1d88] sm:$0xff]  ;;  %v3318_v45 = vpack.c.bf16 %v994_v39, %v992_v37  ;;  %v500_v31 = vld [vmem:[%s6767_s1 + $0xe00] sm:$0xff]  ;;  %v507_v37 = vld [vmem:[%s6767_s1 + $0xe38] sm:$0xff] }
 0x19c   :  { %v1019_v39 = vld [vmem:[%s6767_s1 + $0x1e38] sm:$0xff]  ;;  %v521_v24 = vld [vmem:[%s6767_s1 + $0xea8] sm:$0xff] }
 0x19d   :  { %2787 = vmatpush1.bf16.msra.mxu1 %v2786_v48  ;;  %v486_v48 = vld [vmem:[%s6767_s1 + $0xd90] sm:$0xff]  ;;  %v523_v25 = vld [vmem:[%s6767_s1 + $0xeb8] sm:$0xff] }
 0x19e   :  { %3299 = vmatpush1.bf16.msra.mxu0 %v3298_v49  ;;  %2789 = vmatprep.subr.bf16.mxu1 %v2788_v50  ;;  %v996_v49 = vld [vmem:[%s6767_s1 + $0x1d80] sm:$0xff]  ;;  %v3320_v50 = vpack.c.bf16 %v999_v43, %v997_v42  ;;  %v2810_v56 = vpack.c.bf16 %v486_v48, %v484_v47 }
 0x19f   :  { %3301 = vmatprep.subr.bf16.mxu0 %v3300_v54  ;;  %v1001_v54 = vld [vmem:[%s6767_s1 + $0x1da8] sm:$0xff]  ;;  %v3322_v57 = vpack.c.bf16 %v998_v51, %v996_v49  ;;  %v48_v42 = vld [vmem:[%s6768_s0 + $0xe0] sm:$0xff]  ;;  %v1018_v49 = vld [vmem:[%s6767_s1 + $0x1e30] sm:$0xff] }
 0x1a0   :  { %v1016_v47 = vld [vmem:[%s6767_s1 + $0x1e20] sm:$0xff]  ;;  %v511_v51 = vld [vmem:[%s6767_s1 + $0xe58] sm:$0xff] }
 0x1a1   :  { %2791 = vmatpush1.bf16.msra.mxu1 %v2790_v60  ;;  %v490_v60 = vld [vmem:[%s6767_s1 + $0xdb0] sm:$0xff] }
 0x1a2   :  { %3303 = vmatpush1.bf16.msra.mxu0 %v3302_v61  ;;  %2793 = vmatprep.subr.bf16.mxu1 %v2792_v62  ;;  %v1000_v61 = vld [vmem:[%s6767_s1 + $0x1da0] sm:$0xff]  ;;  %v3324_v62 = vpack.c.bf16 %v1003_v55, %v1001_v54  ;;  %v2814_v4 = vpack.c.bf16 %v490_v60, %v488_v59  ;;  %v35_v54 = vld [vmem:[%s6768_s0 + $0x78] sm:$0xff]  ;;  %v510_v60 = vld [vmem:[%s6767_s1 + $0xe50] sm:$0xff] }
 0x1a3   :  { %3305 = vmatprep.subr.bf16.mxu0 %v3304_v2  ;;  %v1005_v2 = vld [vmem:[%s6767_s1 + $0x1dc8] sm:$0xff]  ;;  %v3326_v5 = vpack.c.bf16 %v1002_v63, %v1000_v61  ;;  %v508_v59 = vld [vmem:[%s6767_s1 + $0xe40] sm:$0xff]  ;;  %v1022_v63 = vld [vmem:[%s6767_s1 + $0x1e50] sm:$0xff] }
 0x1a4   :  { %v1020_v61 = vld [vmem:[%s6767_s1 + $0x1e40] sm:$0xff] }
 0x1a5   :  { %2795 = vmatpush1.bf16.msra.mxu1 %v2794_v8  ;;  %v494_v8 = vld [vmem:[%s6767_s1 + $0xdd0] sm:$0xff] }
 0x1a6   :  { %3307 = vmatpush1.bf16.msra.mxu0 %v3306_v9  ;;  %2797 = vmatprep.subr.bf16.mxu1 %v2796_v10  ;;  %v1004_v9 = vld [vmem:[%s6767_s1 + $0x1dc0] sm:$0xff]  ;;  %v3328_v10 = vpack.c.bf16 %v1007_v3, %v1005_v2  ;;  %v2818_v16 = vpack.c.bf16 %v494_v8, %v492_v7  ;;  %v1025_v2 = vld [vmem:[%s6767_s1 + $0x1e68] sm:$0xff]  ;;  %v1027_v3 = vld [vmem:[%s6767_s1 + $0x1e78] sm:$0xff] }
 0x1a7   :  { %3309 = vmatprep.subr.bf16.mxu0 %v3308_v14  ;;  %v1009_v14 = vld [vmem:[%s6767_s1 + $0x1de8] sm:$0xff]  ;;  %v3330_v17 = vpack.c.bf16 %v1006_v11, %v1004_v9  ;;  %v512_v7 = vld [vmem:[%s6767_s1 + $0xe60] sm:$0xff]  ;;  %v514_v8 = vld [vmem:[%s6767_s1 + $0xe70] sm:$0xff] }
 0x1a8   :  { %v1024_v9 = vld [vmem:[%s6767_s1 + $0x1e60] sm:$0xff]  ;;  %v1026_v11 = vld [vmem:[%s6767_s1 + $0x1e70] sm:$0xff] }
 0x1a9   :  { %2799 = vmatpush1.bf16.msra.mxu1 %v2798_v20  ;;  %v498_v20 = vld [vmem:[%s6767_s1 + $0xdf0] sm:$0xff] }
 0x1aa   :  { %3311 = vmatpush1.bf16.msra.mxu0 %v3310_v21  ;;  %2801 = vmatprep.subr.bf16.mxu1 %v2800_v22  ;;  %v1008_v21 = vld [vmem:[%s6767_s1 + $0x1de0] sm:$0xff]  ;;  %v3332_v22 = vpack.c.bf16 %v1011_v15, %v1009_v14  ;;  %v2822_v28 = vpack.c.bf16 %v498_v20, %v496_v19  ;;  %v1029_v14 = vld [vmem:[%s6767_s1 + $0x1e88] sm:$0xff]  ;;  %v1031_v15 = vld [vmem:[%s6767_s1 + $0x1e98] sm:$0xff] }
 0x1ab   :  { %3313 = vmatprep.subr.bf16.mxu0 %v3312_v26  ;;  %v1013_v26 = vld [vmem:[%s6767_s1 + $0x1e08] sm:$0xff]  ;;  %v3334_v29 = vpack.c.bf16 %v1010_v23, %v1008_v21  ;;  %v516_v19 = vld [vmem:[%s6767_s1 + $0xe80] sm:$0xff]  ;;  %v518_v20 = vld [vmem:[%s6767_s1 + $0xe90] sm:$0xff] }
 0x1ac   :  { %v1028_v21 = vld [vmem:[%s6767_s1 + $0x1e80] sm:$0xff]  ;;  %v1030_v23 = vld [vmem:[%s6767_s1 + $0x1e90] sm:$0xff] }
 0x1ad   :  { %2803 = vmatpush1.bf16.msra.mxu1 %v2802_v32  ;;  %v502_v32 = vld [vmem:[%s6767_s1 + $0xe10] sm:$0xff] }
 0x1ae   :  { %3315 = vmatpush1.bf16.msra.mxu0 %v3314_v33  ;;  %2805 = vmatprep.subr.bf16.mxu1 %v2804_v34  ;;  %v1012_v33 = vld [vmem:[%s6767_s1 + $0x1e00] sm:$0xff]  ;;  %v3336_v34 = vpack.c.bf16 %v1015_v27, %v1013_v26  ;;  %v2826_v41 = vpack.c.bf16 %v502_v32, %v500_v31  ;;  %v1033_v26 = vld [vmem:[%s6767_s1 + $0x1ea8] sm:$0xff]  ;;  %v1035_v27 = vld [vmem:[%s6767_s1 + $0x1eb8] sm:$0xff] }
 0x1af   :  { %3317 = vmatprep.subr.bf16.mxu0 %v3316_v38  ;;  %v1017_v38 = vld [vmem:[%s6767_s1 + $0x1e28] sm:$0xff]  ;;  %v3338_v43 = vpack.c.bf16 %v1014_v35, %v1012_v33  ;;  %v520_v31 = vld [vmem:[%s6767_s1 + $0xea0] sm:$0xff]  ;;  %v522_v32 = vld [vmem:[%s6767_s1 + $0xeb0] sm:$0xff] }
 0x1b0   :  { %v3340_v48 = vpack.c.bf16 %v1019_v39, %v1017_v38  ;;  %v1032_v33 = vld [vmem:[%s6767_s1 + $0x1ea0] sm:$0xff]  ;;  %v1034_v35 = vld [vmem:[%s6767_s1 + $0x1eb0] sm:$0xff]  ;;  %v1037_v38 = vld [vmem:[%s6767_s1 + $0x1ec8] sm:$0xff] }
 0x1b1   :  { %2807 = vmatpush1.bf16.msra.mxu1 %v2806_v44  ;;  %v2828_v44 = vpack.c.bf16 %v507_v37, %v505_v36  ;;  %v525_v36 = vld [vmem:[%s6767_s1 + $0xec8] sm:$0xff]  ;;  %v527_v37 = vld [vmem:[%s6767_s1 + $0xed8] sm:$0xff] }
 0x1b2   :  { %3319 = vmatpush1.bf16.msra.mxu0 %v3318_v45  ;;  %2809 = vmatprep.subr.bf16.mxu1 %v2808_v46  ;;  %v504_v45 = vld [vmem:[%s6767_s1 + $0xe20] sm:$0xff]  ;;  %v506_v46 = vld [vmem:[%s6767_s1 + $0xe30] sm:$0xff]  ;;  %v1039_v39 = vld [vmem:[%s6767_s1 + $0x1ed8] sm:$0xff] }
 0x1b3   :  { %3321 = vmatprep.subr.bf16.mxu0 %v3320_v50  ;;  %v509_v50 = vld [vmem:[%s6767_s1 + $0xe48] sm:$0xff]  ;;  %v2830_v55 = vpack.c.bf16 %v506_v46, %v504_v45  ;;  %v1036_v45 = vld [vmem:[%s6767_s1 + $0x1ec0] sm:$0xff]  ;;  %v3360_v46 = vpack.c.bf16 %v1039_v39, %v1037_v38 }
 0x1b4   :  { %v544_v39 = vld [vmem:[%s6767_s1 + $0xf60] sm:$0xff] }
 0x1b5   :  { %2811 = vmatpush1.bf16.msra.mxu1 %v2810_v56  ;;  %v51_v56 = vld [vmem:[%s6768_s0 + $0xf8] sm:$0xff] }
 0x1b6   :  { %3323 = vmatpush1.bf16.msra.mxu0 %v3322_v57  ;;  %2813 = vmatprep.subr.bf16.mxu1 %v2812_v58  ;;  %v3342_v57 = vpack.c.bf16 %v1018_v49, %v1016_v47  ;;  %v2832_v58 = vpack.c.bf16 %v511_v51, %v509_v50  ;;  %v1038_v47 = vld [vmem:[%s6767_s1 + $0x1ed0] sm:$0xff]  ;;  %v531_v49 = vld [vmem:[%s6767_s1 + $0xef8] sm:$0xff]  ;;  %v1041_v50 = vld [vmem:[%s6767_s1 + $0x1ee8] sm:$0xff] }
 0x1b7   :  { %3325 = vmatprep.subr.bf16.mxu0 %v3324_v62  ;;  %v3344_v62 = vpack.c.bf16 %v1023_v53, %v1021_v52  ;;  %v1043_v51 = vld [vmem:[%s6767_s1 + $0x1ef8] sm:$0xff]  ;;  %v3362_v53 = vpack.c.bf16 %v1038_v47, %v1036_v45 }
 0x1b8   :  { %v551_v45 = vld [vmem:[%s6767_s1 + $0xf98] sm:$0xff] }
 0x1b9   :  { %2815 = vmatpush1.bf16.msra.mxu1 %v2814_v4  ;;  %v2834_v4 = vpack.c.bf16 %v510_v60, %v508_v59  ;;  %v1042_v59 = vld [vmem:[%s6767_s1 + $0x1ef0] sm:$0xff]  ;;  %v533_v60 = vld [vmem:[%s6767_s1 + $0xf08] sm:$0xff]  ;;  %v1063_v47 = vld [vmem:[%s6767_s1 + $0x1f98] sm:$0xff] }
 0x1ba   :  { %3327 = vmatpush1.bf16.msra.mxu0 %v3326_v5  ;;  %2817 = vmatprep.subr.bf16.mxu1 %v2816_v6  ;;  %v3346_v5 = vpack.c.bf16 %v1022_v63, %v1020_v61  ;;  %v2836_v6 = vpack.c.bf16 %v515_v1, %v513_v0  ;;  %v535_v61 = vld [vmem:[%s6767_s1 + $0xf18] sm:$0xff] }
 0x1bb   :  { %3329 = vmatprep.subr.bf16.mxu0 %v3328_v10  ;;  %v3348_v10 = vpack.c.bf16 %v1027_v3, %v1025_v2  ;;  %v1047_v63 = vld [vmem:[%s6767_s1 + $0x1f18] sm:$0xff]  ;;  %v2856_v2 = vpack.c.bf16 %v535_v61, %v533_v60  ;;  %v532_v3 = vld [vmem:[%s6767_s1 + $0xf00] sm:$0xff] }
 0x1bd   :  { %2819 = vmatpush1.bf16.msra.mxu1 %v2818_v16  ;;  %v2838_v16 = vpack.c.bf16 %v514_v8, %v512_v7  ;;  %v1046_v7 = vld [vmem:[%s6767_s1 + $0x1f10] sm:$0xff]  ;;  %v537_v8 = vld [vmem:[%s6767_s1 + $0xf28] sm:$0xff] }
 0x1be   :  { %3331 = vmatpush1.bf16.msra.mxu0 %v3330_v17  ;;  %2821 = vmatprep.subr.bf16.mxu1 %v2820_v18  ;;  %v3350_v17 = vpack.c.bf16 %v1026_v11, %v1024_v9  ;;  %v2840_v18 = vpack.c.bf16 %v519_v13, %v517_v12  ;;  %v539_v9 = vld [vmem:[%s6767_s1 + $0xf38] sm:$0xff] }
 0x1bf   :  { %3333 = vmatprep.subr.bf16.mxu0 %v3332_v22  ;;  %v3352_v22 = vpack.c.bf16 %v1031_v15, %v1029_v14  ;;  %v1051_v11 = vld [vmem:[%s6767_s1 + $0x1f38] sm:$0xff]  ;;  %v2860_v14 = vpack.c.bf16 %v539_v9, %v537_v8  ;;  %v536_v15 = vld [vmem:[%s6767_s1 + $0xf20] sm:$0xff] }
 0x1c1   :  { %2823 = vmatpush1.bf16.msra.mxu1 %v2822_v28  ;;  %v2842_v28 = vpack.c.bf16 %v518_v20, %v516_v19  ;;  %v1050_v19 = vld [vmem:[%s6767_s1 + $0x1f30] sm:$0xff]  ;;  %v541_v20 = vld [vmem:[%s6767_s1 + $0xf48] sm:$0xff] }
 0x1c2   :  { %3335 = vmatpush1.bf16.msra.mxu0 %v3334_v29  ;;  %2825 = vmatprep.subr.bf16.mxu1 %v2824_v30  ;;  %v3354_v29 = vpack.c.bf16 %v1030_v23, %v1028_v21  ;;  %v2844_v30 = vpack.c.bf16 %v523_v25, %v521_v24  ;;  %v543_v21 = vld [vmem:[%s6767_s1 + $0xf58] sm:$0xff] }
 0x1c3   :  { %3337 = vmatprep.subr.bf16.mxu0 %v3336_v34  ;;  %v3356_v34 = vpack.c.bf16 %v1035_v27, %v1033_v26  ;;  %v1055_v23 = vld [vmem:[%s6767_s1 + $0x1f58] sm:$0xff]  ;;  %v2864_v26 = vpack.c.bf16 %v543_v21, %v541_v20  ;;  %v540_v27 = vld [vmem:[%s6767_s1 + $0xf40] sm:$0xff] }
 0x1c4   :  { %1579 = vmatmul.mubr.f32.vlgmr.msra.gmra.mrb[0].mxu1 %v32_v40  ;;  %v2846_v40 = vpack.c.bf16 %v522_v32, %v520_v31  ;;  %v1054_v31 = vld [vmem:[%s6767_s1 + $0x1f50] sm:$0xff]  ;;  %v545_v32 = vld [vmem:[%s6767_s1 + $0xf68] sm:$0xff] }
 0x1c5   :  { %2827 = vmatpush1.bf16.msra.mxu1 %v2826_v41  ;;  %2147 = vmatmul.mubr.f32.vlgmr.msra.gmra.mrb[0].mxu0 %v48_v42  ;;  %v3358_v41 = vpack.c.bf16 %v1034_v35, %v1032_v33  ;;  %v2848_v42 = vpack.c.bf16 %v527_v37, %v525_v36  ;;  %v547_v33 = vld [vmem:[%s6767_s1 + $0xf78] sm:$0xff] }
 0x1c6   :  { %3339 = vmatpush1.bf16.msra.mxu0 %v3338_v43  ;;  %2829 = vmatprep.subr.bf16.mxu1 %v2828_v44  ;;  %v524_v43 = vld [vmem:[%s6767_s1 + $0xec0] sm:$0xff]  ;;  %v526_v44 = vld [vmem:[%s6767_s1 + $0xed0] sm:$0xff]  ;;  %v1059_v35 = vld [vmem:[%s6767_s1 + $0x1f78] sm:$0xff]  ;;  %v2868_v38 = vpack.c.bf16 %v547_v33, %v545_v32 }
 0x1c7   :  { %3341 = vmatprep.subr.bf16.mxu0 %v3340_v48  ;;  %1649 = vmatprep.mubr.f32.mxu1 %v35_v54  ;;  %v529_v48 = vld [vmem:[%s6767_s1 + $0xee8] sm:$0xff]  ;;  %v2850_v52 = vpack.c.bf16 %v526_v44, %v524_v43  ;;  %v1058_v43 = vld [vmem:[%s6767_s1 + $0x1f70] sm:$0xff]  ;;  %v2226_v33 = vld [vmem:[%s6769_s3] sm:$0xff] }
 0x1c8   :  { %2217 = vmatprep.mubr.f32.mxu0 %v51_v56  ;;  %v2852_v54 = vpack.c.bf16 %v531_v49, %v529_v48  ;;  %v530_v56 = vld [vmem:[%s6767_s1 + $0xef0] sm:$0xff]  ;;  %v549_v44 = vld [vmem:[%s6767_s1 + $0xf88] sm:$0xff] }
 0x1c9   :  { %2831 = vmatpush1.bf16.msra.mxu1 %v2830_v55  ;;  %v528_v55 = vld [vmem:[%s6767_s1 + $0xee0] sm:$0xff] }
 0x1ca   :  { %3343 = vmatpush1.bf16.msra.mxu0 %v3342_v57  ;;  %2833 = vmatprep.subr.bf16.mxu1 %v2832_v58  ;;  %v1040_v57 = vld [vmem:[%s6767_s1 + $0x1ee0] sm:$0xff]  ;;  %v3364_v58 = vpack.c.bf16 %v1043_v51, %v1041_v50  ;;  %v2854_v0 = vpack.c.bf16 %v530_v56, %v528_v55  ;;  %v2872_v50 = vpack.c.bf16 %v551_v45, %v549_v44  ;;  %v1062_v55 = vld [vmem:[%s6767_s1 + $0x1f90] sm:$0xff]  ;;  %v553_v56 = vld [vmem:[%s6767_s1 + $0xfa8] sm:$0xff] }
 0x1cb   :  { %3345 = vmatprep.subr.bf16.mxu0 %v3344_v62  ;;  %v1045_v62 = vld [vmem:[%s6767_s1 + $0x1f08] sm:$0xff]  ;;  %v3366_v1 = vpack.c.bf16 %v1042_v59, %v1040_v57  ;;  %v548_v51 = vld [vmem:[%s6767_s1 + $0xf80] sm:$0xff]  ;;  %v555_v57 = vld [vmem:[%s6767_s1 + $0xfb8] sm:$0xff] }
 0x1cc   :  { %v1067_v59 = vld [vmem:[%s6767_s1 + $0x1fb8] sm:$0xff]  ;;  %v2247_v44 = vld [vmem:[%s6769_s3 + $0xa8] sm:$0xff] }
 0x1cd   :  { %2835 = vmatpush1.bf16.msra.mxu1 %v2834_v4  ;;  %v534_v4 = vld [vmem:[%s6767_s1 + $0xf10] sm:$0xff] }
 0x1ce   :  { %3347 = vmatpush1.bf16.msra.mxu0 %v3346_v5  ;;  %2837 = vmatprep.subr.bf16.mxu1 %v2836_v6  ;;  %v1044_v5 = vld [vmem:[%s6767_s1 + $0x1f00] sm:$0xff]  ;;  %v3368_v6 = vpack.c.bf16 %v1047_v63, %v1045_v62  ;;  %v2858_v12 = vpack.c.bf16 %v534_v4, %v532_v3  ;;  %v2876_v62 = vpack.c.bf16 %v555_v57, %v553_v56  ;;  %v1066_v3 = vld [vmem:[%s6767_s1 + $0x1fb0] sm:$0xff]  ;;  %v557_v4 = vld [vmem:[%s6767_s1 + $0xfc8] sm:$0xff] }
 0x1cf   :  { %3349 = vmatprep.subr.bf16.mxu0 %v3348_v10  ;;  %v1049_v10 = vld [vmem:[%s6767_s1 + $0x1f28] sm:$0xff]  ;;  %v3370_v13 = vpack.c.bf16 %v1046_v7, %v1044_v5  ;;  %v552_v63 = vld [vmem:[%s6767_s1 + $0xfa0] sm:$0xff]  ;;  %v559_v5 = vld [vmem:[%s6767_s1 + $0xfd8] sm:$0xff] }
 0x1d0   :  { %v1071_v7 = vld [vmem:[%s6767_s1 + $0x1fd8] sm:$0xff]  ;;  %v2251_v56 = vld [vmem:[%s6769_s3 + $0xc8] sm:$0xff] }
 0x1d1   :  { %2839 = vmatpush1.bf16.msra.mxu1 %v2838_v16  ;;  %v538_v16 = vld [vmem:[%s6767_s1 + $0xf30] sm:$0xff] }
 0x1d2   :  { %3351 = vmatpush1.bf16.msra.mxu0 %v3350_v17  ;;  %2841 = vmatprep.subr.bf16.mxu1 %v2840_v18  ;;  %v1048_v17 = vld [vmem:[%s6767_s1 + $0x1f20] sm:$0xff]  ;;  %v3372_v18 = vpack.c.bf16 %v1051_v11, %v1049_v10  ;;  %v2862_v24 = vpack.c.bf16 %v538_v16, %v536_v15  ;;  %v2880_v10 = vpack.c.bf16 %v559_v5, %v557_v4  ;;  %v1070_v15 = vld [vmem:[%s6767_s1 + $0x1fd0] sm:$0xff]  ;;  %v561_v16 = vld [vmem:[%s6767_s1 + $0xfe8] sm:$0xff] }
 0x1d3   :  { %3353 = vmatprep.subr.bf16.mxu0 %v3352_v22  ;;  %v1053_v22 = vld [vmem:[%s6767_s1 + $0x1f48] sm:$0xff]  ;;  %v3374_v25 = vpack.c.bf16 %v1050_v19, %v1048_v17  ;;  %v556_v11 = vld [vmem:[%s6767_s1 + $0xfc0] sm:$0xff]  ;;  %v563_v17 = vld [vmem:[%s6767_s1 + $0xff8] sm:$0xff] }
 0x1d4   :  { %v1075_v19 = vld [vmem:[%s6767_s1 + $0x1ff8] sm:$0xff]  ;;  %v2254_v4 = vld [vmem:[%s6769_s3 + $0xe0] sm:$0xff]  ;;  %v2255_v5 = vld [vmem:[%s6769_s3 + $0xe8] sm:$0xff] }
 0x1d5   :  { %2843 = vmatpush1.bf16.msra.mxu1 %v2842_v28  ;;  %v542_v28 = vld [vmem:[%s6767_s1 + $0xf50] sm:$0xff] }
 0x1d6   :  { %3355 = vmatpush1.bf16.msra.mxu0 %v3354_v29  ;;  %2845 = vmatprep.subr.bf16.mxu1 %v2844_v30  ;;  %v1052_v29 = vld [vmem:[%s6767_s1 + $0x1f40] sm:$0xff]  ;;  %v3376_v30 = vpack.c.bf16 %v1055_v23, %v1053_v22  ;;  %v2866_v36 = vpack.c.bf16 %v542_v28, %v540_v27  ;;  %v2884_v22 = vpack.c.bf16 %v563_v17, %v561_v16  ;;  %v1074_v27 = vld [vmem:[%s6767_s1 + $0x1ff0] sm:$0xff]  ;;  %v1078_v16 = vlaneseq }
 0x1d7   :  { %3357 = vmatprep.subr.bf16.mxu0 %v3356_v34  ;;  %v1057_v34 = vld [vmem:[%s6767_s1 + $0x1f68] sm:$0xff]  ;;  %v3378_v37 = vpack.c.bf16 %v1054_v31, %v1052_v29  ;;  %v560_v23 = vld [vmem:[%s6767_s1 + $0xfe0] sm:$0xff] }
 0x1d8   :  { %v2242_v28 = vld [vmem:[%s6769_s3 + $0x80] sm:$0xff]  ;;  %v2243_v29 = vld [vmem:[%s6769_s3 + $0x88] sm:$0xff]  ;;  %v1079_v17 = vshrl.u32 %v1078_v16, 7 }
 0x1d9   :  { %2847 = vmatpush1.bf16.msra.mxu1 %v2846_v40  ;;  %v546_v40 = vld [vmem:[%s6767_s1 + $0xf70] sm:$0xff]  ;;  %v3400_v32 = vpack.c.bf16 %v2243_v29, %v2242_v28 }
 0x1da   :  { %3359 = vmatpush1.bf16.msra.mxu0 %v3358_v41  ;;  %2849 = vmatprep.subr.bf16.mxu1 %v2848_v42  ;;  %v1056_v41 = vld [vmem:[%s6767_s1 + $0x1f60] sm:$0xff]  ;;  %v3380_v42 = vpack.c.bf16 %v1059_v35, %v1057_v34  ;;  %v2870_v48 = vpack.c.bf16 %v546_v40, %v544_v39  ;;  %v2227_v34 = vld [vmem:[%s6769_s3 + $0x8] sm:$0xff]  ;;  %v2244_v35 = vld [vmem:[%s6769_s3 + $0x90] sm:$0xff] }
 0x1db   :  { %3361 = vmatprep.subr.bf16.mxu0 %v3360_v46  ;;  %v1061_v46 = vld [vmem:[%s6767_s1 + $0x1f88] sm:$0xff]  ;;  %v3382_v49 = vpack.c.bf16 %v1058_v43, %v1056_v41  ;;  %v50_v39 = vld [vmem:[%s6768_s0 + $0xf0] sm:$0xff]  ;;  %v2246_v43 = vld [vmem:[%s6769_s3 + $0xa0] sm:$0xff] }
 0x1dc   :  { %v2228_v41 = vld [vmem:[%s6769_s3 + $0x10] sm:$0xff] }
 0x1dd   :  { %2851 = vmatpush1.bf16.msra.mxu1 %v2850_v52  ;;  %v550_v52 = vld [vmem:[%s6767_s1 + $0xf90] sm:$0xff] }
 0x1de   :  { %3363 = vmatpush1.bf16.msra.mxu0 %v3362_v53  ;;  %2853 = vmatprep.subr.bf16.mxu1 %v2852_v54  ;;  %v1060_v53 = vld [vmem:[%s6767_s1 + $0x1f80] sm:$0xff]  ;;  %v3384_v54 = vpack.c.bf16 %v1063_v47, %v1061_v46  ;;  %v2874_v60 = vpack.c.bf16 %v550_v52, %v548_v51  ;;  %v3408_v46 = vpack.c.bf16 %v2247_v44, %v2246_v43 }
 0x1df   :  { %3365 = vmatprep.subr.bf16.mxu0 %v3364_v58  ;;  %v1065_v58 = vld [vmem:[%s6767_s1 + $0x1fa8] sm:$0xff]  ;;  %v3386_v61 = vpack.c.bf16 %v1062_v55, %v1060_v53  ;;  %v2230_v47 = vld [vmem:[%s6769_s3 + $0x20] sm:$0xff]  ;;  %v2232_v53 = vld [vmem:[%s6769_s3 + $0x30] sm:$0xff] }
 0x1e0   :  { %v2250_v55 = vld [vmem:[%s6769_s3 + $0xc0] sm:$0xff] }
 0x1e1   :  { %2855 = vmatpush1.bf16.msra.mxu1 %v2854_v0  ;;  %v554_v0 = vld [vmem:[%s6767_s1 + $0xfb0] sm:$0xff] }
 0x1e2   :  { %3367 = vmatpush1.bf16.msra.mxu0 %v3366_v1  ;;  %2857 = vmatprep.subr.bf16.mxu1 %v2856_v2  ;;  %v1064_v1 = vld [vmem:[%s6767_s1 + $0x1fa0] sm:$0xff]  ;;  %v3388_v2 = vpack.c.bf16 %v1067_v59, %v1065_v58  ;;  %v2878_v8 = vpack.c.bf16 %v554_v0, %v552_v63  ;;  %v3416_v58 = vpack.c.bf16 %v2251_v56, %v2250_v55 }
 0x1e3   :  { %3369 = vmatprep.subr.bf16.mxu0 %v3368_v6  ;;  %v1069_v6 = vld [vmem:[%s6767_s1 + $0x1fc8] sm:$0xff]  ;;  %v3390_v9 = vpack.c.bf16 %v1066_v3, %v1064_v1  ;;  %v2234_v59 = vld [vmem:[%s6769_s3 + $0x40] sm:$0xff]  ;;  %v2236_v1 = vld [vmem:[%s6769_s3 + $0x50] sm:$0xff] }
 0x1e5   :  { %2859 = vmatpush1.bf16.msra.mxu1 %v2858_v12  ;;  %v558_v12 = vld [vmem:[%s6767_s1 + $0xfd0] sm:$0xff] }
 0x1e6   :  { %3371 = vmatpush1.bf16.msra.mxu0 %v3370_v13  ;;  %2861 = vmatprep.subr.bf16.mxu1 %v2860_v14  ;;  %v1068_v13 = vld [vmem:[%s6767_s1 + $0x1fc0] sm:$0xff]  ;;  %v3392_v14 = vpack.c.bf16 %v1071_v7, %v1069_v6  ;;  %v2882_v20 = vpack.c.bf16 %v558_v12, %v556_v11  ;;  %v3424_v6 = vpack.c.bf16 %v2255_v5, %v2254_v4  ;;  %v2257_v11 = vld [vmem:[%s6769_s3 + $0xf8] sm:$0xff] }
 0x1e7   :  { %3373 = vmatprep.subr.bf16.mxu0 %v3372_v18  ;;  %v1073_v18 = vld [vmem:[%s6767_s1 + $0x1fe8] sm:$0xff]  ;;  %v3394_v21 = vpack.c.bf16 %v1070_v15, %v1068_v13  ;;  %v2238_v7 = vld [vmem:[%s6769_s3 + $0x60] sm:$0xff]  ;;  %v2240_v13 = vld [vmem:[%s6769_s3 + $0x70] sm:$0xff] }
 0x1e9   :  { %2863 = vmatpush1.bf16.msra.mxu1 %v2862_v24  ;;  %v562_v24 = vld [vmem:[%s6767_s1 + $0xff0] sm:$0xff] }
 0x1ea   :  { %3375 = vmatpush1.bf16.msra.mxu0 %v3374_v25  ;;  %2865 = vmatprep.subr.bf16.mxu1 %v2864_v26  ;;  %v1072_v25 = vld [vmem:[%s6767_s1 + $0x1fe0] sm:$0xff]  ;;  %v3396_v26 = vpack.c.bf16 %v1075_v19, %v1073_v18  ;;  %v1080_v18 = vsub.s32 0, %v1079_v17 }
 0x1eb   :  { %3377 = vmatprep.subr.bf16.mxu0 %v3376_v30  ;;  %v2886_v30 = vpack.c.bf16 %v562_v24, %v560_v23  ;;  %v3398_v31 = vpack.c.bf16 %v1074_v27, %v1072_v25  ;;  %v1076_v19 = vld [vmem:[%s6770_s2] sm:$0x3] }
 0x1ed   :  { %2867 = vmatpush1.bf16.msra.mxu1 %v2866_v36  ;;  %v2245_v36 = vld [vmem:[%s6769_s3 + $0x98] sm:$0xff] }
 0x1ee   :  { %3379 = vmatpush1.bf16.msra.mxu0 %v3378_v37  ;;  %2869 = vmatprep.subr.bf16.mxu1 %v2868_v38  ;;  %v34_v37 = vld [vmem:[%s6768_s0 + $0x70] sm:$0xff]  ;;  %v3402_v38 = vpack.c.bf16 %v2227_v34, %v2226_v33  ;;  %v3404_v40 = vpack.c.bf16 %v2245_v36, %v2244_v35  ;;  %v2340_v34 = vld [vmem:[%s6771_s4] ss:$0 sm:$0xff] }
 0x1ef   :  { %3381 = vmatprep.subr.bf16.mxu0 %v3380_v42  ;;  %v2229_v42 = vld [vmem:[%s6769_s3 + $0x18] sm:$0xff] }
 0x1f0   :  { %v3406_v45 = vpack.c.bf16 %v2229_v42, %v2228_v41 }
 0x1f1   :  { %2871 = vmatpush1.bf16.msra.mxu1 %v2870_v48  ;;  %v2231_v48 = vld [vmem:[%s6769_s3 + $0x28] sm:$0xff] }
 0x1f2   :  { %3383 = vmatpush1.bf16.msra.mxu0 %v3382_v49  ;;  %2873 = vmatprep.subr.bf16.mxu1 %v2872_v50  ;;  %v2248_v49 = vld [vmem:[%s6769_s3 + $0xb0] sm:$0xff]  ;;  %v2249_v50 = vld [vmem:[%s6769_s3 + $0xb8] sm:$0xff]  ;;  %v3410_v51 = vpack.c.bf16 %v2231_v48, %v2230_v47 }
 0x1f3   :  { %3385 = vmatprep.subr.bf16.mxu0 %v3384_v54  ;;  %v3412_v52 = vpack.c.bf16 %v2249_v50, %v2248_v49  ;;  %v2233_v54 = vld [vmem:[%s6769_s3 + $0x38] sm:$0xff] }
 0x1f4   :  { %v3414_v57 = vpack.c.bf16 %v2233_v54, %v2232_v53 }
 0x1f5   :  { %2875 = vmatpush1.bf16.msra.mxu1 %v2874_v60  ;;  %v2235_v60 = vld [vmem:[%s6769_s3 + $0x48] sm:$0xff] }
 0x1f6   :  { %3387 = vmatpush1.bf16.msra.mxu0 %v3386_v61  ;;  %2877 = vmatprep.subr.bf16.mxu1 %v2876_v62  ;;  %v2252_v61 = vld [vmem:[%s6769_s3 + $0xd0] sm:$0xff]  ;;  %v2253_v62 = vld [vmem:[%s6769_s3 + $0xd8] sm:$0xff]  ;;  %v3418_v63 = vpack.c.bf16 %v2235_v60, %v2234_v59 }
 0x1f7   :  { %3389 = vmatprep.subr.bf16.mxu0 %v3388_v2  ;;  %v3420_v0 = vpack.c.bf16 %v2253_v62, %v2252_v61  ;;  %v2237_v2 = vld [vmem:[%s6769_s3 + $0x58] sm:$0xff] }
 0x1f8   :  { %v3422_v3 = vpack.c.bf16 %v2237_v2, %v2236_v1 }
 0x1f9   :  { %2879 = vmatpush1.bf16.msra.mxu1 %v2878_v8  ;;  %v2239_v8 = vld [vmem:[%s6769_s3 + $0x68] sm:$0xff] }
 0x1fa   :  { %3391 = vmatpush1.bf16.msra.mxu0 %v3390_v9  ;;  %2881 = vmatprep.subr.bf16.mxu1 %v2880_v10  ;;  %v3426_v9 = vpack.c.bf16 %v2239_v8, %v2238_v7  ;;  %v2256_v10 = vld [vmem:[%s6769_s3 + $0xf0] sm:$0xff] }
 0x1fb   :  { %3393 = vmatprep.subr.bf16.mxu0 %v3392_v14  ;;  %v3428_v12 = vpack.c.bf16 %v2257_v11, %v2256_v10  ;;  %v2241_v14 = vld [vmem:[%s6769_s3 + $0x78] sm:$0xff] }
 0x1fc   :  { %v3430_v15 = vpack.c.bf16 %v2241_v14, %v2240_v13 }
 0x1fd   :  { %2883 = vmatpush1.bf16.msra.mxu1 %v2882_v20  ;;  %v1084_v20 = vsub.s32 1, %v1079_v17 }
 0x1fe   :  { %3395 = vmatpush1.bf16.msra.mxu0 %v3394_v21  ;;  %2885 = vmatprep.subr.bf16.mxu1 %v2884_v22  ;;  %v1081_v21 = vrot.slane %v1076_v19, %v1080_v18 }
 0x1ff   :  { %3397 = vmatprep.subr.bf16.mxu0 %v3396_v26  ;;  %v1085_v22 = vrot.slane %v1076_v19, %v1084_v20 }
 0x201   :  { %2887 = vmatpush1.bf16.msra.mxu1 %v2886_v30 }
 0x202   :  { %3399 = vmatpush1.bf16.msra.mxu0 %v3398_v31  ;;  %3401 = vmatprep.subr.bf16.mxu1 %v3400_v32 }
 0x204   :  { %1650 = vmatmul.mubr.f32.vlgmr.msra.gmra.mrb[0].mxu1 %v34_v37 }
 0x205   :  { %2218 = vmatmul.mubr.f32.vlgmr.msra.gmra.mrb[0].mxu0 %v50_v39  ;;  %3403 = vmatpush3.bf16.msra.mxu1 %v3402_v38 }
 0x206   :  { %3405 = vmatprep.subr.bf16.mxu1 %v3404_v40 }
 0x209   :  { %3407 = vmatpush3.bf16.msra.mxu1 %v3406_v45 }
 0x20a   :  { %3409 = vmatprep.subr.bf16.mxu1 %v3408_v46 }
 0x20d   :  { %3411 = vmatpush3.bf16.msra.mxu1 %v3410_v51 }
 0x20e   :  { %3413 = vmatprep.subr.bf16.mxu1 %v3412_v52 }
 0x211   :  { %3415 = vmatpush3.bf16.msra.mxu1 %v3414_v57 }
 0x212   :  { %3417 = vmatprep.subr.bf16.mxu1 %v3416_v58 }
 0x215   :  { %3419 = vmatpush3.bf16.msra.mxu1 %v3418_v63 }
 0x216   :  { %3421 = vmatprep.subr.bf16.mxu1 %v3420_v0 }
 0x219   :  { %3423 = vmatpush3.bf16.msra.mxu1 %v3422_v3 }
 0x21a   :  { %3425 = vmatprep.subr.bf16.mxu1 %v3424_v6 }
 0x21d   :  { %3427 = vmatpush3.bf16.msra.mxu1 %v3426_v9 }
 0x21e   :  { %3429 = vmatprep.subr.bf16.mxu1 %v3428_v12 }
 0x221   :  { %3431 = vmatpush3.bf16.msra.mxu1 %v3430_v15 }
 0x2d7   :  { %v1651_v23 = vpop.f32.mrb[0].mxu1 }
 0x2d8   :  { %v3432_v24 = vadd.f32 %v1651_v23, %v1081_v21  ;;  %v2219_v25 = vpop.f32.mrb[0].mxu0  ;;  %v1653_v26 = vpop.f32.mrb[1].mxu1 }
 0x2d9   :  { %v3434_v27 = vadd.f32 %v1653_v26, %v1085_v22  ;;  %v2221_v28 = vpop.f32.mrb[1].mxu0 }
 0x2da   :  { %v3433_v29 = vadd.f32 %v3432_v24, %v2219_v25 }
 0x2db   :  { %v3435_v30 = vadd.f32 %v3434_v27, %v2221_v28 }
 0x2dc   :  { %v2224_v32 = vmax.f32 %v3433_v29, 0.0 }
 0x2dd   :  { %v2225_v31 = vmax.f32 %v3435_v30, 0.0 }
 0x2df   :  { %2329 = vmatprep.mubr.f32.mxu1 %v2225_v31 }
 0x2e0   :  { %2330 = vmatmul.mubr.f32.vlgmr.msra.gmra.mrb[2].mxu1 %v2224_v32 }
 0x3b3   :  { %v2373_v33 = vpop.f32.mrb[2].mxu1 }
 0x3b4   :  { %v2374_v35 = vpop.f32.mrb[3].mxu1 }
 0x3b5   :  { %v2375_v36 = vadd.f32 %v2374_v35, %v2373_v33 }
 0x3b7   :  { %v2332_v37 = vadd.f32 %v2375_v36, %v2340_v34 }
 0x3b9   :  { %2335 = vst [vmem:[%s6772_s5] sm:$0xff] %v2332_v37 }

</bundles_post_ra>
